<compile_context>
chip_gen: v6e
topology: v6e:2x2x1
jax: 0.10.0
libtpu: 0.0.40
codegen_flags: <defaults>
</compile_context>

<pallas_src>
import functools

import jax
import jax.numpy as jnp
import numpy as np
from jax.experimental import pallas as pl
from jax.experimental.pallas import tpu as pltpu

_LANE = 128      # channel tiles are padded to multiples of the 128-lane vreg width
_SUBLANE = 8


def _round_up(x, m):
    return (x + m - 1) // m * m


def _largest_divisor(n, candidates):
    for c in candidates:
        if c <= n and n % c == 0:
            return c
    return n


def _vmem_limit(nbytes):
    # Explicit scoped-VMEM budget: >= 32 MiB default, capped well under v7x's 64 MiB physical.
    return int(min(48 * 1024 * 1024, max(32 * 1024 * 1024, 2 * nbytes)))


# --------------------------------------------------------------------------------------
# 1x1 conv + folded BN + LeakyReLU  == tiled matmul with fused epilogue
# --------------------------------------------------------------------------------------
def _mm_bn_leaky_kernel(x_ref, w_ref, scale_ref, bias_ref, o_ref, acc_ref, *, neg_slope):
    k = pl.program_id(2)

    @pl.when(k == 0)
    def _():
        acc_ref[...] = jnp.zeros_like(acc_ref)

    acc_ref[...] += jnp.dot(x_ref[...], w_ref[...], preferred_element_type=jnp.float32)

    @pl.when(k == pl.num_programs(2) - 1)
    def _():
        y = acc_ref[...] * scale_ref[...] + bias_ref[...]     # folded BatchNorm
        y = jnp.where(y >= 0, y, neg_slope * y)               # LeakyReLU(0.01)
        o_ref[...] = y.astype(o_ref.dtype)


def _conv1x1_bn_leaky(x, w, scale, bias, *, neg_slope):
    """x: (N,H,W,Cin_p) NHWC channel-padded. w: (Cin_p, Cout_p). scale/bias: (1, Cout_p) f32."""
    N, H, W, Cin = x.shape
    Cout = w.shape[1]
    M = N * H * W
    xm = x.reshape(M, Cin)                      # contiguous NHWC -> free reshape

    tm = _largest_divisor(M, [2048, 1024, 512, 256, 128, 64, 32, 16, 8])
    tk = _largest_divisor(Cin, [512, 256, 128])
    tc = _largest_divisor(Cout, [256, 128])
    grid = (M // tm, Cout // tc, Cin // tk)

    itemsize = x.dtype.itemsize
    vmem_need = (2 * (tm * tk + tk * tc + tm * tc + 2 * tc)) * itemsize + tm * tc * 4
    cost = pl.CostEstimate(
        flops=int(2 * M * Cin * Cout),
        transcendentals=0,
        bytes_accessed=int((M * Cin + Cin * Cout + M * Cout) * itemsize),
    )

    out = pl.pallas_call(
        functools.partial(_mm_bn_leaky_kernel, neg_slope=neg_slope),
        out_shape=jax.ShapeDtypeStruct((M, Cout), x.dtype),
        grid_spec=pltpu.PrefetchScalarGridSpec(
            num_scalar_prefetch=0,
            grid=grid,
            in_specs=[
                pl.BlockSpec((tm, tk), lambda i, j, k: (i, k)),
                pl.BlockSpec((tk, tc), lambda i, j, k: (k, j)),
                pl.BlockSpec((1, tc), lambda i, j, k: (0, j)),
                pl.BlockSpec((1, tc), lambda i, j, k: (0, j)),
            ],
            out_specs=pl.BlockSpec((tm, tc), lambda i, j, k: (i, j)),
            scratch_shapes=[pltpu.VMEM((tm, tc), jnp.float32)],
        ),
        compiler_params=pltpu.CompilerParams(
            dimension_semantics=("parallel", "parallel", "arbitrary"),
            vmem_limit_bytes=_vmem_limit(vmem_need),
        ),
        cost_estimate=cost,
    )(xm, w, scale, bias)

    return out.reshape(N, H, W, Cout)


# --------------------------------------------------------------------------------------
# 3x3 conv (stride 1, pad 1) + folded BN + LeakyReLU
#   * input lives in HBM (pl.ANY); each grid step DMAs only its (TH+2)-row halo strip
#   * conv == 9 shifted matmuls on a width-flattened buffer with Wp % 8 == 0
# --------------------------------------------------------------------------------------
def _conv3x3_bn_leaky_kernel(x_hbm, w_ref, scale_ref, bias_ref, o_ref, xbuf, sem,
                             *, th, hp, wp, wo, neg_slope):
    n = pl.program_id(0)
    r = pl.program_id(1)
    cin = xbuf.shape[-1]
    tc = o_ref.shape[-1]
    rows = (th + 2) * wp                       # halo strip: TH + (KH-1) padded rows

    # Manual halo DMA: rows [r*TH, r*TH + TH + 2) of this image, width-flattened.
    # Start/length are multiples of 8 because wp % 8 == 0.
    start = pl.multiple_of(n * (hp * wp) + r * (th * wp), _SUBLANE)
    # Zero the small over-read tail (only feeds output columns that are sliced off).
    xbuf[rows:, :] = jnp.zeros((_SUBLANE, cin), xbuf.dtype)
    cp = pltpu.make_async_copy(x_hbm.at[pl.ds(start, rows), :],
                               xbuf.at[pl.ds(0, rows), :], sem)
    cp.start()
    cp.wait()

    acc = jnp.zeros((th * wp, tc), jnp.float32)
    for i in range(3):                         # kernel row
        for j in range(3):                     # kernel col: static shifted slice, no reshape
            strip = xbuf[i * wp + j:i * wp + j + th * wp, :]
            acc = acc + jnp.dot(strip, w_ref[i, j], preferred_element_type=jnp.float32)

    y = acc * scale_ref[...] + bias_ref[...]                  # folded BatchNorm
    y = jnp.where(y >= 0, y, neg_slope * y)                   # LeakyReLU(0.01)
    o_ref[0] = y.reshape(th, wp, tc)[:, :wo, :].astype(o_ref.dtype)


def _pick_row_tile(ho, wp, cin, tc, itemsize,
                   max_in_bytes=4 * 1024 * 1024, max_acc_bytes=2 * 1024 * 1024):
    best = 1
    for th in range(1, ho + 1):
        if ho % th:
            continue
        in_bytes = (th + 2) * wp * cin * itemsize
        acc_bytes = th * wp * tc * 4
        if in_bytes <= max_in_bytes and acc_bytes <= max_acc_bytes:
            best = th
    return best


def _conv3x3_bn_leaky(x, w, scale, bias, *, neg_slope, row_tile=None):
    """x: (N,H,W,Cin_p). w: (3,3,Cin_p,Cout_p). scale/bias: (1,Cout_p) f32. stride 1 / pad 1."""
    N, H, W, Cin = x.shape
    Cout = w.shape[-1]
    Ho, Wo = H, W
    Hp = H + 2
    Wp = _round_up(W + 2, _SUBLANE)            # left pad 1, right pad >= 1, sublane aligned

    # spatial zero pad (once), then flatten (N, Hp, Wp, C) -> (N*Hp*Wp, C): free reshape
    xp = jnp.pad(x, ((0, 0), (1, 1), (1, Wp - W - 1), (0, 0)))
    xf = xp.reshape(N * Hp * Wp, Cin)

    itemsize = x.dtype.itemsize
    tc = _largest_divisor(Cout, [256, 128])
    th = row_tile if row_tile is not None else _pick_row_tile(Ho, Wp, Cin, tc, itemsize)
    assert Ho % th == 0, "row tile must divide the output height"

    grid = (N, Ho // th, Cout // tc)

    vmem_need = (((th + 2) * Wp + _SUBLANE) * Cin * itemsize          # halo scratch
                 + 2 * (9 * Cin * tc + th * Wo * tc + 2 * tc) * itemsize
                 + th * Wp * tc * 4)                                  # accumulator
    cost = pl.CostEstimate(
        flops=int(2 * N * Ho * Wp * 9 * Cin * Cout),
        transcendentals=0,
        bytes_accessed=int((N * Hp * Wp * Cin + 9 * Cin * Cout + N * Ho * Wo * Cout) * itemsize),
    )

    return pl.pallas_call(
        functools.partial(_conv3x3_bn_leaky_kernel, th=th, hp=Hp, wp=Wp, wo=Wo,
                          neg_slope=neg_slope),
        out_shape=jax.ShapeDtypeStruct((N, Ho, Wo, Cout), x.dtype),
        grid_spec=pltpu.PrefetchScalarGridSpec(
            num_scalar_prefetch=0,
            grid=grid,
            in_specs=[
                pl.BlockSpec(memory_space=pl.ANY),                       # stays in HBM
                pl.BlockSpec((3, 3, Cin, tc), lambda n, r, c: (0, 0, 0, c)),
                pl.BlockSpec((1, tc), lambda n, r, c: (0, c)),
                pl.BlockSpec((1, tc), lambda n, r, c: (0, c)),
            ],
            out_specs=pl.BlockSpec((1, th, Wo, tc), lambda n, r, c: (n, r, 0, c)),
            scratch_shapes=[
                pltpu.VMEM(((th + 2) * Wp + _SUBLANE, Cin), x.dtype),
                pltpu.SemaphoreType.DMA(()),
            ],
        ),
        compiler_params=pltpu.CompilerParams(
            dimension_semantics=("parallel", "parallel", "parallel"),
            vmem_limit_bytes=_vmem_limit(vmem_need),
        ),
        cost_estimate=cost,
    )(xf, w, scale, bias)


# --------------------------------------------------------------------------------------
# DarknetLoopBlock forward (inference semantics)
# --------------------------------------------------------------------------------------
def darknet_loop_block(x_nchw, layers, *, eps=1e-5, neg_slope=0.01, row_tile_3x3=None):
    """layers: list of dicts with 'weight' (OIHW), 'gamma', 'beta', 'mean', 'var'.
    Input/output are NCHW (PyTorch convention); all intermediate work is NHWC,
    channel-padded to a multiple of 128 lanes (single transpose/pad per block)."""
    N, C, H, W = x_nchw.shape
    x = jnp.transpose(x_nchw, (0, 2, 3, 1))                        # NHWC, once per block
    cur_c, cur_cp = C, _round_up(C, _LANE)
    if cur_cp != C:
        x = jnp.pad(x, ((0, 0), (0, 0), (0, 0), (0, cur_cp - C)))

    for p in layers:
        wt = p["weight"]
        cout, cin, kh, kw = wt.shape
        assert (kh, kw) in ((1, 1), (3, 3)) and cin == cur_c
        cout_p = _round_up(cout, _LANE)

        # fold BN (eval) into per-channel scale/bias; pad channels with zeros
        scale = p["gamma"] / jnp.sqrt(p["var"] + eps)
        bias = p["beta"] - p["mean"] * scale
        scale = jnp.pad(scale, (0, cout_p - cout)).reshape(1, cout_p).astype(jnp.float32)
        bias = jnp.pad(bias, (0, cout_p - cout)).reshape(1, cout_p).astype(jnp.float32)

        # HWIO weight in the activation dtype (no f32 up-cast), zero-padded channels
        w = jnp.transpose(wt, (2, 3, 1, 0)).astype(x.dtype)
        w = jnp.pad(w, ((0, 0), (0, 0), (0, cur_cp - cin), (0, cout_p - cout)))

        if kh == 1:
            x = _conv1x1_bn_leaky(x, w[0, 0], scale, bias, neg_slope=neg_slope)
        else:
            x = _conv3x3_bn_leaky(x, w, scale, bias, neg_slope=neg_slope,
                                  row_tile=row_tile_3x3)
        cur_c, cur_cp = cout, cout_p

    x = x[..., :cur_c]
    return jnp.transpose(x, (0, 3, 1, 2))                           # back to NCHW, once


def _reference_forward(x_nchw, layers, eps=1e-5, neg_slope=0.01):
    """Pure-JAX reference mirroring the PyTorch eval-mode forward."""
    y = x_nchw
    for p in layers:
        wt = p["weight"]
        k = wt.shape[-1]
        pad = (k - 1) // 2
        y = jax.lax.conv_general_dilated(
            y, wt, window_strides=(1, 1), padding=((pad, pad), (pad, pad)),
            dimension_numbers=("NCHW", "OIHW", "NCHW"))
        s = p["gamma"] / jnp.sqrt(p["var"] + eps)
        b = p["beta"] - p["mean"] * s
        y = y * s.reshape(1, -1, 1, 1) + b.reshape(1, -1, 1, 1)
        y = jnp.where(y >= 0, y, neg_slope * y)
    return y


if __name__ == "__main__":
    key = jax.random.PRNGKey(0)
    in_ch, out_ch, rep = 4, 8, 3          # DarknetLoopBlock(in_ch=4, out_ch=8, rep=3)
    N, H, W = 2, 16, 16

    keys = jax.random.split(key, 1 + 5 * rep)
    x = jax.random.normal(keys[0], (N, in_ch, H, W), jnp.float32)

    layers = []
    for idx in range(1, rep + 1):
        if idx % 2 == 1:
            ci, co, k = in_ch, out_ch, 1      # 1x1, pad 0
        else:
            ci, co, k = out_ch, in_ch, 3      # 3x3, pad 1
        kk = keys[1 + 5 * (idx - 1):1 + 5 * idx]
        layers.append(dict(
            weight=jax.random.normal(kk[0], (co, ci, k, k), jnp.float32) * 0.1,
            gamma=jax.random.normal(kk[1], (co,), jnp.float32) * 0.1 + 1.0,
            beta=jax.random.normal(kk[2], (co,), jnp.float32) * 0.1,
            mean=jax.random.normal(kk[3], (co,), jnp.float32) * 0.1,
            var=jax.random.uniform(kk[4], (co,), jnp.float32, 0.5, 1.5),
        ))

    # row_tile_3x3=8 forces two row tiles at this small demo size so the halo-DMA
    # path (r > 0) is exercised; at real Darknet sizes the budget-based chooser runs.
    fwd = jax.jit(functools.partial(darknet_loop_block, row_tile_3x3=8))
    out = jax.block_until_ready(fwd(x, layers))

    ref = _reference_forward(x, layers)
    np.testing.assert_allclose(np.asarray(out), np.asarray(ref), rtol=1e-3, atol=1e-4)

    print("KERNEL_OK")
</pallas_src>

<mosaic_0001>
module attributes {stable_mosaic.version = 11 : i64} {
  func.func @_mm_bn_leaky_kernel(%arg0: i32, %arg1: i32, %arg2: i32, %arg3: memref<512x128xf32, #tpu.memory_space<vmem>>, %arg4: memref<128x128xf32, #tpu.memory_space<vmem>>, %arg5: memref<1x128xf32, #tpu.memory_space<vmem>>, %arg6: memref<1x128xf32, #tpu.memory_space<vmem>>, %arg7: memref<512x128xf32, #tpu.memory_space<vmem>>, %arg8: memref<512x128xf32, #tpu.memory_space<vmem>>) attributes {dimension_semantics = [#tpu.dimension_semantics<parallel>, #tpu.dimension_semantics<parallel>, #tpu.dimension_semantics<arbitrary>], iteration_bounds = array<i64: 1, 1, 1>, scalar_prefetch = 0 : i64, scratch_operands = 1 : i64, tpu.core_type = #tpu.core_type<tc>, window_params = [{transform_indices = @transform_0, window_bounds = array<i64: 512, 128>}, {transform_indices = @transform_1, window_bounds = array<i64: 128, 128>}, {transform_indices = @transform_2, window_bounds = array<i64: 1, 128>}, {transform_indices = @transform_3, window_bounds = array<i64: 1, 128>}, {transform_indices = @transform_4, window_bounds = array<i64: 512, 128>}]} {
    %c0_i32 = arith.constant 0 : i32
    %0 = arith.cmpi eq, %arg2, %c0_i32 : i32
    %1 = arith.extui %0 : i1 to i32
    %c0_i32_0 = arith.constant 0 : i32
    %2 = arith.cmpi ne, %1, %c0_i32_0 : i32
    scf.if %2 {
      %cst_10 = arith.constant 0.000000e+00 : f32
      %12 = vector.broadcast %cst_10 : f32 to vector<512x128xf32>
      %c0_11 = arith.constant 0 : index
      %c0_12 = arith.constant 0 : index
      %13 = vector.load %arg8[%c0_11, %c0_12] : memref<512x128xf32, #tpu.memory_space<vmem>>, vector<512x128xf32>
      tpu.vector_store %arg8[%c0_11, %c0_12], %12 {strides = array<i32>} : memref<512x128xf32, #tpu.memory_space<vmem>>, vector<512x128xf32>,
    } else {
    }
    %c0 = arith.constant 0 : index
    %c0_1 = arith.constant 0 : index
    %3 = vector.load %arg8[%c0, %c0_1] : memref<512x128xf32, #tpu.memory_space<vmem>>, vector<512x128xf32>
    %c0_2 = arith.constant 0 : index
    %c0_3 = arith.constant 0 : index
    %4 = vector.load %arg3[%c0_2, %c0_3] : memref<512x128xf32, #tpu.memory_space<vmem>>, vector<512x128xf32>
    %c0_4 = arith.constant 0 : index
    %c0_5 = arith.constant 0 : index
    %5 = vector.load %arg4[%c0_4, %c0_5] : memref<128x128xf32, #tpu.memory_space<vmem>>, vector<128x128xf32>
    %cst = arith.constant dense<0.000000e+00> : vector<512x128xf32>
    %6 = tpu.matmul %4, %5, %cst {dimension_numbers = #tpu.dot_dimension_numbers<[1], [0], [0], [1], [0, 0, 1, 1], [], []>} : vector<512x128xf32>, vector<128x128xf32>, vector<512x128xf32> -> vector<512x128xf32>
    %7 = arith.addf %3, %6 : vector<512x128xf32>
    %c0_6 = arith.constant 0 : index
    %c0_7 = arith.constant 0 : index
    %8 = vector.load %arg8[%c0_6, %c0_7] : memref<512x128xf32, #tpu.memory_space<vmem>>, vector<512x128xf32>
    tpu.vector_store %arg8[%c0_6, %c0_7], %7 {strides = array<i32>} : memref<512x128xf32, #tpu.memory_space<vmem>>, vector<512x128xf32>,
    %c0_i32_8 = arith.constant 0 : i32
    %9 = arith.cmpi eq, %arg2, %c0_i32_8 : i32
    %10 = arith.extui %9 : i1 to i32
    %c0_i32_9 = arith.constant 0 : i32
    %11 = arith.cmpi ne, %10, %c0_i32_9 : i32
    scf.if %11 {
      %c0_10 = arith.constant 0 : index
      %c0_11 = arith.constant 0 : index
      %12 = vector.load %arg8[%c0_10, %c0_11] : memref<512x128xf32, #tpu.memory_space<vmem>>, vector<512x128xf32>
      %c0_12 = arith.constant 0 : index
      %c0_13 = arith.constant 0 : index
      %13 = vector.load %arg5[%c0_12, %c0_13] : memref<1x128xf32, #tpu.memory_space<vmem>>, vector<1x128xf32>
      %14 = vector.broadcast %13 : vector<1x128xf32> to vector<512x128xf32>
      %15 = arith.mulf %12, %14 : vector<512x128xf32>
      %c0_14 = arith.constant 0 : index
      %c0_15 = arith.constant 0 : index
      %16 = vector.load %arg6[%c0_14, %c0_15] : memref<1x128xf32, #tpu.memory_space<vmem>>, vector<1x128xf32>
      %17 = vector.broadcast %16 : vector<1x128xf32> to vector<512x128xf32>
      %18 = arith.addf %15, %17 : vector<512x128xf32>
      %cst_16 = arith.constant 0.000000e+00 : f32
      %19 = vector.broadcast %cst_16 : f32 to vector<512x128xf32>
      %20 = arith.cmpf oge, %18, %19 : vector<512x128xf32>
      %cst_17 = arith.constant 0.00999999977 : f32
      %21 = vector.broadcast %cst_17 : f32 to vector<512x128xf32>
      %22 = arith.mulf %21, %18 : vector<512x128xf32>
      %23 = arith.select %20, %18, %22 : vector<512x128xi1>, vector<512x128xf32>
      %c0_18 = arith.constant 0 : index
      %c0_19 = arith.constant 0 : index
      %24 = vector.load %arg7[%c0_18, %c0_19] : memref<512x128xf32, #tpu.memory_space<vmem>>, vector<512x128xf32>
      tpu.vector_store %arg7[%c0_18, %c0_19], %23 {strides = array<i32>} : memref<512x128xf32, #tpu.memory_space<vmem>>, vector<512x128xf32>,
    } else {
    }
    return
  }
  func.func @transform_0(%arg0: i32, %arg1: i32, %arg2: i32) -> (i32, i32) {
    %c0_i32 = arith.constant 0 : i32
    return %arg0, %arg2 : i32, i32
  }
  func.func @transform_1(%arg0: i32, %arg1: i32, %arg2: i32) -> (i32, i32) {
    %c0_i32 = arith.constant 0 : i32
    return %arg2, %arg1 : i32, i32
  }
  func.func @transform_2(%arg0: i32, %arg1: i32, %arg2: i32) -> (i32, i32) {
    %c0_i32 = arith.constant 0 : i32
    %c0_i32_0 = arith.constant 0 : i32
    return %c0_i32, %arg1 : i32, i32
  }
  func.func @transform_3(%arg0: i32, %arg1: i32, %arg2: i32) -> (i32, i32) {
    %c0_i32 = arith.constant 0 : i32
    %c0_i32_0 = arith.constant 0 : i32
    return %c0_i32, %arg1 : i32, i32
  }
  func.func @transform_4(%arg0: i32, %arg1: i32, %arg2: i32) -> (i32, i32) {
    %c0_i32 = arith.constant 0 : i32
    return %arg0, %arg1 : i32, i32
  }
}

module attributes {stable_mosaic.version = 11 : i64} {
  func.func @_conv3x3_bn_leaky_kernel(%arg0: i32, %arg1: i32, %arg2: i32, %arg3: memref<864x128xf32, #tpu.memory_space<any>>, %arg4: memref<3x3x128x128xf32, #tpu.memory_space<vmem>>, %arg5: memref<1x128xf32, #tpu.memory_space<vmem>>, %arg6: memref<1x128xf32, #tpu.memory_space<vmem>>, %arg7: memref<1x8x16x128xf32, #tpu.memory_space<vmem>>, %arg8: memref<248x128xf32, #tpu.memory_space<vmem>>, %arg9: memref<!tpu.dma_semaphore, #tpu.memory_space<semaphore_mem>>) attributes {dimension_semantics = [#tpu.dimension_semantics<parallel>, #tpu.dimension_semantics<parallel>, #tpu.dimension_semantics<parallel>], iteration_bounds = array<i64: 2, 2, 1>, scalar_prefetch = 0 : i64, scratch_operands = 2 : i64, tpu.core_type = #tpu.core_type<tc>, window_params = [{}, {transform_indices = @transform_1, window_bounds = array<i64: 3, 3, 128, 128>}, {transform_indices = @transform_2, window_bounds = array<i64: 1, 128>}, {transform_indices = @transform_3, window_bounds = array<i64: 1, 128>}, {transform_indices = @transform_4, window_bounds = array<i64: 1, 8, 16, 128>}]} {
    %c432_i32 = arith.constant 432 : i32
    %0 = arith.muli %arg0, %c432_i32 : i32
    %c192_i32 = arith.constant 192 : i32
    %1 = arith.muli %arg1, %c192_i32 : i32
    %2 = arith.addi %0, %1 : i32
    %3 = tpu.assume_multiple %2, 8 : i32
    %cst = arith.constant 0.000000e+00 : f32
    %4 = vector.broadcast %cst : f32 to vector<8x128xf32>
    %c240 = arith.constant 240 : index
    %c0 = arith.constant 0 : index
    %5 = vector.load %arg8[%c240, %c0] : memref<248x128xf32, #tpu.memory_space<vmem>>, vector<8x128xf32>
    tpu.vector_store %arg8[%c240, %c0], %4 {strides = array<i32>} : memref<248x128xf32, #tpu.memory_space<vmem>>, vector<8x128xf32>,
    %c0_i32 = arith.constant 0 : i32
    %6 = tpu.memref_slice %arg3[%3, %c0_i32] : memref<864x128xf32, #tpu.memory_space<any>> -> memref<240x128xf32, #tpu.memory_space<any>>
    %c0_i32_0 = arith.constant 0 : i32
    %c0_i32_1 = arith.constant 0 : i32
    %7 = tpu.memref_slice %arg8[%c0_i32_0, %c0_i32_1] : memref<248x128xf32, #tpu.memory_space<vmem>> -> memref<240x128xf32, #tpu.memory_space<vmem>>
    tpu.enqueue_dma source(%6 : memref<240x128xf32, #tpu.memory_space<any>>) target(%7 : memref<240x128xf32, #tpu.memory_space<vmem>>) target_semaphore(%arg9 : memref<!tpu.dma_semaphore, #tpu.memory_space<semaphore_mem>>)
    %c0_i32_2 = arith.constant 0 : i32
    %8 = tpu.memref_slice %arg3[%3, %c0_i32_2] : memref<864x128xf32, #tpu.memory_space<any>> -> memref<240x128xf32, #tpu.memory_space<any>>
    %c0_i32_3 = arith.constant 0 : i32
    %c0_i32_4 = arith.constant 0 : i32
    %9 = tpu.memref_slice %arg8[%c0_i32_3, %c0_i32_4] : memref<248x128xf32, #tpu.memory_space<vmem>> -> memref<240x128xf32, #tpu.memory_space<vmem>>
    tpu.wait_dma2 semaphore(%arg9 : memref<!tpu.dma_semaphore, #tpu.memory_space<semaphore_mem>>) src(%8 : memref<240x128xf32, #tpu.memory_space<any>>) dst(%9 : memref<240x128xf32, #tpu.memory_space<vmem>>)
    %cst_5 = arith.constant 0.000000e+00 : f32
    %10 = vector.broadcast %cst_5 : f32 to vector<192x128xf32>
    %c0_6 = arith.constant 0 : index
    %c0_7 = arith.constant 0 : index
    %11 = vector.load %arg8[%c0_6, %c0_7] : memref<248x128xf32, #tpu.memory_space<vmem>>, vector<192x128xf32>
    %c0_8 = arith.constant 0 : index
    %c0_9 = arith.constant 0 : index
    %c0_10 = arith.constant 0 : index
    %c0_11 = arith.constant 0 : index
    %12 = vector.load %arg4[%c0_8, %c0_9, %c0_10, %c0_11] : memref<3x3x128x128xf32, #tpu.memory_space<vmem>>, vector<1x1x128x128xf32>
    %13 = vector.shape_cast %12 : vector<1x1x128x128xf32> to vector<128x128xf32>
    %cst_12 = arith.constant dense<0.000000e+00> : vector<192x128xf32>
    %14 = tpu.matmul %11, %13, %cst_12 {dimension_numbers = #tpu.dot_dimension_numbers<[1], [0], [0], [1], [0, 0, 1, 1], [], []>} : vector<192x128xf32>, vector<128x128xf32>, vector<192x128xf32> -> vector<192x128xf32>
    %15 = arith.addf %10, %14 : vector<192x128xf32>
    %c1 = arith.constant 1 : index
    %c0_13 = arith.constant 0 : index
    %16 = vector.load %arg8[%c1, %c0_13] : memref<248x128xf32, #tpu.memory_space<vmem>>, vector<192x128xf32>
    %c0_14 = arith.constant 0 : index
    %c1_15 = arith.constant 1 : index
    %c0_16 = arith.constant 0 : index
    %c0_17 = arith.constant 0 : index
    %17 = vector.load %arg4[%c0_14, %c1_15, %c0_16, %c0_17] : memref<3x3x128x128xf32, #tpu.memory_space<vmem>>, vector<1x1x128x128xf32>
    %18 = vector.shape_cast %17 : vector<1x1x128x128xf32> to vector<128x128xf32>
    %cst_18 = arith.constant dense<0.000000e+00> : vector<192x128xf32>
    %19 = tpu.matmul %16, %18, %cst_18 {dimension_numbers = #tpu.dot_dimension_numbers<[1], [0], [0], [1], [0, 0, 1, 1], [], []>} : vector<192x128xf32>, vector<128x128xf32>, vector<192x128xf32> -> vector<192x128xf32>
    %20 = arith.addf %15, %19 : vector<192x128xf32>
    %c2 = arith.constant 2 : index
    %c0_19 = arith.constant 0 : index
    %21 = vector.load %arg8[%c2, %c0_19] : memref<248x128xf32, #tpu.memory_space<vmem>>, vector<192x128xf32>
    %c0_20 = arith.constant 0 : index
    %c2_21 = arith.constant 2 : index
    %c0_22 = arith.constant 0 : index
    %c0_23 = arith.constant 0 : index
    %22 = vector.load %arg4[%c0_20, %c2_21, %c0_22, %c0_23] : memref<3x3x128x128xf32, #tpu.memory_space<vmem>>, vector<1x1x128x128xf32>
    %23 = vector.shape_cast %22 : vector<1x1x128x128xf32> to vector<128x128xf32>
    %cst_24 = arith.constant dense<0.000000e+00> : vector<192x128xf32>
    %24 = tpu.matmul %21, %23, %cst_24 {dimension_numbers = #tpu.dot_dimension_numbers<[1], [0], [0], [1], [0, 0, 1, 1], [], []>} : vector<192x128xf32>, vector<128x128xf32>, vector<192x128xf32> -> vector<192x128xf32>
    %25 = arith.addf %20, %24 : vector<192x128xf32>
    %c24 = arith.constant 24 : index
    %c0_25 = arith.constant 0 : index
    %26 = vector.load %arg8[%c24, %c0_25] : memref<248x128xf32, #tpu.memory_space<vmem>>, vector<192x128xf32>
    %c1_26 = arith.constant 1 : index
    %c0_27 = arith.constant 0 : index
    %c0_28 = arith.constant 0 : index
    %c0_29 = arith.constant 0 : index
    %27 = vector.load %arg4[%c1_26, %c0_27, %c0_28, %c0_29] : memref<3x3x128x128xf32, #tpu.memory_space<vmem>>, vector<1x1x128x128xf32>
    %28 = vector.shape_cast %27 : vector<1x1x128x128xf32> to vector<128x128xf32>
    %cst_30 = arith.constant dense<0.000000e+00> : vector<192x128xf32>
    %29 = tpu.matmul %26, %28, %cst_30 {dimension_numbers = #tpu.dot_dimension_numbers<[1], [0], [0], [1], [0, 0, 1, 1], [], []>} : vector<192x128xf32>, vector<128x128xf32>, vector<192x128xf32> -> vector<192x128xf32>
    %30 = arith.addf %25, %29 : vector<192x128xf32>
    %c25 = arith.constant 25 : index
    %c0_31 = arith.constant 0 : index
    %31 = vector.load %arg8[%c25, %c0_31] : memref<248x128xf32, #tpu.memory_space<vmem>>, vector<192x128xf32>
    %c1_32 = arith.constant 1 : index
    %c1_33 = arith.constant 1 : index
    %c0_34 = arith.constant 0 : index
    %c0_35 = arith.constant 0 : index
    %32 = vector.load %arg4[%c1_32, %c1_33, %c0_34, %c0_35] : memref<3x3x128x128xf32, #tpu.memory_space<vmem>>, vector<1x1x128x128xf32>
    %33 = vector.shape_cast %32 : vector<1x1x128x128xf32> to vector<128x128xf32>
    %cst_36 = arith.constant dense<0.000000e+00> : vector<192x128xf32>
    %34 = tpu.matmul %31, %33, %cst_36 {dimension_numbers = #tpu.dot_dimension_numbers<[1], [0], [0], [1], [0, 0, 1, 1], [], []>} : vector<192x128xf32>, vector<128x128xf32>, vector<192x128xf32> -> vector<192x128xf32>
    %35 = arith.addf %30, %34 : vector<192x128xf32>
    %c26 = arith.constant 26 : index
    %c0_37 = arith.constant 0 : index
    %36 = vector.load %arg8[%c26, %c0_37] : memref<248x128xf32, #tpu.memory_space<vmem>>, vector<192x128xf32>
    %c1_38 = arith.constant 1 : index
    %c2_39 = arith.constant 2 : index
    %c0_40 = arith.constant 0 : index
    %c0_41 = arith.constant 0 : index
    %37 = vector.load %arg4[%c1_38, %c2_39, %c0_40, %c0_41] : memref<3x3x128x128xf32, #tpu.memory_space<vmem>>, vector<1x1x128x128xf32>
    %38 = vector.shape_cast %37 : vector<1x1x128x128xf32> to vector<128x128xf32>
    %cst_42 = arith.constant dense<0.000000e+00> : vector<192x128xf32>
    %39 = tpu.matmul %36, %38, %cst_42 {dimension_numbers = #tpu.dot_dimension_numbers<[1], [0], [0], [1], [0, 0, 1, 1], [], []>} : vector<192x128xf32>, vector<128x128xf32>, vector<192x128xf32> -> vector<192x128xf32>
    %40 = arith.addf %35, %39 : vector<192x128xf32>
    %c48 = arith.constant 48 : index
    %c0_43 = arith.constant 0 : index
    %41 = vector.load %arg8[%c48, %c0_43] : memref<248x128xf32, #tpu.memory_space<vmem>>, vector<192x128xf32>
    %c2_44 = arith.constant 2 : index
    %c0_45 = arith.constant 0 : index
    %c0_46 = arith.constant 0 : index
    %c0_47 = arith.constant 0 : index
    %42 = vector.load %arg4[%c2_44, %c0_45, %c0_46, %c0_47] : memref<3x3x128x128xf32, #tpu.memory_space<vmem>>, vector<1x1x128x128xf32>
    %43 = vector.shape_cast %42 : vector<1x1x128x128xf32> to vector<128x128xf32>
    %cst_48 = arith.constant dense<0.000000e+00> : vector<192x128xf32>
    %44 = tpu.matmul %41, %43, %cst_48 {dimension_numbers = #tpu.dot_dimension_numbers<[1], [0], [0], [1], [0, 0, 1, 1], [], []>} : vector<192x128xf32>, vector<128x128xf32>, vector<192x128xf32> -> vector<192x128xf32>
    %45 = arith.addf %40, %44 : vector<192x128xf32>
    %c49 = arith.constant 49 : index
    %c0_49 = arith.constant 0 : index
    %46 = vector.load %arg8[%c49, %c0_49] : memref<248x128xf32, #tpu.memory_space<vmem>>, vector<192x128xf32>
    %c2_50 = arith.constant 2 : index
    %c1_51 = arith.constant 1 : index
    %c0_52 = arith.constant 0 : index
    %c0_53 = arith.constant 0 : index
    %47 = vector.load %arg4[%c2_50, %c1_51, %c0_52, %c0_53] : memref<3x3x128x128xf32, #tpu.memory_space<vmem>>, vector<1x1x128x128xf32>
    %48 = vector.shape_cast %47 : vector<1x1x128x128xf32> to vector<128x128xf32>
    %cst_54 = arith.constant dense<0.000000e+00> : vector<192x128xf32>
    %49 = tpu.matmul %46, %48, %cst_54 {dimension_numbers = #tpu.dot_dimension_numbers<[1], [0], [0], [1], [0, 0, 1, 1], [], []>} : vector<192x128xf32>, vector<128x128xf32>, vector<192x128xf32> -> vector<192x128xf32>
    %50 = arith.addf %45, %49 : vector<192x128xf32>
    %c50 = arith.constant 50 : index
    %c0_55 = arith.constant 0 : index
    %51 = vector.load %arg8[%c50, %c0_55] : memref<248x128xf32, #tpu.memory_space<vmem>>, vector<192x128xf32>
    %c2_56 = arith.constant 2 : index
    %c2_57 = arith.constant 2 : index
    %c0_58 = arith.constant 0 : index
    %c0_59 = arith.constant 0 : index
    %52 = vector.load %arg4[%c2_56, %c2_57, %c0_58, %c0_59] : memref<3x3x128x128xf32, #tpu.memory_space<vmem>>, vector<1x1x128x128xf32>
    %53 = vector.shape_cast %52 : vector<1x1x128x128xf32> to vector<128x128xf32>
    %cst_60 = arith.constant dense<0.000000e+00> : vector<192x128xf32>
    %54 = tpu.matmul %51, %53, %cst_60 {dimension_numbers = #tpu.dot_dimension_numbers<[1], [0], [0], [1], [0, 0, 1, 1], [], []>} : vector<192x128xf32>, vector<128x128xf32>, vector<192x128xf32> -> vector<192x128xf32>
    %55 = arith.addf %50, %54 : vector<192x128xf32>
    %c0_61 = arith.constant 0 : index
    %c0_62 = arith.constant 0 : index
    %56 = vector.load %arg5[%c0_61, %c0_62] : memref<1x128xf32, #tpu.memory_space<vmem>>, vector<1x128xf32>
    %57 = vector.broadcast %56 : vector<1x128xf32> to vector<192x128xf32>
    %58 = arith.mulf %55, %57 : vector<192x128xf32>
    %c0_63 = arith.constant 0 : index
    %c0_64 = arith.constant 0 : index
    %59 = vector.load %arg6[%c0_63, %c0_64] : memref<1x128xf32, #tpu.memory_space<vmem>>, vector<1x128xf32>
    %60 = vector.broadcast %59 : vector<1x128xf32> to vector<192x128xf32>
    %61 = arith.addf %58, %60 : vector<192x128xf32>
    %cst_65 = arith.constant 0.000000e+00 : f32
    %62 = vector.broadcast %cst_65 : f32 to vector<192x128xf32>
    %63 = arith.cmpf oge, %61, %62 : vector<192x128xf32>
    %cst_66 = arith.constant 0.00999999977 : f32
    %64 = vector.broadcast %cst_66 : f32 to vector<192x128xf32>
    %65 = arith.mulf %64, %61 : vector<192x128xf32>
    %66 = arith.select %63, %61, %65 : vector<192x128xi1>, vector<192x128xf32>
    %67 = vector.shape_cast %66 : vector<192x128xf32> to vector<8x24x128xf32>
    %68 = vector.extract_strided_slice %67 {offsets = [0, 0, 0], sizes = [8, 16, 128], strides = [1, 1, 1]} : vector<8x24x128xf32> to vector<8x16x128xf32>
    %c0_67 = arith.constant 0 : index
    %c0_68 = arith.constant 0 : index
    %c0_69 = arith.constant 0 : index
    %c0_70 = arith.constant 0 : index
    %69 = vector.load %arg7[%c0_67, %c0_68, %c0_69, %c0_70] : memref<1x8x16x128xf32, #tpu.memory_space<vmem>>, vector<1x8x16x128xf32>
    %70 = vector.shape_cast %69 : vector<1x8x16x128xf32> to vector<8x16x128xf32>
    %71 = vector.shape_cast %68 : vector<8x16x128xf32> to vector<1x8x16x128xf32>
    tpu.vector_store %arg7[%c0_67, %c0_68, %c0_69, %c0_70], %71 {strides = array<i32>} : memref<1x8x16x128xf32, #tpu.memory_space<vmem>>, vector<1x8x16x128xf32>,
    return
  }
  func.func @transform_1(%arg0: i32, %arg1: i32, %arg2: i32) -> (i32, i32, i32, i32) {
    %c0_i32 = arith.constant 0 : i32
    %c0_i32_0 = arith.constant 0 : i32
    %c0_i32_1 = arith.constant 0 : i32
    %c0_i32_2 = arith.constant 0 : i32
    return %c0_i32, %c0_i32_0, %c0_i32_1, %arg2 : i32, i32, i32, i32
  }
  func.func @transform_2(%arg0: i32, %arg1: i32, %arg2: i32) -> (i32, i32) {
    %c0_i32 = arith.constant 0 : i32
    %c0_i32_0 = arith.constant 0 : i32
    return %c0_i32, %arg2 : i32, i32
  }
  func.func @transform_3(%arg0: i32, %arg1: i32, %arg2: i32) -> (i32, i32) {
    %c0_i32 = arith.constant 0 : i32
    %c0_i32_0 = arith.constant 0 : i32
    return %c0_i32, %arg2 : i32, i32
  }
  func.func @transform_4(%arg0: i32, %arg1: i32, %arg2: i32) -> (i32, i32, i32, i32) {
    %c0_i32 = arith.constant 0 : i32
    %c0_i32_0 = arith.constant 0 : i32
    return %arg0, %arg1, %c0_i32, %arg2 : i32, i32, i32, i32
  }
}

</mosaic_0001>

<bundles_post_ra>
// kernel: darknet_loop_block.3
= control target key start
LH: loop header
LB: loop body
LE: loop exit
PB: predicated region body
PF: predicated region fallthrough
CT: control target
= control target key end

     0   :  { %s2069_s1 = inlined_call_operand.vmem [shape: f32[128,128], index: 1, kind: input, shape index: {}]   ;;  %s2070_s0 = inlined_call_operand.vmem [shape: f32[512,128], index: 0, kind: input, shape index: {}]   ;;  %s2071_s2 = inlined_call_operand.vmem [shape: f32[1,128], index: 2, kind: input, shape index: {}]   ;;  %s2072_s3 = inlined_call_operand.vmem [shape: f32[1,128], index: 3, kind: input, shape index: {}]   ;;  %s2073_s4 = inlined_call_operand.vmem [shape: f32[512,128], index: 4, kind: output, shape index: {}]  }
   0x1   :  { %v228_v0 = vld [vmem:[%s2069_s1 + $0x78] sm:$0xff]  ;;  %v227_v1 = vld [vmem:[%s2069_s1 + $0x70] sm:$0xff]  ;;  %v226_v2 = vld [vmem:[%s2069_s1 + $0x68] sm:$0xff] }
   0x2   :  { %1293 = vmatprep.subr.mxu0 %v228_v0  ;;  %1421 = vmatprep.subr.mxu1 %v228_v0  ;;  %v225_v3 = vld [vmem:[%s2069_s1 + $0x60] sm:$0xff]  ;;  %v224_v4 = vld [vmem:[%s2069_s1 + $0x58] sm:$0xff]  ;;  %v223_v5 = vld [vmem:[%s2069_s1 + $0x50] sm:$0xff] }
   0x3   :  { %1294 = vmatpush3.msra.mxu0 %v228_v0  ;;  %1437 = vmatpush3.msra.mxu1 %v228_v0  ;;  %v222_v6 = vld [vmem:[%s2069_s1 + $0x48] sm:$0xff]  ;;  %v221_v7 = vld [vmem:[%s2069_s1 + $0x40] sm:$0xff]  ;;  %v220_v8 = vld [vmem:[%s2069_s1 + $0x38] sm:$0xff] }
   0x4   :  { %1295 = vmatprep.subr.mxu0 %v227_v1  ;;  %1422 = vmatprep.subr.mxu1 %v227_v1  ;;  %v219_v9 = vld [vmem:[%s2069_s1 + $0x30] sm:$0xff]  ;;  %v218_v10 = vld [vmem:[%s2069_s1 + $0x28] sm:$0xff]  ;;  %v217_v11 = vld [vmem:[%s2069_s1 + $0x20] sm:$0xff] }
   0x5   :  { %1296 = vmatpush3.msra.mxu0 %v227_v1  ;;  %1438 = vmatpush3.msra.mxu1 %v227_v1  ;;  %v216_v12 = vld [vmem:[%s2069_s1 + $0x18] sm:$0xff]  ;;  %v215_v13 = vld [vmem:[%s2069_s1 + $0x10] sm:$0xff]  ;;  %v214_v14 = vld [vmem:[%s2069_s1 + $0x8] sm:$0xff] }
   0x6   :  { %1297 = vmatprep.subr.mxu0 %v226_v2  ;;  %1423 = vmatprep.subr.mxu1 %v226_v2  ;;  %v213_v15 = vld [vmem:[%s2069_s1] sm:$0xff]  ;;  %v150_v18 = vld [vmem:[%s2070_s0 + $0x8] sm:$0xff]  ;;  %v151_v20 = vld [vmem:[%s2070_s0 + $0x10] sm:$0xff] }
   0x7   :  { %1298 = vmatpush3.msra.mxu0 %v226_v2  ;;  %1439 = vmatpush3.msra.mxu1 %v226_v2  ;;  %v149_v16 = vld [vmem:[%s2070_s0] sm:$0xff]  ;;  %v182_v19 = vld [vmem:[%s2070_s0 + $0x108] sm:$0xff]  ;;  %v183_v21 = vld [vmem:[%s2070_s0 + $0x110] sm:$0xff] }
   0x8   :  { %1299 = vmatprep.subr.mxu0 %v225_v3  ;;  %1424 = vmatprep.subr.mxu1 %v225_v3  ;;  %v181_v17 = vld [vmem:[%s2070_s0 + $0x100] sm:$0xff]  ;;  %v152_v22 = vld [vmem:[%s2070_s0 + $0x18] sm:$0xff]  ;;  %v154_v26 = vld [vmem:[%s2070_s0 + $0x28] sm:$0xff] }
   0x9   :  { %1300 = vmatpush3.msra.mxu0 %v225_v3  ;;  %1440 = vmatpush3.msra.mxu1 %v225_v3  ;;  %v184_v23 = vld [vmem:[%s2070_s0 + $0x118] sm:$0xff]  ;;  %v153_v24 = vld [vmem:[%s2070_s0 + $0x20] sm:$0xff]  ;;  %v186_v27 = vld [vmem:[%s2070_s0 + $0x128] sm:$0xff] }
   0xa   :  { %1301 = vmatprep.subr.mxu0 %v224_v4  ;;  %1425 = vmatprep.subr.mxu1 %v224_v4  ;;  %v185_v25 = vld [vmem:[%s2070_s0 + $0x120] sm:$0xff]  ;;  %v155_v28 = vld [vmem:[%s2070_s0 + $0x30] sm:$0xff]  ;;  %v156_v30 = vld [vmem:[%s2070_s0 + $0x38] sm:$0xff] }
   0xb   :  { %1302 = vmatpush3.msra.mxu0 %v224_v4  ;;  %1441 = vmatpush3.msra.mxu1 %v224_v4  ;;  %v187_v29 = vld [vmem:[%s2070_s0 + $0x130] sm:$0xff]  ;;  %v188_v31 = vld [vmem:[%s2070_s0 + $0x138] sm:$0xff]  ;;  %v157_v32 = vld [vmem:[%s2070_s0 + $0x40] sm:$0xff] }
   0xc   :  { %1303 = vmatprep.subr.mxu0 %v223_v5  ;;  %1426 = vmatprep.subr.mxu1 %v223_v5  ;;  %v189_v33 = vld [vmem:[%s2070_s0 + $0x140] sm:$0xff]  ;;  %v158_v34 = vld [vmem:[%s2070_s0 + $0x48] sm:$0xff]  ;;  %v159_v36 = vld [vmem:[%s2070_s0 + $0x50] sm:$0xff] }
   0xd   :  { %1304 = vmatpush3.msra.mxu0 %v223_v5  ;;  %1442 = vmatpush3.msra.mxu1 %v223_v5  ;;  %v190_v35 = vld [vmem:[%s2070_s0 + $0x148] sm:$0xff]  ;;  %v191_v37 = vld [vmem:[%s2070_s0 + $0x150] sm:$0xff]  ;;  %v160_v38 = vld [vmem:[%s2070_s0 + $0x58] sm:$0xff] }
   0xe   :  { %1305 = vmatprep.subr.mxu0 %v222_v6  ;;  %1427 = vmatprep.subr.mxu1 %v222_v6  ;;  %v192_v39 = vld [vmem:[%s2070_s0 + $0x158] sm:$0xff]  ;;  %v161_v40 = vld [vmem:[%s2070_s0 + $0x60] sm:$0xff]  ;;  %v162_v42 = vld [vmem:[%s2070_s0 + $0x68] sm:$0xff] }
   0xf   :  { %1306 = vmatpush3.msra.mxu0 %v222_v6  ;;  %1443 = vmatpush3.msra.mxu1 %v222_v6  ;;  %v193_v41 = vld [vmem:[%s2070_s0 + $0x160] sm:$0xff]  ;;  %v194_v43 = vld [vmem:[%s2070_s0 + $0x168] sm:$0xff]  ;;  %v163_v44 = vld [vmem:[%s2070_s0 + $0x70] sm:$0xff] }
  0x10   :  { %1307 = vmatprep.subr.mxu0 %v221_v7  ;;  %1428 = vmatprep.subr.mxu1 %v221_v7  ;;  %v195_v45 = vld [vmem:[%s2070_s0 + $0x170] sm:$0xff]  ;;  %v164_v46 = vld [vmem:[%s2070_s0 + $0x78] sm:$0xff]  ;;  %v165_v48 = vld [vmem:[%s2070_s0 + $0x80] sm:$0xff] }
  0x11   :  { %1308 = vmatpush3.msra.mxu0 %v221_v7  ;;  %1444 = vmatpush3.msra.mxu1 %v221_v7  ;;  %v196_v47 = vld [vmem:[%s2070_s0 + $0x178] sm:$0xff]  ;;  %v197_v49 = vld [vmem:[%s2070_s0 + $0x180] sm:$0xff]  ;;  %v166_v50 = vld [vmem:[%s2070_s0 + $0x88] sm:$0xff] }
  0x12   :  { %1309 = vmatprep.subr.mxu0 %v220_v8  ;;  %1429 = vmatprep.subr.mxu1 %v220_v8  ;;  %v198_v51 = vld [vmem:[%s2070_s0 + $0x188] sm:$0xff]  ;;  %v167_v52 = vld [vmem:[%s2070_s0 + $0x90] sm:$0xff]  ;;  %v168_v54 = vld [vmem:[%s2070_s0 + $0x98] sm:$0xff] }
  0x13   :  { %1310 = vmatpush3.msra.mxu0 %v220_v8  ;;  %1445 = vmatpush3.msra.mxu1 %v220_v8  ;;  %v199_v53 = vld [vmem:[%s2070_s0 + $0x190] sm:$0xff]  ;;  %v200_v55 = vld [vmem:[%s2070_s0 + $0x198] sm:$0xff]  ;;  %v169_v56 = vld [vmem:[%s2070_s0 + $0xa0] sm:$0xff] }
  0x14   :  { %1311 = vmatprep.subr.mxu0 %v219_v9  ;;  %1430 = vmatprep.subr.mxu1 %v219_v9  ;;  %v201_v57 = vld [vmem:[%s2070_s0 + $0x1a0] sm:$0xff]  ;;  %v170_v58 = vld [vmem:[%s2070_s0 + $0xa8] sm:$0xff]  ;;  %v171_v60 = vld [vmem:[%s2070_s0 + $0xb0] sm:$0xff] }
  0x15   :  { %1312 = vmatpush3.msra.mxu0 %v219_v9  ;;  %1446 = vmatpush3.msra.mxu1 %v219_v9  ;;  %v202_v59 = vld [vmem:[%s2070_s0 + $0x1a8] sm:$0xff]  ;;  %v203_v61 = vld [vmem:[%s2070_s0 + $0x1b0] sm:$0xff]  ;;  %v172_v62 = vld [vmem:[%s2070_s0 + $0xb8] sm:$0xff] }
  0x16   :  { %1313 = vmatprep.subr.mxu0 %v218_v10  ;;  %1431 = vmatprep.subr.mxu1 %v218_v10  ;;  %v204_v63 = vld [vmem:[%s2070_s0 + $0x1b8] sm:$0xff]  ;;  %v173_v0 = vld [vmem:[%s2070_s0 + $0xc0] sm:$0xff]  ;;  %v174_v2 = vld [vmem:[%s2070_s0 + $0xc8] sm:$0xff] }
  0x17   :  { %1314 = vmatpush3.msra.mxu0 %v218_v10  ;;  %1447 = vmatpush3.msra.mxu1 %v218_v10  ;;  %v205_v1 = vld [vmem:[%s2070_s0 + $0x1c0] sm:$0xff]  ;;  %v206_v3 = vld [vmem:[%s2070_s0 + $0x1c8] sm:$0xff]  ;;  %v175_v4 = vld [vmem:[%s2070_s0 + $0xd0] sm:$0xff] }
  0x18   :  { %1315 = vmatprep.subr.mxu0 %v217_v11  ;;  %1432 = vmatprep.subr.mxu1 %v217_v11  ;;  %v207_v5 = vld [vmem:[%s2070_s0 + $0x1d0] sm:$0xff]  ;;  %v176_v6 = vld [vmem:[%s2070_s0 + $0xd8] sm:$0xff]  ;;  %v177_v8 = vld [vmem:[%s2070_s0 + $0xe0] sm:$0xff] }
  0x19   :  { %1316 = vmatpush3.msra.mxu0 %v217_v11  ;;  %1448 = vmatpush3.msra.mxu1 %v217_v11  ;;  %v208_v7 = vld [vmem:[%s2070_s0 + $0x1d8] sm:$0xff]  ;;  %v209_v9 = vld [vmem:[%s2070_s0 + $0x1e0] sm:$0xff]  ;;  %v178_v10 = vld [vmem:[%s2070_s0 + $0xe8] sm:$0xff] }
  0x1a   :  { %1317 = vmatprep.subr.mxu0 %v216_v12  ;;  %1433 = vmatprep.subr.mxu1 %v216_v12  ;;  %v210_v11 = vld [vmem:[%s2070_s0 + $0x1e8] sm:$0xff] }
  0x1b   :  { %1318 = vmatpush3.msra.mxu0 %v216_v12  ;;  %1449 = vmatpush3.msra.mxu1 %v216_v12  ;;  %v179_v12 = vld [vmem:[%s2070_s0 + $0xf0] sm:$0xff] }
  0x1c   :  { %1319 = vmatprep.subr.mxu0 %v215_v13  ;;  %1434 = vmatprep.subr.mxu1 %v215_v13 }
  0x1d   :  { %1320 = vmatpush3.msra.mxu0 %v215_v13  ;;  %1450 = vmatpush3.msra.mxu1 %v215_v13  ;;  %v211_v13 = vld [vmem:[%s2070_s0 + $0x1f0] sm:$0xff] }
  0x1e   :  { %1321 = vmatprep.subr.mxu0 %v214_v14  ;;  %1435 = vmatprep.subr.mxu1 %v214_v14 }
  0x1f   :  { %1322 = vmatpush3.msra.mxu0 %v214_v14  ;;  %1451 = vmatpush3.msra.mxu1 %v214_v14  ;;  %v180_v14 = vld [vmem:[%s2070_s0 + $0xf8] sm:$0xff] }
  0x20   :  { %1323 = vmatprep.subr.mxu0 %v213_v15  ;;  %1436 = vmatprep.subr.mxu1 %v213_v15 }
  0x21   :  { %1324 = vmatpush3.msra.mxu0 %v213_v15  ;;  %1452 = vmatpush3.msra.mxu1 %v213_v15  ;;  %v212_v15 = vld [vmem:[%s2070_s0 + $0x1f8] sm:$0xff] }
  0x22   :  { %1325 = vmatprep.mubr.f32.mxu0 %v149_v16  ;;  %1373 = vmatprep.mubr.f32.mxu1 %v181_v17  ;;  %v1721_v16 = vld [vmem:[%s2071_s2] ss:$0 sm:$0xff] }
  0x23   :  { %1326 = vmatmul.mubr.f32.vlgmr.msra.gmra.mxu0 %v150_v18  ;;  %1374 = vmatmul.mubr.f32.vlgmr.msra.gmra.mxu1 %v182_v19  ;;  %v1726_v18 = vld [vmem:[%s2072_s3] ss:$0 sm:$0xff] }
  0x24   :  { %1328 = vmatprep.mubr.f32.mxu0 %v151_v20  ;;  %1376 = vmatprep.mubr.f32.mxu1 %v183_v21 }
  0x27   :  { %1329 = vmatmul.mubr.f32.gmra.mxu0 %v152_v22  ;;  %1377 = vmatmul.mubr.f32.gmra.mxu1 %v184_v23 }
  0x28   :  { %1331 = vmatprep.mubr.f32.mxu0 %v153_v24  ;;  %1379 = vmatprep.mubr.f32.mxu1 %v185_v25 }
  0x2b   :  { %1332 = vmatmul.mubr.f32.gmra.mxu0 %v154_v26  ;;  %1380 = vmatmul.mubr.f32.gmra.mxu1 %v186_v27 }
  0x2c   :  { %1334 = vmatprep.mubr.f32.mxu0 %v155_v28  ;;  %1382 = vmatprep.mubr.f32.mxu1 %v187_v29 }
  0x2f   :  { %1335 = vmatmul.mubr.f32.gmra.mxu0 %v156_v30  ;;  %1383 = vmatmul.mubr.f32.gmra.mxu1 %v188_v31 }
  0x30   :  { %1337 = vmatprep.mubr.f32.mxu0 %v157_v32  ;;  %1385 = vmatprep.mubr.f32.mxu1 %v189_v33 }
  0x33   :  { %1338 = vmatmul.mubr.f32.gmra.mxu0 %v158_v34  ;;  %1386 = vmatmul.mubr.f32.gmra.mxu1 %v190_v35 }
  0x34   :  { %1340 = vmatprep.mubr.f32.mxu0 %v159_v36  ;;  %1388 = vmatprep.mubr.f32.mxu1 %v191_v37 }
  0x37   :  { %1341 = vmatmul.mubr.f32.gmra.mxu0 %v160_v38  ;;  %1389 = vmatmul.mubr.f32.gmra.mxu1 %v192_v39 }
  0x38   :  { %1343 = vmatprep.mubr.f32.mxu0 %v161_v40  ;;  %1391 = vmatprep.mubr.f32.mxu1 %v193_v41 }
  0x3b   :  { %1344 = vmatmul.mubr.f32.gmra.mxu0 %v162_v42  ;;  %1392 = vmatmul.mubr.f32.gmra.mxu1 %v194_v43 }
  0x3c   :  { %1346 = vmatprep.mubr.f32.mxu0 %v163_v44  ;;  %1394 = vmatprep.mubr.f32.mxu1 %v195_v45 }
  0x3f   :  { %1347 = vmatmul.mubr.f32.gmra.mxu0 %v164_v46  ;;  %1395 = vmatmul.mubr.f32.gmra.mxu1 %v196_v47 }
  0x40   :  { %1349 = vmatprep.mubr.f32.mxu0 %v165_v48  ;;  %1397 = vmatprep.mubr.f32.mxu1 %v197_v49 }
  0x43   :  { %1350 = vmatmul.mubr.f32.gmra.mxu0 %v166_v50  ;;  %1398 = vmatmul.mubr.f32.gmra.mxu1 %v198_v51 }
  0x44   :  { %1352 = vmatprep.mubr.f32.mxu0 %v167_v52  ;;  %1400 = vmatprep.mubr.f32.mxu1 %v199_v53 }
  0x47   :  { %1353 = vmatmul.mubr.f32.gmra.mxu0 %v168_v54  ;;  %1401 = vmatmul.mubr.f32.gmra.mxu1 %v200_v55 }
  0x48   :  { %1355 = vmatprep.mubr.f32.mxu0 %v169_v56  ;;  %1403 = vmatprep.mubr.f32.mxu1 %v201_v57 }
  0x4b   :  { %1356 = vmatmul.mubr.f32.gmra.mxu0 %v170_v58  ;;  %1404 = vmatmul.mubr.f32.gmra.mxu1 %v202_v59 }
  0x4c   :  { %1358 = vmatprep.mubr.f32.mxu0 %v171_v60  ;;  %1406 = vmatprep.mubr.f32.mxu1 %v203_v61 }
  0x4f   :  { %1359 = vmatmul.mubr.f32.gmra.mxu0 %v172_v62  ;;  %1407 = vmatmul.mubr.f32.gmra.mxu1 %v204_v63 }
  0x50   :  { %1361 = vmatprep.mubr.f32.mxu0 %v173_v0  ;;  %1409 = vmatprep.mubr.f32.mxu1 %v205_v1 }
  0x53   :  { %1362 = vmatmul.mubr.f32.gmra.mxu0 %v174_v2  ;;  %1410 = vmatmul.mubr.f32.gmra.mxu1 %v206_v3 }
  0x54   :  { %1364 = vmatprep.mubr.f32.mxu0 %v175_v4  ;;  %1412 = vmatprep.mubr.f32.mxu1 %v207_v5 }
  0x57   :  { %1365 = vmatmul.mubr.f32.gmra.mxu0 %v176_v6  ;;  %1413 = vmatmul.mubr.f32.gmra.mxu1 %v208_v7 }
  0x58   :  { %1367 = vmatprep.mubr.f32.mxu0 %v177_v8  ;;  %1415 = vmatprep.mubr.f32.mxu1 %v209_v9 }
  0x5b   :  { %1368 = vmatmul.mubr.f32.gmra.mxu0 %v178_v10  ;;  %1416 = vmatmul.mubr.f32.gmra.mxu1 %v210_v11 }
  0x5c   :  { %1370 = vmatprep.mubr.f32.mxu0 %v179_v12  ;;  %1418 = vmatprep.mubr.f32.mxu1 %v211_v13 }
  0x5f   :  { %1371 = vmatmul.mubr.f32.gmra.mxu0 %v180_v14  ;;  %1419 = vmatmul.mubr.f32.gmra.mxu1 %v212_v15 }
  0xe3   :  { %v1327_v17 = vpop.f32.mrf.mxu0  ;;  %v1375_v19 = vpop.f32.mrf.mxu1 }
  0xe4   :  { %v817_v20 = vmul.f32 %v1327_v17, %v1721_v16  ;;  %v849_v21 = vmul.f32 %v1375_v19, %v1721_v16 }
  0xe5   :  { %v295_v22 = vpop.f32.mrf.mxu0  ;;  %v455_v23 = vpop.f32.mrf.mxu1 }
  0xe6   :  { %v888_v24 = vadd.f32 %v1726_v18, %v817_v20  ;;  %v920_v25 = vadd.f32 %v1726_v18, %v849_v21  ;;  %v816_v26 = vmul.f32 %v1721_v16, %v295_v22  ;;  %v848_v27 = vmul.f32 %v1721_v16, %v455_v23 }
  0xe7   :  { %v1330_v28 = vpop.f32.mrf.mxu0  ;;  %v1378_v29 = vpop.f32.mrf.mxu1 }
  0xe8   :  { %vm952_vm0 = vcmp.ge.f32.partialorder %v888_v24, 0.0  ;;  %v1016_v30 = vmul.f32 0.01, %v888_v24  ;;  %vm984_vm1 = vcmp.ge.f32.partialorder %v920_v25, 0.0  ;;  %v1048_v31 = vmul.f32 0.01, %v920_v25 }
  0xe9   :  { %v887_v32 = vadd.f32 %v1726_v18, %v816_v26  ;;  %v919_v33 = vadd.f32 %v1726_v18, %v848_v27  ;;  %v819_v34 = vmul.f32 %v1330_v28, %v1721_v16  ;;  %v851_v35 = vmul.f32 %v1378_v29, %v1721_v16  ;;  %v305_v36 = vpop.f32.mrf.mxu0  ;;  %v465_v37 = vpop.f32.mrf.mxu1 }
  0xea   :  { %v1080_v38 = vsel %vm952_vm0, %v888_v24, %v1016_v30  ;;  %v1112_v39 = vsel %vm984_vm1, %v920_v25, %v1048_v31  ;;  %v818_v40 = vmul.f32 %v1721_v16, %v305_v36  ;;  %v850_v41 = vmul.f32 %v1721_v16, %v465_v37 }
  0xeb   :  { %1144 = vst [vmem:[%s2073_s4 + $0x8] sm:$0xff] %v1080_v38  ;;  %1176 = vst [vmem:[%s2073_s4 + $0x108] sm:$0xff] %v1112_v39  ;;  %vm951_vm2 = vcmp.ge.f32.partialorder %v887_v32, 0.0  ;;  %v1015_v42 = vmul.f32 0.01, %v887_v32  ;;  %vm983_vm3 = vcmp.ge.f32.partialorder %v919_v33, 0.0  ;;  %v1333_v44 = vpop.f32.mrf.mxu0  ;;  %v1381_v45 = vpop.f32.mrf.mxu1  ;;  %v890_v46 = vadd.f32 %v1726_v18, %v819_v34 }
  0xec   :  { %v1047_v43 = vmul.f32 0.01, %v919_v33  ;;  %v922_v47 = vadd.f32 %v1726_v18, %v851_v35  ;;  %v889_v48 = vadd.f32 %v1726_v18, %v818_v40  ;;  %v921_v49 = vadd.f32 %v1726_v18, %v850_v41 }
  0xed   :  { %v1079_v50 = vsel %vm951_vm2, %v887_v32, %v1015_v42  ;;  %v821_v52 = vmul.f32 %v1333_v44, %v1721_v16  ;;  %v853_v53 = vmul.f32 %v1381_v45, %v1721_v16  ;;  %v315_v54 = vpop.f32.mrf.mxu0  ;;  %v475_v55 = vpop.f32.mrf.mxu1  ;;  %vm954_vm4 = vcmp.ge.f32.partialorder %v890_v46, 0.0 }
  0xee   :  { %v1111_v51 = vsel %vm983_vm3, %v919_v33, %v1047_v43  ;;  %1143 = vst [vmem:[%s2073_s4] sm:$0xff] %v1079_v50  ;;  %v1018_v56 = vmul.f32 0.01, %v890_v46  ;;  %vm986_vm5 = vcmp.ge.f32.partialorder %v922_v47, 0.0  ;;  %v1050_v57 = vmul.f32 0.01, %v922_v47 }
  0xef   :  { %1175 = vst [vmem:[%s2073_s4 + $0x100] sm:$0xff] %v1111_v51  ;;  %vm953_vm6 = vcmp.ge.f32.partialorder %v889_v48, 0.0  ;;  %v1017_v58 = vmul.f32 0.01, %v889_v48  ;;  %vm985_vm7 = vcmp.ge.f32.partialorder %v921_v49, 0.0  ;;  %v1336_v60 = vpop.f32.mrf.mxu0  ;;  %v1384_v61 = vpop.f32.mrf.mxu1  ;;  %v892_v0 = vadd.f32 %v1726_v18, %v821_v52 }
  0xf0   :  { %v1049_v59 = vmul.f32 0.01, %v921_v49  ;;  %v1082_v62 = vsel %vm954_vm4, %v890_v46, %v1018_v56  ;;  %v1114_v63 = vsel %vm986_vm5, %v922_v47, %v1050_v57  ;;  %v924_v1 = vadd.f32 %v1726_v18, %v853_v53 }
  0xf1   :  { %1146 = vst [vmem:[%s2073_s4 + $0x18] sm:$0xff] %v1082_v62  ;;  %1178 = vst [vmem:[%s2073_s4 + $0x118] sm:$0xff] %v1114_v63  ;;  %v1081_v2 = vsel %vm953_vm6, %v889_v48, %v1017_v58  ;;  %v820_v4 = vmul.f32 %v1721_v16, %v315_v54  ;;  %v852_v5 = vmul.f32 %v1721_v16, %v475_v55  ;;  %v325_v6 = vpop.f32.mrf.mxu0  ;;  %v485_v7 = vpop.f32.mrf.mxu1  ;;  %vm956_vm8 = vcmp.ge.f32.partialorder %v892_v0, 0.0 }
  0xf2   :  { %v1113_v3 = vsel %vm985_vm7, %v921_v49, %v1049_v59  ;;  %1145 = vst [vmem:[%s2073_s4 + $0x10] sm:$0xff] %v1081_v2  ;;  %v1020_v8 = vmul.f32 0.01, %v892_v0  ;;  %vm988_vm9 = vcmp.ge.f32.partialorder %v924_v1, 0.0  ;;  %v1052_v9 = vmul.f32 0.01, %v924_v1 }
  0xf3   :  { %1177 = vst [vmem:[%s2073_s4 + $0x110] sm:$0xff] %v1113_v3  ;;  %v891_v10 = vadd.f32 %v1726_v18, %v820_v4  ;;  %v923_v11 = vadd.f32 %v1726_v18, %v852_v5  ;;  %v823_v12 = vmul.f32 %v1336_v60, %v1721_v16  ;;  %v855_v13 = vmul.f32 %v1384_v61, %v1721_v16  ;;  %v1339_v14 = vpop.f32.mrf.mxu0  ;;  %v1387_v15 = vpop.f32.mrf.mxu1 }
  0xf4   :  { %v1084_v17 = vsel %vm956_vm8, %v892_v0, %v1020_v8  ;;  %v1116_v19 = vsel %vm988_vm9, %v924_v1, %v1052_v9  ;;  %v822_v20 = vmul.f32 %v1721_v16, %v325_v6  ;;  %v854_v21 = vmul.f32 %v1721_v16, %v485_v7 }
  0xf5   :  { %1148 = vst [vmem:[%s2073_s4 + $0x28] sm:$0xff] %v1084_v17  ;;  %1180 = vst [vmem:[%s2073_s4 + $0x128] sm:$0xff] %v1116_v19  ;;  %vm955_vm10 = vcmp.ge.f32.partialorder %v891_v10, 0.0  ;;  %v1019_v22 = vmul.f32 0.01, %v891_v10  ;;  %vm987_vm11 = vcmp.ge.f32.partialorder %v923_v11, 0.0  ;;  %v335_v24 = vpop.f32.mrf.mxu0  ;;  %v495_v25 = vpop.f32.mrf.mxu1  ;;  %v894_v26 = vadd.f32 %v1726_v18, %v823_v12 }
  0xf6   :  { %v1051_v23 = vmul.f32 0.01, %v923_v11  ;;  %v926_v27 = vadd.f32 %v1726_v18, %v855_v13  ;;  %v893_v28 = vadd.f32 %v1726_v18, %v822_v20  ;;  %v925_v29 = vadd.f32 %v1726_v18, %v854_v21 }
  0xf7   :  { %v1083_v30 = vsel %vm955_vm10, %v891_v10, %v1019_v22  ;;  %v825_v32 = vmul.f32 %v1339_v14, %v1721_v16  ;;  %v857_v33 = vmul.f32 %v1387_v15, %v1721_v16  ;;  %v1342_v34 = vpop.f32.mrf.mxu0  ;;  %v1390_v35 = vpop.f32.mrf.mxu1  ;;  %vm958_vm12 = vcmp.ge.f32.partialorder %v894_v26, 0.0 }
  0xf8   :  { %v1115_v31 = vsel %vm987_vm11, %v923_v11, %v1051_v23  ;;  %1147 = vst [vmem:[%s2073_s4 + $0x20] sm:$0xff] %v1083_v30  ;;  %v1022_v36 = vmul.f32 0.01, %v894_v26  ;;  %vm990_vm13 = vcmp.ge.f32.partialorder %v926_v27, 0.0  ;;  %v1054_v37 = vmul.f32 0.01, %v926_v27 }
  0xf9   :  { %1179 = vst [vmem:[%s2073_s4 + $0x120] sm:$0xff] %v1115_v31  ;;  %vm957_vm14 = vcmp.ge.f32.partialorder %v893_v28, 0.0  ;;  %v1021_v38 = vmul.f32 0.01, %v893_v28  ;;  %vm989_vm15 = vcmp.ge.f32.partialorder %v925_v29, 0.0  ;;  %v345_v40 = vpop.f32.mrf.mxu0  ;;  %v505_v41 = vpop.f32.mrf.mxu1  ;;  %v896_v44 = vadd.f32 %v1726_v18, %v825_v32 }
  0xfa   :  { %v1053_v39 = vmul.f32 0.01, %v925_v29  ;;  %v1086_v42 = vsel %vm958_vm12, %v894_v26, %v1022_v36  ;;  %v1118_v43 = vsel %vm990_vm13, %v926_v27, %v1054_v37  ;;  %v928_v45 = vadd.f32 %v1726_v18, %v857_v33 }
  0xfb   :  { %1150 = vst [vmem:[%s2073_s4 + $0x38] sm:$0xff] %v1086_v42  ;;  %1182 = vst [vmem:[%s2073_s4 + $0x138] sm:$0xff] %v1118_v43  ;;  %v1085_v46 = vsel %vm957_vm14, %v893_v28, %v1021_v38  ;;  %v824_v48 = vmul.f32 %v1721_v16, %v335_v24  ;;  %v856_v49 = vmul.f32 %v1721_v16, %v495_v25  ;;  %v1345_v50 = vpop.f32.mrf.mxu0  ;;  %v1393_v51 = vpop.f32.mrf.mxu1  ;;  %vm960_vm0 = vcmp.ge.f32.partialorder %v896_v44, 0.0 }
  0xfc   :  { %v1117_v47 = vsel %vm989_vm15, %v925_v29, %v1053_v39  ;;  %1149 = vst [vmem:[%s2073_s4 + $0x30] sm:$0xff] %v1085_v46  ;;  %v1024_v52 = vmul.f32 0.01, %v896_v44  ;;  %vm992_vm1 = vcmp.ge.f32.partialorder %v928_v45, 0.0  ;;  %v1056_v53 = vmul.f32 0.01, %v928_v45 }
  0xfd   :  { %1181 = vst [vmem:[%s2073_s4 + $0x130] sm:$0xff] %v1117_v47  ;;  %v895_v54 = vadd.f32 %v1726_v18, %v824_v48  ;;  %v927_v55 = vadd.f32 %v1726_v18, %v856_v49  ;;  %v827_v56 = vmul.f32 %v1342_v34, %v1721_v16  ;;  %v859_v57 = vmul.f32 %v1390_v35, %v1721_v16  ;;  %v355_v58 = vpop.f32.mrf.mxu0  ;;  %v515_v59 = vpop.f32.mrf.mxu1 }
  0xfe   :  { %v1088_v60 = vsel %vm960_vm0, %v896_v44, %v1024_v52  ;;  %v1120_v61 = vsel %vm992_vm1, %v928_v45, %v1056_v53  ;;  %v826_v62 = vmul.f32 %v1721_v16, %v345_v40  ;;  %v858_v63 = vmul.f32 %v1721_v16, %v505_v41 }
  0xff   :  { %1152 = vst [vmem:[%s2073_s4 + $0x48] sm:$0xff] %v1088_v60  ;;  %1184 = vst [vmem:[%s2073_s4 + $0x148] sm:$0xff] %v1120_v61  ;;  %vm959_vm2 = vcmp.ge.f32.partialorder %v895_v54, 0.0  ;;  %v1023_v0 = vmul.f32 0.01, %v895_v54  ;;  %vm991_vm3 = vcmp.ge.f32.partialorder %v927_v55, 0.0  ;;  %v1348_v2 = vpop.f32.mrf.mxu0  ;;  %v1396_v3 = vpop.f32.mrf.mxu1  ;;  %v898_v4 = vadd.f32 %v1726_v18, %v827_v56 }
 0x100   :  { %v1055_v1 = vmul.f32 0.01, %v927_v55  ;;  %v930_v5 = vadd.f32 %v1726_v18, %v859_v57  ;;  %v897_v6 = vadd.f32 %v1726_v18, %v826_v62  ;;  %v929_v7 = vadd.f32 %v1726_v18, %v858_v63 }
 0x101   :  { %v1087_v8 = vsel %vm959_vm2, %v895_v54, %v1023_v0  ;;  %v829_v10 = vmul.f32 %v1345_v50, %v1721_v16  ;;  %v861_v11 = vmul.f32 %v1393_v51, %v1721_v16  ;;  %v365_v12 = vpop.f32.mrf.mxu0  ;;  %v525_v13 = vpop.f32.mrf.mxu1  ;;  %vm962_vm4 = vcmp.ge.f32.partialorder %v898_v4, 0.0 }
 0x102   :  { %v1119_v9 = vsel %vm991_vm3, %v927_v55, %v1055_v1  ;;  %1151 = vst [vmem:[%s2073_s4 + $0x40] sm:$0xff] %v1087_v8  ;;  %v1026_v14 = vmul.f32 0.01, %v898_v4  ;;  %vm994_vm5 = vcmp.ge.f32.partialorder %v930_v5, 0.0  ;;  %v1058_v15 = vmul.f32 0.01, %v930_v5 }
 0x103   :  { %1183 = vst [vmem:[%s2073_s4 + $0x140] sm:$0xff] %v1119_v9  ;;  %vm961_vm6 = vcmp.ge.f32.partialorder %v897_v6, 0.0  ;;  %v1025_v17 = vmul.f32 0.01, %v897_v6  ;;  %vm993_vm7 = vcmp.ge.f32.partialorder %v929_v7, 0.0  ;;  %v1351_v20 = vpop.f32.mrf.mxu0  ;;  %v1399_v21 = vpop.f32.mrf.mxu1  ;;  %v900_v24 = vadd.f32 %v1726_v18, %v829_v10 }
 0x104   :  { %v1057_v19 = vmul.f32 0.01, %v929_v7  ;;  %v1090_v22 = vsel %vm962_vm4, %v898_v4, %v1026_v14  ;;  %v1122_v23 = vsel %vm994_vm5, %v930_v5, %v1058_v15  ;;  %v932_v25 = vadd.f32 %v1726_v18, %v861_v11 }
 0x105   :  { %1154 = vst [vmem:[%s2073_s4 + $0x58] sm:$0xff] %v1090_v22  ;;  %1186 = vst [vmem:[%s2073_s4 + $0x158] sm:$0xff] %v1122_v23  ;;  %v1089_v26 = vsel %vm961_vm6, %v897_v6, %v1025_v17  ;;  %v828_v28 = vmul.f32 %v1721_v16, %v355_v58  ;;  %v860_v29 = vmul.f32 %v1721_v16, %v515_v59  ;;  %v375_v30 = vpop.f32.mrf.mxu0  ;;  %v535_v31 = vpop.f32.mrf.mxu1  ;;  %vm964_vm8 = vcmp.ge.f32.partialorder %v900_v24, 0.0 }
 0x106   :  { %v1121_v27 = vsel %vm993_vm7, %v929_v7, %v1057_v19  ;;  %1153 = vst [vmem:[%s2073_s4 + $0x50] sm:$0xff] %v1089_v26  ;;  %v1028_v32 = vmul.f32 0.01, %v900_v24  ;;  %vm996_vm9 = vcmp.ge.f32.partialorder %v932_v25, 0.0  ;;  %v1060_v33 = vmul.f32 0.01, %v932_v25 }
 0x107   :  { %1185 = vst [vmem:[%s2073_s4 + $0x150] sm:$0xff] %v1121_v27  ;;  %v899_v34 = vadd.f32 %v1726_v18, %v828_v28  ;;  %v931_v35 = vadd.f32 %v1726_v18, %v860_v29  ;;  %v831_v36 = vmul.f32 %v1348_v2, %v1721_v16  ;;  %v863_v37 = vmul.f32 %v1396_v3, %v1721_v16  ;;  %v1354_v38 = vpop.f32.mrf.mxu0  ;;  %v1402_v39 = vpop.f32.mrf.mxu1 }
 0x108   :  { %v1092_v40 = vsel %vm964_vm8, %v900_v24, %v1028_v32  ;;  %v1124_v41 = vsel %vm996_vm9, %v932_v25, %v1060_v33  ;;  %v830_v42 = vmul.f32 %v1721_v16, %v365_v12  ;;  %v862_v43 = vmul.f32 %v1721_v16, %v525_v13 }
 0x109   :  { %1156 = vst [vmem:[%s2073_s4 + $0x68] sm:$0xff] %v1092_v40  ;;  %1188 = vst [vmem:[%s2073_s4 + $0x168] sm:$0xff] %v1124_v41  ;;  %vm963_vm10 = vcmp.ge.f32.partialorder %v899_v34, 0.0  ;;  %v1027_v44 = vmul.f32 0.01, %v899_v34  ;;  %vm995_vm11 = vcmp.ge.f32.partialorder %v931_v35, 0.0  ;;  %v385_v46 = vpop.f32.mrf.mxu0  ;;  %v545_v47 = vpop.f32.mrf.mxu1  ;;  %v902_v48 = vadd.f32 %v1726_v18, %v831_v36 }
 0x10a   :  { %v1059_v45 = vmul.f32 0.01, %v931_v35  ;;  %v934_v49 = vadd.f32 %v1726_v18, %v863_v37  ;;  %v901_v50 = vadd.f32 %v1726_v18, %v830_v42  ;;  %v933_v51 = vadd.f32 %v1726_v18, %v862_v43 }
 0x10b   :  { %v1091_v52 = vsel %vm963_vm10, %v899_v34, %v1027_v44  ;;  %v833_v54 = vmul.f32 %v1351_v20, %v1721_v16  ;;  %v865_v55 = vmul.f32 %v1399_v21, %v1721_v16  ;;  %v1357_v56 = vpop.f32.mrf.mxu0  ;;  %v1405_v57 = vpop.f32.mrf.mxu1  ;;  %vm966_vm12 = vcmp.ge.f32.partialorder %v902_v48, 0.0 }
 0x10c   :  { %v1123_v53 = vsel %vm995_vm11, %v931_v35, %v1059_v45  ;;  %1155 = vst [vmem:[%s2073_s4 + $0x60] sm:$0xff] %v1091_v52  ;;  %v1030_v58 = vmul.f32 0.01, %v902_v48  ;;  %vm998_vm13 = vcmp.ge.f32.partialorder %v934_v49, 0.0  ;;  %v1062_v59 = vmul.f32 0.01, %v934_v49 }
 0x10d   :  { %1187 = vst [vmem:[%s2073_s4 + $0x160] sm:$0xff] %v1123_v53  ;;  %vm965_vm14 = vcmp.ge.f32.partialorder %v901_v50, 0.0  ;;  %v1029_v60 = vmul.f32 0.01, %v901_v50  ;;  %vm997_vm15 = vcmp.ge.f32.partialorder %v933_v51, 0.0  ;;  %v1878_v62 = vpop.f32.mrf.mxu0  ;;  %v1880_v63 = vpop.f32.mrf.mxu1  ;;  %v904_v2 = vadd.f32 %v1726_v18, %v833_v54 }
 0x10e   :  { %v1061_v61 = vmul.f32 0.01, %v933_v51  ;;  %v1094_v0 = vsel %vm966_vm12, %v902_v48, %v1030_v58  ;;  %v1126_v1 = vsel %vm998_vm13, %v934_v49, %v1062_v59  ;;  %v936_v3 = vadd.f32 %v1726_v18, %v865_v55 }
 0x10f   :  { %1158 = vst [vmem:[%s2073_s4 + $0x78] sm:$0xff] %v1094_v0  ;;  %1190 = vst [vmem:[%s2073_s4 + $0x178] sm:$0xff] %v1126_v1  ;;  %v1093_v4 = vsel %vm965_vm14, %v901_v50, %v1029_v60  ;;  %v832_v6 = vmul.f32 %v1721_v16, %v375_v30  ;;  %v864_v7 = vmul.f32 %v1721_v16, %v535_v31  ;;  %v1892_v8 = vpop.f32.mrf.mxu0  ;;  %v1894_v9 = vpop.f32.mrf.mxu1  ;;  %vm968_vm0 = vcmp.ge.f32.partialorder %v904_v2, 0.0 }
 0x110   :  { %v1125_v5 = vsel %vm997_vm15, %v933_v51, %v1061_v61  ;;  %1157 = vst [vmem:[%s2073_s4 + $0x70] sm:$0xff] %v1093_v4  ;;  %v1032_v10 = vmul.f32 0.01, %v904_v2  ;;  %vm1000_vm1 = vcmp.ge.f32.partialorder %v936_v3, 0.0  ;;  %v1064_v11 = vmul.f32 0.01, %v936_v3 }
 0x111   :  { %1189 = vst [vmem:[%s2073_s4 + $0x170] sm:$0xff] %v1125_v5  ;;  %v903_v12 = vadd.f32 %v1726_v18, %v832_v6  ;;  %v935_v13 = vadd.f32 %v1726_v18, %v864_v7  ;;  %v835_v14 = vmul.f32 %v1354_v38, %v1721_v16  ;;  %v867_v15 = vmul.f32 %v1402_v39, %v1721_v16  ;;  %v405_v17 = vpop.f32.mrf.mxu0  ;;  %v565_v19 = vpop.f32.mrf.mxu1 }
 0x112   :  { %v1096_v20 = vsel %vm968_vm0, %v904_v2, %v1032_v10  ;;  %v1128_v21 = vsel %vm1000_vm1, %v936_v3, %v1064_v11  ;;  %v834_v22 = vmul.f32 %v1721_v16, %v385_v46  ;;  %v866_v23 = vmul.f32 %v1721_v16, %v545_v47 }
 0x113   :  { %1160 = vst [vmem:[%s2073_s4 + $0x88] sm:$0xff] %v1096_v20  ;;  %1192 = vst [vmem:[%s2073_s4 + $0x188] sm:$0xff] %v1128_v21  ;;  %vm967_vm2 = vcmp.ge.f32.partialorder %v903_v12, 0.0  ;;  %v1031_v24 = vmul.f32 0.01, %v903_v12  ;;  %vm999_vm3 = vcmp.ge.f32.partialorder %v935_v13, 0.0  ;;  %v1914_v26 = vpop.f32.mrf.mxu0  ;;  %v1411_v27 = vpop.f32.mrf.mxu1  ;;  %v906_v28 = vadd.f32 %v1726_v18, %v835_v14 }
 0x114   :  { %v1063_v25 = vmul.f32 0.01, %v935_v13  ;;  %v938_v29 = vadd.f32 %v1726_v18, %v867_v15  ;;  %v905_v30 = vadd.f32 %v1726_v18, %v834_v22  ;;  %v937_v31 = vadd.f32 %v1726_v18, %v866_v23 }
 0x115   :  { %v1095_v32 = vsel %vm967_vm2, %v903_v12, %v1031_v24  ;;  %v837_v34 = vmul.f32 %v1357_v56, %v1721_v16  ;;  %v869_v35 = vmul.f32 %v1405_v57, %v1721_v16  ;;  %v1922_v36 = vpop.f32.mrf.mxu0  ;;  %v1924_v37 = vpop.f32.mrf.mxu1  ;;  %vm970_vm4 = vcmp.ge.f32.partialorder %v906_v28, 0.0 }
 0x116   :  { %v1127_v33 = vsel %vm999_vm3, %v935_v13, %v1063_v25  ;;  %1159 = vst [vmem:[%s2073_s4 + $0x80] sm:$0xff] %v1095_v32  ;;  %v1034_v38 = vmul.f32 0.01, %v906_v28  ;;  %vm1002_vm5 = vcmp.ge.f32.partialorder %v938_v29, 0.0  ;;  %v1066_v39 = vmul.f32 0.01, %v938_v29 }
 0x117   :  { %1191 = vst [vmem:[%s2073_s4 + $0x180] sm:$0xff] %v1127_v33  ;;  %vm969_vm6 = vcmp.ge.f32.partialorder %v905_v30, 0.0  ;;  %v1033_v40 = vmul.f32 0.01, %v905_v30  ;;  %vm1001_vm7 = vcmp.ge.f32.partialorder %v937_v31, 0.0  ;;  %v908_v44 = vadd.f32 %v1726_v18, %v837_v34  ;;  %v1366_v50 = vpop.f32.mrf.mxu0  ;;  %v1414_v51 = vpop.f32.mrf.mxu1 }
 0x118   :  { %v1065_v41 = vmul.f32 0.01, %v937_v31  ;;  %v1098_v42 = vsel %vm970_vm4, %v906_v28, %v1034_v38  ;;  %v1130_v43 = vsel %vm1002_vm5, %v938_v29, %v1066_v39  ;;  %v940_v45 = vadd.f32 %v1726_v18, %v869_v35 }
 0x119   :  { %1162 = vst [vmem:[%s2073_s4 + $0x98] sm:$0xff] %v1098_v42  ;;  %1194 = vst [vmem:[%s2073_s4 + $0x198] sm:$0xff] %v1130_v43  ;;  %v1097_v46 = vsel %vm969_vm6, %v905_v30, %v1033_v40  ;;  %v836_v48 = vmul.f32 %v1721_v16, %v1878_v62  ;;  %v868_v49 = vmul.f32 %v1721_v16, %v1880_v63  ;;  %vm972_vm8 = vcmp.ge.f32.partialorder %v908_v44, 0.0  ;;  %v425_v0 = vpop.f32.mrf.mxu0  ;;  %v585_v1 = vpop.f32.mrf.mxu1 }
 0x11a   :  { %v1129_v47 = vsel %vm1001_vm7, %v937_v31, %v1065_v41  ;;  %1161 = vst [vmem:[%s2073_s4 + $0x90] sm:$0xff] %v1097_v46  ;;  %v1036_v52 = vmul.f32 0.01, %v908_v44  ;;  %vm1004_vm9 = vcmp.ge.f32.partialorder %v940_v45, 0.0  ;;  %v1068_v53 = vmul.f32 0.01, %v940_v45 }
 0x11b   :  { %1193 = vst [vmem:[%s2073_s4 + $0x190] sm:$0xff] %v1129_v47  ;;  %v907_v54 = vadd.f32 %v1726_v18, %v836_v48  ;;  %v939_v55 = vadd.f32 %v1726_v18, %v868_v49  ;;  %v839_v56 = vmul.f32 %v1892_v8, %v1721_v16  ;;  %v871_v57 = vmul.f32 %v1894_v9, %v1721_v16  ;;  %v1369_v14 = vpop.f32.mrf.mxu0  ;;  %v1417_v15 = vpop.f32.mrf.mxu1 }
 0x11c   :  { %v1100_v58 = vsel %vm972_vm8, %v908_v44, %v1036_v52  ;;  %v1132_v59 = vsel %vm1004_vm9, %v940_v45, %v1068_v53  ;;  %v838_v60 = vmul.f32 %v1721_v16, %v405_v17  ;;  %v870_v61 = vmul.f32 %v1721_v16, %v565_v19 }
 0x11d   :  { %1164 = vst [vmem:[%s2073_s4 + $0xa8] sm:$0xff] %v1100_v58  ;;  %1196 = vst [vmem:[%s2073_s4 + $0x1a8] sm:$0xff] %v1132_v59  ;;  %vm971_vm10 = vcmp.ge.f32.partialorder %v907_v54, 0.0  ;;  %v1035_v62 = vmul.f32 0.01, %v907_v54  ;;  %vm1003_vm11 = vcmp.ge.f32.partialorder %v939_v55, 0.0  ;;  %v910_v2 = vadd.f32 %v1726_v18, %v839_v56  ;;  %v435_v32 = vpop.f32.mrf.mxu0  ;;  %v595_v33 = vpop.f32.mrf.mxu1 }
 0x11e   :  { %v1067_v63 = vmul.f32 0.01, %v939_v55  ;;  %v942_v3 = vadd.f32 %v1726_v18, %v871_v57  ;;  %v909_v4 = vadd.f32 %v1726_v18, %v838_v60  ;;  %v941_v5 = vadd.f32 %v1726_v18, %v870_v61 }
 0x11f   :  { %v1099_v6 = vsel %vm971_vm10, %v907_v54, %v1035_v62  ;;  %v841_v8 = vmul.f32 %v1914_v26, %v1721_v16  ;;  %v873_v9 = vmul.f32 %v1411_v27, %v1721_v16  ;;  %vm974_vm12 = vcmp.ge.f32.partialorder %v910_v2, 0.0  ;;  %v1372_v48 = vpop.f32.mrf.mxu0  ;;  %v1420_v49 = vpop.f32.mrf.mxu1 }
 0x120   :  { %v1131_v7 = vsel %vm1003_vm11, %v939_v55, %v1067_v63  ;;  %1163 = vst [vmem:[%s2073_s4 + $0xa0] sm:$0xff] %v1099_v6  ;;  %v1038_v10 = vmul.f32 0.01, %v910_v2  ;;  %vm1006_vm13 = vcmp.ge.f32.partialorder %v942_v3, 0.0  ;;  %v1070_v11 = vmul.f32 0.01, %v942_v3 }
 0x121   :  { %1195 = vst [vmem:[%s2073_s4 + $0x1a0] sm:$0xff] %v1131_v7  ;;  %vm973_vm14 = vcmp.ge.f32.partialorder %v909_v4, 0.0  ;;  %v1037_v12 = vmul.f32 0.01, %v909_v4  ;;  %vm1005_vm15 = vcmp.ge.f32.partialorder %v941_v5, 0.0  ;;  %v912_v20 = vadd.f32 %v1726_v18, %v841_v8  ;;  %v445_v62 = vpop.f32.mrf.mxu0  ;;  %v605_v63 = vpop.f32.mrf.mxu1 }
 0x122   :  { %v1069_v13 = vmul.f32 0.01, %v941_v5  ;;  %v1102_v17 = vsel %vm974_vm12, %v910_v2, %v1038_v10  ;;  %v1134_v19 = vsel %vm1006_vm13, %v942_v3, %v1070_v11  ;;  %v944_v21 = vadd.f32 %v1726_v18, %v873_v9 }
 0x123   :  { %1166 = vst [vmem:[%s2073_s4 + $0xb8] sm:$0xff] %v1102_v17  ;;  %1198 = vst [vmem:[%s2073_s4 + $0x1b8] sm:$0xff] %v1134_v19  ;;  %v1101_v22 = vsel %vm973_vm14, %v909_v4, %v1037_v12  ;;  %v840_v24 = vmul.f32 %v1721_v16, %v1922_v36  ;;  %v872_v25 = vmul.f32 %v1721_v16, %v1924_v37  ;;  %vm976_vm0 = vcmp.ge.f32.partialorder %v912_v20, 0.0 }
 0x124   :  { %v1133_v23 = vsel %vm1005_vm15, %v941_v5, %v1069_v13  ;;  %1165 = vst [vmem:[%s2073_s4 + $0xb0] sm:$0xff] %v1101_v22  ;;  %v1040_v26 = vmul.f32 0.01, %v912_v20  ;;  %vm1008_vm1 = vcmp.ge.f32.partialorder %v944_v21, 0.0  ;;  %v1072_v27 = vmul.f32 0.01, %v944_v21 }
 0x125   :  { %1197 = vst [vmem:[%s2073_s4 + $0x1b0] sm:$0xff] %v1133_v23  ;;  %v911_v28 = vadd.f32 %v1726_v18, %v840_v24  ;;  %v943_v29 = vadd.f32 %v1726_v18, %v872_v25  ;;  %v843_v30 = vmul.f32 %v1366_v50, %v1721_v16  ;;  %v875_v31 = vmul.f32 %v1414_v51, %v1721_v16 }
 0x126   :  { %v1104_v34 = vsel %vm976_vm0, %v912_v20, %v1040_v26  ;;  %v1136_v35 = vsel %vm1008_vm1, %v944_v21, %v1072_v27  ;;  %v842_v36 = vmul.f32 %v1721_v16, %v425_v0  ;;  %v874_v37 = vmul.f32 %v1721_v16, %v585_v1 }
 0x127   :  { %1168 = vst [vmem:[%s2073_s4 + $0xc8] sm:$0xff] %v1104_v34  ;;  %1200 = vst [vmem:[%s2073_s4 + $0x1c8] sm:$0xff] %v1136_v35  ;;  %vm975_vm2 = vcmp.ge.f32.partialorder %v911_v28, 0.0  ;;  %v1039_v38 = vmul.f32 0.01, %v911_v28  ;;  %vm1007_vm3 = vcmp.ge.f32.partialorder %v943_v29, 0.0  ;;  %v914_v40 = vadd.f32 %v1726_v18, %v843_v30 }
 0x128   :  { %v1071_v39 = vmul.f32 0.01, %v943_v29  ;;  %v946_v41 = vadd.f32 %v1726_v18, %v875_v31  ;;  %v913_v42 = vadd.f32 %v1726_v18, %v842_v36  ;;  %v945_v43 = vadd.f32 %v1726_v18, %v874_v37 }
 0x129   :  { %v1103_v44 = vsel %vm975_vm2, %v911_v28, %v1039_v38  ;;  %v845_v46 = vmul.f32 %v1369_v14, %v1721_v16  ;;  %v877_v47 = vmul.f32 %v1417_v15, %v1721_v16  ;;  %vm978_vm4 = vcmp.ge.f32.partialorder %v914_v40, 0.0 }
 0x12a   :  { %v1135_v45 = vsel %vm1007_vm3, %v943_v29, %v1071_v39  ;;  %1167 = vst [vmem:[%s2073_s4 + $0xc0] sm:$0xff] %v1103_v44  ;;  %v1042_v50 = vmul.f32 0.01, %v914_v40  ;;  %vm1010_vm5 = vcmp.ge.f32.partialorder %v946_v41, 0.0  ;;  %v1074_v51 = vmul.f32 0.01, %v946_v41 }
 0x12b   :  { %1199 = vst [vmem:[%s2073_s4 + $0x1c0] sm:$0xff] %v1135_v45  ;;  %vm977_vm6 = vcmp.ge.f32.partialorder %v913_v42, 0.0  ;;  %v1041_v52 = vmul.f32 0.01, %v913_v42  ;;  %vm1009_vm7 = vcmp.ge.f32.partialorder %v945_v43, 0.0  ;;  %v916_v56 = vadd.f32 %v1726_v18, %v845_v46 }
 0x12c   :  { %v1073_v53 = vmul.f32 0.01, %v945_v43  ;;  %v1106_v54 = vsel %vm978_vm4, %v914_v40, %v1042_v50  ;;  %v1138_v55 = vsel %vm1010_vm5, %v946_v41, %v1074_v51  ;;  %v948_v57 = vadd.f32 %v1726_v18, %v877_v47 }
 0x12d   :  { %1170 = vst [vmem:[%s2073_s4 + $0xd8] sm:$0xff] %v1106_v54  ;;  %1202 = vst [vmem:[%s2073_s4 + $0x1d8] sm:$0xff] %v1138_v55  ;;  %v1105_v58 = vsel %vm977_vm6, %v913_v42, %v1041_v52  ;;  %v844_v60 = vmul.f32 %v1721_v16, %v435_v32  ;;  %v876_v61 = vmul.f32 %v1721_v16, %v595_v33  ;;  %vm980_vm8 = vcmp.ge.f32.partialorder %v916_v56, 0.0 }
 0x12e   :  { %v1137_v59 = vsel %vm1009_vm7, %v945_v43, %v1073_v53  ;;  %1169 = vst [vmem:[%s2073_s4 + $0xd0] sm:$0xff] %v1105_v58  ;;  %v1044_v0 = vmul.f32 0.01, %v916_v56  ;;  %vm1012_vm9 = vcmp.ge.f32.partialorder %v948_v57, 0.0  ;;  %v1076_v1 = vmul.f32 0.01, %v948_v57 }
 0x12f   :  { %1201 = vst [vmem:[%s2073_s4 + $0x1d0] sm:$0xff] %v1137_v59  ;;  %v915_v2 = vadd.f32 %v1726_v18, %v844_v60  ;;  %v947_v3 = vadd.f32 %v1726_v18, %v876_v61  ;;  %v847_v4 = vmul.f32 %v1372_v48, %v1721_v16  ;;  %v879_v5 = vmul.f32 %v1420_v49, %v1721_v16 }
 0x130   :  { %v1108_v6 = vsel %vm980_vm8, %v916_v56, %v1044_v0  ;;  %v1140_v7 = vsel %vm1012_vm9, %v948_v57, %v1076_v1  ;;  %v846_v8 = vmul.f32 %v1721_v16, %v445_v62  ;;  %v878_v9 = vmul.f32 %v1721_v16, %v605_v63 }
 0x131   :  { %1172 = vst [vmem:[%s2073_s4 + $0xe8] sm:$0xff] %v1108_v6  ;;  %1204 = vst [vmem:[%s2073_s4 + $0x1e8] sm:$0xff] %v1140_v7  ;;  %vm979_vm10 = vcmp.ge.f32.partialorder %v915_v2, 0.0  ;;  %v1043_v10 = vmul.f32 0.01, %v915_v2  ;;  %vm1011_vm11 = vcmp.ge.f32.partialorder %v947_v3, 0.0  ;;  %v918_v12 = vadd.f32 %v1726_v18, %v847_v4 }
 0x132   :  { %v1075_v11 = vmul.f32 0.01, %v947_v3  ;;  %v950_v13 = vadd.f32 %v1726_v18, %v879_v5  ;;  %v917_v14 = vadd.f32 %v1726_v18, %v846_v8  ;;  %v949_v16 = vadd.f32 %v1726_v18, %v878_v9 }
 0x133   :  { %v1107_v15 = vsel %vm979_vm10, %v915_v2, %v1043_v10  ;;  %vm982_vm12 = vcmp.ge.f32.partialorder %v918_v12, 0.0  ;;  %v1046_v19 = vmul.f32 0.01, %v918_v12 }
 0x134   :  { %v1139_v17 = vsel %vm1011_vm11, %v947_v3, %v1075_v11  ;;  %1171 = vst [vmem:[%s2073_s4 + $0xe0] sm:$0xff] %v1107_v15  ;;  %vm1014_vm13 = vcmp.ge.f32.partialorder %v950_v13, 0.0  ;;  %v1078_v20 = vmul.f32 0.01, %v950_v13  ;;  %vm981_vm14 = vcmp.ge.f32.partialorder %v917_v14, 0.0 }
 0x135   :  { %1203 = vst [vmem:[%s2073_s4 + $0x1e0] sm:$0xff] %v1139_v17  ;;  %v1045_v21 = vmul.f32 0.01, %v917_v14  ;;  %vm1013_vm15 = vcmp.ge.f32.partialorder %v949_v16, 0.0  ;;  %v1077_v22 = vmul.f32 0.01, %v949_v16  ;;  %v1110_v23 = vsel %vm982_vm12, %v918_v12, %v1046_v19 }
 0x136   :  { %v1142_v18 = vsel %vm1014_vm13, %v950_v13, %v1078_v20  ;;  %1174 = vst [vmem:[%s2073_s4 + $0xf8] sm:$0xff] %v1110_v23 }
 0x137   :  { %1206 = vst [vmem:[%s2073_s4 + $0x1f8] sm:$0xff] %v1142_v18  ;;  %v1109_v24 = vsel %vm981_vm14, %v917_v14, %v1045_v21  ;;  %v1141_v25 = vsel %vm1013_vm15, %v949_v16, %v1077_v22 }
 0x138   :  { %1173 = vst [vmem:[%s2073_s4 + $0xf0] sm:$0xff] %v1109_v24  ;;  %1205 = vst [vmem:[%s2073_s4 + $0x1f0] sm:$0xff] %v1141_v25 }

// kernel: darknet_loop_block.4
= control target key start
LH: loop header
LB: loop body
LE: loop exit
PB: predicated region body
PF: predicated region fallthrough
CT: control target
= control target key end

     0   :  { %s3934_s15 = smov 0   ;;  %s3936_s16 = smov 0   ;;  %s4989_s0 = inlined_call_operand.vmem [shape: f32[864,128], index: 0, kind: input, shape index: {}]   ;;  %s4990_s1 = inlined_call_operand.vmem [shape: f32[3,3,128,128], index: 1, kind: input, shape index: {}]   ;;  %s4991_s2 = inlined_call_operand.vmem [shape: f32[1,128], index: 2, kind: input, shape index: {}]   ;;  %s4992_s3 = inlined_call_operand.vmem [shape: f32[1,128], index: 3, kind: input, shape index: {}]   ;;  %s4993_s4 = inlined_call_operand.vmem [shape: f32[2,16,16,128], index: 4, kind: output, shape index: {}]  }
   0x1   :  { %s3938_s17 = smov 0   ;;  %s3940_s18 = smov 0  }
   0x2   :  { %s3942_s19 = smov 0  }
   0x3 LB: > { %s29_s20 = sadd.s32 1, %s3898_s17  ;;  %s33_s21 = sadd.s32 1, %s3902_s18  ;;  %s3906_s19 = sphi %s3942_s19, %s14_s19   ;;  %s3902_s18 = sphi %s3940_s18, %s4997_s18   ;;  %s3898_s17 = sphi %s3938_s17, %s4996_s17   ;;  %s3894_s16 = sphi %s3936_s16, %s4995_s16   ;;  %s3890_s15 = sphi %s3934_s15, %s4994_s15  }
   0x4   : > { %p31_p0 = scmp.ge.s32.totalorder %s29_s20, 2  ;;  %p2683_p1 = scmp.ge.s32.totalorder %s3906_s19, 1 }
   0x5   : > { %p176_p2 = scmp.lt.s32.totalorder %s3906_s19, 5 }
   0x6   : > { %s4999_s20 = smov (%p31_p0, %s29_s20), 0  ;;  %s5001_s21 = smov (!%p31_p0, %s33_s21), %s3902_s18 }
   0x7   : > { %p177_p3 = pnand %p2683_p1, %p176_p2  ;;  %p35_p4 = scmp.ge.s32.totalorder %s5001_s21, 2 }
   0x8   : > { %s2684_s22 = sshll.u32 (!%p177_p3), %s3890_s15, 3  ;;  %p224_p5 = scmp.lt.s32.totalorder (!%p177_p3), %s3894_s16, 1 }
   0x9   : > { %s5003_s21 = smov (%p35_p4, %s5001_s21), 0  ;;  %180 = sbr.rel (%p177_p3) target bundleno = 519 (0x207), region = 32 }
   0xa   : > { %p226_p6 = scmp.lt.s32.totalorder (!%p177_p3), %s2684_s22, 15  ;;  %s237_s23 = smul.u32 (!%p177_p3), 432, %s3894_s16 }
   0xb   : > { %s238_s25 = smul.u32 (!%p177_p3), 192, %s3890_s15 }
   0xd   : > { %s239_s28 = sadd.s32 (!%p177_p3), %s238_s25, %s237_s23 }
   0xe   : > { %v3908_v0 = vmov 0.0   ;;  %s5005_s16 = smov (!%p224_p5, %s3894_s16), 1  ;;  %s5007_s22 = smov (!%p226_p6, %s2684_s22), 15 }
   0xf   : > { %240 = vst [vmem:[#allocation2 + $0xf0] sm:$0xff] %v3908_v0  ;;  %s2686_s24 = sshll.u32 %s5005_s16, 5  ;;  %s2685_s26 = sshll.u32 %s5007_s22, 1 }
  0x10   : > { %s233_s27 = sadd.s32 %s2686_s24, %s2685_s26  ;;  %s3971_s6 = scalar_lea.vmem %s4989_s0, %s239_s28 }
  0x11   : > { %s2687_s29 = sshll.u32 %s233_s27, 3  ;;  %v275_v1 = vld [vmem:[%s3971_s6] sm:$0xff]  ;;  %v277_v2 = vld [vmem:[%s3971_s6 + $0x8] sm:$0xff]  ;;  %v279_v3 = vld [vmem:[%s3971_s6 + $0x10] sm:$0xff] }
  0x12   : > { %s3976_s9 = scalar_lea.vmem %s4993_s4, %s2687_s29  ;;  %276 = vst [vmem:[#allocation2] sm:$0xff] %v275_v1  ;;  %278 = vst [vmem:[#allocation2 + $0x8] sm:$0xff] %v277_v2  ;;  %v281_v4 = vld [vmem:[%s3971_s6 + $0x18] sm:$0xff]  ;;  %v283_v5 = vld [vmem:[%s3971_s6 + $0x20] sm:$0xff] }
  0x13   : > { %280 = vst [vmem:[#allocation2 + $0x10] sm:$0xff] %v279_v3  ;;  %v285_v6 = vld [vmem:[%s3971_s6 + $0x28] sm:$0xff]  ;;  %282 = vst [vmem:[#allocation2 + $0x18] sm:$0xff] %v281_v4  ;;  %v287_v7 = vld [vmem:[%s3971_s6 + $0x30] sm:$0xff] }
  0x14   : > { %284 = vst [vmem:[#allocation2 + $0x20] sm:$0xff] %v283_v5  ;;  %286 = vst [vmem:[#allocation2 + $0x28] sm:$0xff] %v285_v6  ;;  %v289_v8 = vld [vmem:[%s3971_s6 + $0x38] sm:$0xff]  ;;  %v291_v9 = vld [vmem:[%s3971_s6 + $0x40] sm:$0xff] }
  0x15   : > { %288 = vst [vmem:[#allocation2 + $0x30] sm:$0xff] %v287_v7  ;;  %290 = vst [vmem:[#allocation2 + $0x38] sm:$0xff] %v289_v8  ;;  %v293_v10 = vld [vmem:[%s3971_s6 + $0x48] sm:$0xff]  ;;  %v295_v11 = vld [vmem:[%s3971_s6 + $0x50] sm:$0xff] }
  0x16   : > { %292 = vst [vmem:[#allocation2 + $0x40] sm:$0xff] %v291_v9  ;;  %v297_v12 = vld [vmem:[%s3971_s6 + $0x58] sm:$0xff]  ;;  %294 = vst [vmem:[#allocation2 + $0x48] sm:$0xff] %v293_v10  ;;  %v299_v13 = vld [vmem:[%s3971_s6 + $0x60] sm:$0xff] }
  0x17   : > { %296 = vst [vmem:[#allocation2 + $0x50] sm:$0xff] %v295_v11  ;;  %298 = vst [vmem:[#allocation2 + $0x58] sm:$0xff] %v297_v12  ;;  %v301_v14 = vld [vmem:[%s3971_s6 + $0x68] sm:$0xff]  ;;  %v303_v15 = vld [vmem:[%s3971_s6 + $0x70] sm:$0xff] }
  0x18   : > { %300 = vst [vmem:[#allocation2 + $0x60] sm:$0xff] %v299_v13  ;;  %302 = vst [vmem:[#allocation2 + $0x68] sm:$0xff] %v301_v14  ;;  %v305_v16 = vld [vmem:[%s3971_s6 + $0x78] sm:$0xff]  ;;  %v307_v17 = vld [vmem:[%s3971_s6 + $0x80] sm:$0xff] }
  0x19   : > { %304 = vst [vmem:[#allocation2 + $0x70] sm:$0xff] %v303_v15  ;;  %v309_v18 = vld [vmem:[%s3971_s6 + $0x88] sm:$0xff]  ;;  %306 = vst [vmem:[#allocation2 + $0x78] sm:$0xff] %v305_v16  ;;  %v311_v19 = vld [vmem:[%s3971_s6 + $0x90] sm:$0xff] }
  0x1a   : > { %308 = vst [vmem:[#allocation2 + $0x80] sm:$0xff] %v307_v17  ;;  %310 = vst [vmem:[#allocation2 + $0x88] sm:$0xff] %v309_v18  ;;  %v313_v20 = vld [vmem:[%s3971_s6 + $0x98] sm:$0xff]  ;;  %v315_v21 = vld [vmem:[%s3971_s6 + $0xa0] sm:$0xff] }
  0x1b   : > { %312 = vst [vmem:[#allocation2 + $0x90] sm:$0xff] %v311_v19  ;;  %314 = vst [vmem:[#allocation2 + $0x98] sm:$0xff] %v313_v20  ;;  %v317_v22 = vld [vmem:[%s3971_s6 + $0xa8] sm:$0xff]  ;;  %v319_v23 = vld [vmem:[%s3971_s6 + $0xb0] sm:$0xff] }
  0x1c   : > { %316 = vst [vmem:[#allocation2 + $0xa0] sm:$0xff] %v315_v21  ;;  %v321_v24 = vld [vmem:[%s3971_s6 + $0xb8] sm:$0xff]  ;;  %318 = vst [vmem:[#allocation2 + $0xa8] sm:$0xff] %v317_v22  ;;  %v323_v25 = vld [vmem:[%s3971_s6 + $0xc0] sm:$0xff] }
  0x1d   : > { %320 = vst [vmem:[#allocation2 + $0xb0] sm:$0xff] %v319_v23  ;;  %322 = vst [vmem:[#allocation2 + $0xb8] sm:$0xff] %v321_v24  ;;  %v325_v26 = vld [vmem:[%s3971_s6 + $0xc8] sm:$0xff]  ;;  %v327_v27 = vld [vmem:[%s3971_s6 + $0xd0] sm:$0xff] }
  0x1e   : > { %324 = vst [vmem:[#allocation2 + $0xc0] sm:$0xff] %v323_v25  ;;  %326 = vst [vmem:[#allocation2 + $0xc8] sm:$0xff] %v325_v26  ;;  %v329_v28 = vld [vmem:[%s3971_s6 + $0xd8] sm:$0xff]  ;;  %v331_v29 = vld [vmem:[%s3971_s6 + $0xe0] sm:$0xff] }
  0x1f   : > { %328 = vst [vmem:[#allocation2 + $0xd0] sm:$0xff] %v327_v27  ;;  %v333_v30 = vld [vmem:[%s3971_s6 + $0xe8] sm:$0xff]  ;;  %330 = vst [vmem:[#allocation2 + $0xd8] sm:$0xff] %v329_v28 }
  0x20   : > { %332 = vst [vmem:[#allocation2 + $0xe0] sm:$0xff] %v331_v29  ;;  %334 = vst [vmem:[#allocation2 + $0xe8] sm:$0xff] %v333_v30 }
  0x21   : > { %342 = vsyncadd [#allocation3], 3840 }
  0x22   : > { %3886 = dma.done.wait [#allocation3], 3840 }
  0x23   : > { %3887 = vsyncadd [#allocation3], 4294963456  ;;  %v2703_v31 = vld [vmem:[%s4990_s1 + $0xf8] sm:$0xff]  ;;  %v2702_v33 = vld [vmem:[%s4990_s1 + $0xf0] sm:$0xff] }
  0x24   : > { %v385_v32 = vld [vmem:[%s4990_s1 + $0x78] sm:$0xff]  ;;  %3181 = vmatprep.subr.mxu0 %v2703_v31  ;;  %v384_v34 = vld [vmem:[%s4990_s1 + $0x70] sm:$0xff]  ;;  %v2701_v35 = vld [vmem:[%s4990_s1 + $0xe8] sm:$0xff] }
  0x25   : > { %3249 = vmatprep.subr.mxu1 %v385_v32  ;;  %3182 = vmatpush3.msra.mxu0 %v2703_v31  ;;  %v383_v36 = vld [vmem:[%s4990_s1 + $0x68] sm:$0xff]  ;;  %v2700_v37 = vld [vmem:[%s4990_s1 + $0xe0] sm:$0xff]  ;;  %v2699_v39 = vld [vmem:[%s4990_s1 + $0xd8] sm:$0xff] }
  0x26   : > { %3250 = vmatpush3.msra.mxu1 %v385_v32  ;;  %3183 = vmatprep.subr.mxu0 %v2702_v33  ;;  %v382_v38 = vld [vmem:[%s4990_s1 + $0x60] sm:$0xff]  ;;  %v381_v40 = vld [vmem:[%s4990_s1 + $0x58] sm:$0xff]  ;;  %v2698_v41 = vld [vmem:[%s4990_s1 + $0xd0] sm:$0xff] }
  0x27   : > { %3251 = vmatprep.subr.mxu1 %v384_v34  ;;  %3184 = vmatpush3.msra.mxu0 %v2702_v33  ;;  %v380_v42 = vld [vmem:[%s4990_s1 + $0x50] sm:$0xff]  ;;  %v2697_v43 = vld [vmem:[%s4990_s1 + $0xc8] sm:$0xff]  ;;  %v2696_v45 = vld [vmem:[%s4990_s1 + $0xc0] sm:$0xff] }
  0x28   : > { %3252 = vmatpush3.msra.mxu1 %v384_v34  ;;  %3185 = vmatprep.subr.mxu0 %v2701_v35  ;;  %v379_v44 = vld [vmem:[%s4990_s1 + $0x48] sm:$0xff]  ;;  %v378_v46 = vld [vmem:[%s4990_s1 + $0x40] sm:$0xff]  ;;  %v2695_v47 = vld [vmem:[%s4990_s1 + $0xb8] sm:$0xff] }
  0x29   : > { %3253 = vmatprep.subr.mxu1 %v383_v36  ;;  %3186 = vmatpush3.msra.mxu0 %v2701_v35  ;;  %v377_v48 = vld [vmem:[%s4990_s1 + $0x38] sm:$0xff]  ;;  %v2694_v49 = vld [vmem:[%s4990_s1 + $0xb0] sm:$0xff]  ;;  %v2693_v51 = vld [vmem:[%s4990_s1 + $0xa8] sm:$0xff] }
  0x2a   : > { %3254 = vmatpush3.msra.mxu1 %v383_v36  ;;  %3187 = vmatprep.subr.mxu0 %v2700_v37  ;;  %v376_v50 = vld [vmem:[%s4990_s1 + $0x30] sm:$0xff]  ;;  %v375_v52 = vld [vmem:[%s4990_s1 + $0x28] sm:$0xff]  ;;  %v2692_v53 = vld [vmem:[%s4990_s1 + $0xa0] sm:$0xff] }
  0x2b   : > { %3255 = vmatprep.subr.mxu1 %v382_v38  ;;  %3188 = vmatpush3.msra.mxu0 %v2700_v37  ;;  %v374_v54 = vld [vmem:[%s4990_s1 + $0x20] sm:$0xff]  ;;  %v2691_v55 = vld [vmem:[%s4990_s1 + $0x98] sm:$0xff]  ;;  %v2690_v57 = vld [vmem:[%s4990_s1 + $0x90] sm:$0xff] }
  0x2c   : > { %3256 = vmatpush3.msra.mxu1 %v382_v38  ;;  %3189 = vmatprep.subr.mxu0 %v2699_v39  ;;  %v373_v56 = vld [vmem:[%s4990_s1 + $0x18] sm:$0xff]  ;;  %v372_v58 = vld [vmem:[%s4990_s1 + $0x10] sm:$0xff]  ;;  %v2689_v59 = vld [vmem:[%s4990_s1 + $0x88] sm:$0xff] }
  0x2d   : > { %3257 = vmatprep.subr.mxu1 %v381_v40  ;;  %3190 = vmatpush3.msra.mxu0 %v2699_v39  ;;  %v371_v60 = vld [vmem:[%s4990_s1 + $0x8] sm:$0xff]  ;;  %v2688_v61 = vld [vmem:[%s4990_s1 + $0x80] sm:$0xff]  ;;  %v2719_v3 = vld [vmem:[%s4990_s1 + $0x178] sm:$0xff] }
  0x2e   : > { %3258 = vmatpush3.msra.mxu1 %v381_v40  ;;  %3191 = vmatprep.subr.mxu0 %v2698_v41  ;;  %v370_v62 = vld [vmem:[%s4990_s1] sm:$0xff]  ;;  %v387_v1 = vld [vmem:[#allocation2 + $0x9] sm:$0xff]  ;;  %v2735_v4 = vld [vmem:[%s4990_s1 + $0x1f8] sm:$0xff] }
  0x2f   : > { %3259 = vmatprep.subr.mxu1 %v380_v42  ;;  %3192 = vmatpush3.msra.mxu0 %v2698_v41  ;;  %v386_v63 = vld [vmem:[#allocation2 + $0x1] sm:$0xff]  ;;  %v388_v5 = vld [vmem:[#allocation2 + $0x11] sm:$0xff]  ;;  %v4116_v9 = vld [vmem:[#allocation2 + $0x19] sm:$0xff] }
  0x30   : > { %3260 = vmatpush3.msra.mxu1 %v380_v42  ;;  %3193 = vmatprep.subr.mxu0 %v2697_v43  ;;  %v346_v0 = vld [vmem:[#allocation2] sm:$0xff]  ;;  %v347_v2 = vld [vmem:[#allocation2 + $0x8] sm:$0xff]  ;;  %v348_v6 = vld [vmem:[#allocation2 + $0x10] sm:$0xff] }
  0x31   : > { %3261 = vmatprep.subr.mxu1 %v379_v44  ;;  %3194 = vmatpush3.msra.mxu0 %v2697_v43  ;;  %v2718_v7 = vld [vmem:[%s4990_s1 + $0x170] sm:$0xff]  ;;  %v4118_v10 = vld [vmem:[#allocation2 + $0x18] sm:$0xff]  ;;  %v2717_v11 = vld [vmem:[%s4990_s1 + $0x168] sm:$0xff] }
  0x32   : > { %3262 = vmatpush3.msra.mxu1 %v379_v44  ;;  %3195 = vmatprep.subr.mxu0 %v2696_v45  ;;  %v2734_v8 = vld [vmem:[%s4990_s1 + $0x1f0] sm:$0xff]  ;;  %v2733_v12 = vld [vmem:[%s4990_s1 + $0x1e8] sm:$0xff]  ;;  %v4130_v14 = vld [vmem:[#allocation2 + $0x20] sm:$0xff] }
  0x33   : > { %3263 = vmatprep.subr.mxu1 %v378_v46  ;;  %3196 = vmatpush3.msra.mxu0 %v2696_v45  ;;  %v4128_v13 = vld [vmem:[#allocation2 + $0x21] sm:$0xff]  ;;  %v4132_v15 = vld [vmem:[#allocation2 + $0x29] sm:$0xff]  ;;  %v4146_v19 = vld [vmem:[#allocation2 + $0x31] sm:$0xff] }
  0x34   : > { %3264 = vmatpush3.msra.mxu1 %v378_v46  ;;  %3197 = vmatprep.subr.mxu0 %v2695_v47  ;;  %v4134_v16 = vld [vmem:[#allocation2 + $0x28] sm:$0xff]  ;;  %v2716_v17 = vld [vmem:[%s4990_s1 + $0x160] sm:$0xff]  ;;  %v4148_v20 = vld [vmem:[#allocation2 + $0x30] sm:$0xff] }
  0x35   : > { %3265 = vmatprep.subr.mxu1 %v377_v48  ;;  %3198 = vmatpush3.msra.mxu0 %v2695_v47  ;;  %v2732_v18 = vld [vmem:[%s4990_s1 + $0x1e0] sm:$0xff]  ;;  %v4152_v22 = vld [vmem:[#allocation2 + $0x38] sm:$0xff]  ;;  %v2714_v27 = vld [vmem:[%s4990_s1 + $0x150] sm:$0xff] }
  0x36   : > { %3266 = vmatpush3.msra.mxu1 %v377_v48  ;;  %3199 = vmatprep.subr.mxu0 %v2694_v49  ;;  %v4150_v21 = vld [vmem:[#allocation2 + $0x39] sm:$0xff]  ;;  %v4164_v25 = vld [vmem:[#allocation2 + $0x41] sm:$0xff]  ;;  %v2730_v28 = vld [vmem:[%s4990_s1 + $0x1d0] sm:$0xff] }
  0x37   : > { %3267 = vmatprep.subr.mxu1 %v376_v50  ;;  %3200 = vmatpush3.msra.mxu0 %v2694_v49  ;;  %v2715_v23 = vld [vmem:[%s4990_s1 + $0x158] sm:$0xff]  ;;  %v4166_v26 = vld [vmem:[#allocation2 + $0x40] sm:$0xff]  ;;  %v4174_v29 = vld [vmem:[#allocation2 + $0x49] sm:$0xff] }
  0x38   : > { %3268 = vmatpush3.msra.mxu1 %v376_v50  ;;  %3201 = vmatprep.subr.mxu0 %v2693_v51  ;;  %v2731_v24 = vld [vmem:[%s4990_s1 + $0x1d8] sm:$0xff]  ;;  %v4176_v30 = vld [vmem:[#allocation2 + $0x48] sm:$0xff]  ;;  %v4190_v34 = vld [vmem:[#allocation2 + $0x50] sm:$0xff] }
  0x39   : > { %3269 = vmatprep.subr.mxu1 %v375_v52  ;;  %3202 = vmatpush3.msra.mxu0 %v2693_v51  ;;  %v2713_v31 = vld [vmem:[%s4990_s1 + $0x148] sm:$0xff]  ;;  %v4188_v33 = vld [vmem:[#allocation2 + $0x51] sm:$0xff]  ;;  %v4192_v35 = vld [vmem:[#allocation2 + $0x59] sm:$0xff] }
  0x3a   : > { %3270 = vmatpush3.msra.mxu1 %v375_v52  ;;  %3203 = vmatprep.subr.mxu0 %v2692_v53  ;;  %v2729_v32 = vld [vmem:[%s4990_s1 + $0x1c8] sm:$0xff]  ;;  %v4194_v36 = vld [vmem:[#allocation2 + $0x58] sm:$0xff]  ;;  %v2712_v37 = vld [vmem:[%s4990_s1 + $0x140] sm:$0xff] }
  0x3b   : > { %3271 = vmatprep.subr.mxu1 %v374_v54  ;;  %3204 = vmatpush3.msra.mxu0 %v2692_v53  ;;  %v2728_v38 = vld [vmem:[%s4990_s1 + $0x1c0] sm:$0xff]  ;;  %v4210_v41 = vld [vmem:[#allocation2 + $0x69] sm:$0xff]  ;;  %v2711_v43 = vld [vmem:[%s4990_s1 + $0x138] sm:$0xff] }
  0x3c   : > { %3272 = vmatpush3.msra.mxu1 %v374_v54  ;;  %3205 = vmatprep.subr.mxu0 %v2691_v55  ;;  %v4206_v39 = vld [vmem:[#allocation2 + $0x61] sm:$0xff]  ;;  %v2727_v44 = vld [vmem:[%s4990_s1 + $0x1b8] sm:$0xff]  ;;  %v4226_v46 = vld [vmem:[#allocation2 + $0x70] sm:$0xff] }
  0x3d   : > { %3273 = vmatprep.subr.mxu1 %v373_v56  ;;  %3206 = vmatpush3.msra.mxu0 %v2691_v55  ;;  %v4208_v40 = vld [vmem:[#allocation2 + $0x60] sm:$0xff]  ;;  %v4212_v42 = vld [vmem:[#allocation2 + $0x68] sm:$0xff]  ;;  %v4224_v45 = vld [vmem:[#allocation2 + $0x71] sm:$0xff] }
  0x3e   : > { %3274 = vmatpush3.msra.mxu1 %v373_v56  ;;  %3207 = vmatprep.subr.mxu0 %v2690_v57  ;;  %v2710_v47 = vld [vmem:[%s4990_s1 + $0x130] sm:$0xff]  ;;  %v4234_v49 = vld [vmem:[#allocation2 + $0x79] sm:$0xff]  ;;  %v2709_v51 = vld [vmem:[%s4990_s1 + $0x128] sm:$0xff] }
  0x3f   : > { %3275 = vmatprep.subr.mxu1 %v372_v58  ;;  %3208 = vmatpush3.msra.mxu0 %v2690_v57  ;;  %v2726_v48 = vld [vmem:[%s4990_s1 + $0x1b0] sm:$0xff]  ;;  %v4236_v50 = vld [vmem:[#allocation2 + $0x78] sm:$0xff]  ;;  %v2725_v52 = vld [vmem:[%s4990_s1 + $0x1a8] sm:$0xff] }
  0x40   : > { %3276 = vmatpush3.msra.mxu1 %v372_v58  ;;  %3209 = vmatprep.subr.mxu0 %v2689_v59  ;;  %v4248_v53 = vld [vmem:[#allocation2 + $0x81] sm:$0xff]  ;;  %v4252_v55 = vld [vmem:[#allocation2 + $0x89] sm:$0xff] }
  0x41   : > { %3277 = vmatprep.subr.mxu1 %v371_v60  ;;  %3210 = vmatpush3.msra.mxu0 %v2689_v59  ;;  %v4250_v54 = vld [vmem:[#allocation2 + $0x80] sm:$0xff]  ;;  %v4254_v56 = vld [vmem:[#allocation2 + $0x88] sm:$0xff]  ;;  %v4266_v59 = vld [vmem:[#allocation2 + $0x91] sm:$0xff] }
  0x42   : > { %3278 = vmatpush3.msra.mxu1 %v371_v60  ;;  %3211 = vmatprep.subr.mxu0 %v2688_v61  ;;  %v2708_v57 = vld [vmem:[%s4990_s1 + $0x120] sm:$0xff]  ;;  %v4268_v60 = vld [vmem:[#allocation2 + $0x90] sm:$0xff] }
  0x43   : > { %3279 = vmatprep.subr.mxu1 %v370_v62  ;;  %3212 = vmatpush3.msra.mxu0 %v2688_v61  ;;  %v2724_v58 = vld [vmem:[%s4990_s1 + $0x1a0] sm:$0xff] }
  0x44   : > { %3213 = vmatprep.mubr.f32.mxu0 %v386_v63  ;;  %3280 = vmatpush3.msra.mxu1 %v370_v62  ;;  %v4270_v61 = vld [vmem:[#allocation2 + $0x99] sm:$0xff] }
  0x45   : > { %3281 = vmatprep.mubr.f32.mxu1 %v346_v0  ;;  %3214 = vmatmul.mubr.f32.vlgmr.msra.gmra.mxu0 %v387_v1  ;;  %v4272_v62 = vld [vmem:[#allocation2 + $0x98] sm:$0xff]  ;;  %v4284_v1 = vld [vmem:[#allocation2 + $0xa1] sm:$0xff] }
  0x46   : > { %3282 = vmatmul.mubr.f32.vlgmr.msra.gmra.mxu1 %v347_v2  ;;  %3317 = vmatprep.subr.mxu0 %v2719_v3  ;;  %v2707_v63 = vld [vmem:[%s4990_s1 + $0x118] sm:$0xff]  ;;  %v4286_v2 = vld [vmem:[#allocation2 + $0xa0] sm:$0xff] }
  0x47   : > { %3385 = vmatprep.subr.mxu1 %v2735_v4  ;;  %3318 = vmatpush3.msra.mxu0 %v2719_v3  ;;  %v2723_v0 = vld [vmem:[%s4990_s1 + $0x198] sm:$0xff]  ;;  %v2706_v3 = vld [vmem:[%s4990_s1 + $0x110] sm:$0xff] }
  0x48   : > { %3386 = vmatpush3.msra.mxu1 %v2735_v4  ;;  %3216 = vmatprep.mubr.f32.mxu0 %v388_v5  ;;  %v2722_v4 = vld [vmem:[%s4990_s1 + $0x190] sm:$0xff] }
  0x49   : > { %3284 = vmatprep.mubr.f32.mxu1 %v348_v6  ;;  %3319 = vmatprep.subr.mxu0 %v2718_v7  ;;  %v4294_v5 = vld [vmem:[#allocation2 + $0xa9] sm:$0xff] }
  0x4a   : > { %3387 = vmatprep.subr.mxu1 %v2734_v8  ;;  %3217 = vmatmul.mubr.f32.gmra.mxu0 %v4116_v9  ;;  %v4296_v6 = vld [vmem:[#allocation2 + $0xa8] sm:$0xff] }
  0x4b   : > { %3285 = vmatmul.mubr.f32.gmra.mxu1 %v4118_v10  ;;  %3320 = vmatpush3.msra.mxu0 %v2718_v7  ;;  %v2705_v7 = vld [vmem:[%s4990_s1 + $0x108] sm:$0xff] }
  0x4c   : > { %3388 = vmatpush3.msra.mxu1 %v2734_v8  ;;  %3321 = vmatprep.subr.mxu0 %v2717_v11  ;;  %v2721_v8 = vld [vmem:[%s4990_s1 + $0x188] sm:$0xff] }
  0x4d   : > { %3389 = vmatprep.subr.mxu1 %v2733_v12  ;;  %3219 = vmatprep.mubr.f32.mxu0 %v4128_v13 }
  0x4e   : > { %3287 = vmatprep.mubr.f32.mxu1 %v4130_v14  ;;  %3322 = vmatpush3.msra.mxu0 %v2717_v11  ;;  %v4308_v11 = vld [vmem:[#allocation2 + $0xb1] sm:$0xff] }
  0x4f   : > { %3390 = vmatpush3.msra.mxu1 %v2733_v12  ;;  %3220 = vmatmul.mubr.f32.gmra.mxu0 %v4132_v15  ;;  %v4310_v12 = vld [vmem:[#allocation2 + $0xb0] sm:$0xff] }
  0x50   : > { %3288 = vmatmul.mubr.f32.gmra.mxu1 %v4134_v16  ;;  %3323 = vmatprep.subr.mxu0 %v2716_v17 }
  0x51   : > { %3391 = vmatprep.subr.mxu1 %v2732_v18  ;;  %3324 = vmatpush3.msra.mxu0 %v2716_v17  ;;  %v4312_v17 = vld [vmem:[#allocation2 + $0xb9] sm:$0xff] }
  0x52   : > { %3392 = vmatpush3.msra.mxu1 %v2732_v18  ;;  %3222 = vmatprep.mubr.f32.mxu0 %v4146_v19  ;;  %v4314_v18 = vld [vmem:[#allocation2 + $0xb8] sm:$0xff] }
  0x53   : > { %3290 = vmatprep.mubr.f32.mxu1 %v4148_v20  ;;  %3223 = vmatmul.mubr.f32.gmra.mxu0 %v4150_v21 }
  0x54   : > { %3291 = vmatmul.mubr.f32.gmra.mxu1 %v4152_v22  ;;  %3325 = vmatprep.subr.mxu0 %v2715_v23 }
  0x55   : > { %3393 = vmatprep.subr.mxu1 %v2731_v24  ;;  %3326 = vmatpush3.msra.mxu0 %v2715_v23  ;;  %v2704_v23 = vld [vmem:[%s4990_s1 + $0x100] sm:$0xff] }
  0x56   : > { %3394 = vmatpush3.msra.mxu1 %v2731_v24  ;;  %3225 = vmatprep.mubr.f32.mxu0 %v4164_v25  ;;  %v2720_v24 = vld [vmem:[%s4990_s1 + $0x180] sm:$0xff] }
  0x57   : > { %3293 = vmatprep.mubr.f32.mxu1 %v4166_v26  ;;  %3327 = vmatprep.subr.mxu0 %v2714_v27 }
  0x58   : > { %3395 = vmatprep.subr.mxu1 %v2730_v28  ;;  %3226 = vmatmul.mubr.f32.gmra.mxu0 %v4174_v29 }
  0x59   : > { %3294 = vmatmul.mubr.f32.gmra.mxu1 %v4176_v30  ;;  %3328 = vmatpush3.msra.mxu0 %v2714_v27  ;;  %v781_v27 = vld [vmem:[#allocation2 + $0x2] sm:$0xff] }
  0x5a   : > { %3396 = vmatpush3.msra.mxu1 %v2730_v28  ;;  %3329 = vmatprep.subr.mxu0 %v2713_v31  ;;  %v782_v28 = vld [vmem:[#allocation2 + $0xa] sm:$0xff] }
  0x5b   : > { %3397 = vmatprep.subr.mxu1 %v2729_v32  ;;  %3228 = vmatprep.mubr.f32.mxu0 %v4188_v33 }
  0x5c   : > { %3296 = vmatprep.mubr.f32.mxu1 %v4190_v34  ;;  %3330 = vmatpush3.msra.mxu0 %v2713_v31  ;;  %v2751_v31 = vld [vmem:[%s4990_s1 + $0x278] sm:$0xff] }
  0x5d   : > { %3398 = vmatpush3.msra.mxu1 %v2729_v32  ;;  %3229 = vmatmul.mubr.f32.gmra.mxu0 %v4192_v35  ;;  %v2767_v32 = vld [vmem:[%s4990_s1 + $0x2f8] sm:$0xff] }
  0x5e   : > { %3297 = vmatmul.mubr.f32.gmra.mxu1 %v4194_v36  ;;  %3331 = vmatprep.subr.mxu0 %v2712_v37 }
  0x5f   : > { %3399 = vmatprep.subr.mxu1 %v2728_v38  ;;  %3332 = vmatpush3.msra.mxu0 %v2712_v37  ;;  %v783_v37 = vld [vmem:[#allocation2 + $0x12] sm:$0xff] }
  0x60   : > { %3400 = vmatpush3.msra.mxu1 %v2728_v38  ;;  %3231 = vmatprep.mubr.f32.mxu0 %v4206_v39  ;;  %v2750_v38 = vld [vmem:[%s4990_s1 + $0x270] sm:$0xff] }
  0x61   : > { %3299 = vmatprep.mubr.f32.mxu1 %v4208_v40  ;;  %3232 = vmatmul.mubr.f32.gmra.mxu0 %v4210_v41 }
  0x62   : > { %3300 = vmatmul.mubr.f32.gmra.mxu1 %v4212_v42  ;;  %3333 = vmatprep.subr.mxu0 %v2711_v43 }
  0x63   : > { %3401 = vmatprep.subr.mxu1 %v2727_v44  ;;  %3334 = vmatpush3.msra.mxu0 %v2711_v43  ;;  %v2766_v43 = vld [vmem:[%s4990_s1 + $0x2f0] sm:$0xff] }
  0x64   : > { %3402 = vmatpush3.msra.mxu1 %v2727_v44  ;;  %3234 = vmatprep.mubr.f32.mxu0 %v4224_v45  ;;  %v4340_v44 = vld [vmem:[#allocation2 + $0x1a] sm:$0xff] }
  0x65   : > { %3302 = vmatprep.mubr.f32.mxu1 %v4226_v46  ;;  %3335 = vmatprep.subr.mxu0 %v2710_v47 }
  0x66   : > { %3403 = vmatprep.subr.mxu1 %v2726_v48  ;;  %3235 = vmatmul.mubr.f32.gmra.mxu0 %v4234_v49 }
  0x67   : > { %3303 = vmatmul.mubr.f32.gmra.mxu1 %v4236_v50  ;;  %3336 = vmatpush3.msra.mxu0 %v2710_v47  ;;  %v4351_v47 = vld [vmem:[#allocation2 + $0x22] sm:$0xff] }
  0x68   : > { %3404 = vmatpush3.msra.mxu1 %v2726_v48  ;;  %3337 = vmatprep.subr.mxu0 %v2709_v51  ;;  %v2748_v48 = vld [vmem:[%s4990_s1 + $0x260] sm:$0xff] }
  0x69   : > { %3405 = vmatprep.subr.mxu1 %v2725_v52  ;;  %3237 = vmatprep.mubr.f32.mxu0 %v4248_v53 }
  0x6a   : > { %3305 = vmatprep.mubr.f32.mxu1 %v4250_v54  ;;  %3338 = vmatpush3.msra.mxu0 %v2709_v51  ;;  %v4365_v51 = vld [vmem:[#allocation2 + $0x32] sm:$0xff] }
  0x6b   : > { %3406 = vmatpush3.msra.mxu1 %v2725_v52  ;;  %3238 = vmatmul.mubr.f32.gmra.mxu0 %v4252_v55  ;;  %v4367_v52 = vld [vmem:[#allocation2 + $0x3a] sm:$0xff] }
  0x6c   : > { %3306 = vmatmul.mubr.f32.gmra.mxu1 %v4254_v56  ;;  %3339 = vmatprep.subr.mxu0 %v2708_v57 }
  0x6d   : > { %3407 = vmatprep.subr.mxu1 %v2724_v58  ;;  %3340 = vmatpush3.msra.mxu0 %v2708_v57  ;;  %v2763_v57 = vld [vmem:[%s4990_s1 + $0x2d8] sm:$0xff] }
  0x6e   : > { %3408 = vmatpush3.msra.mxu1 %v2724_v58  ;;  %3240 = vmatprep.mubr.f32.mxu0 %v4266_v59  ;;  %v2746_v58 = vld [vmem:[%s4990_s1 + $0x250] sm:$0xff] }
  0x6f   : > { %3308 = vmatprep.mubr.f32.mxu1 %v4268_v60  ;;  %3241 = vmatmul.mubr.f32.gmra.mxu0 %v4270_v61 }
  0x70   : > { %3309 = vmatmul.mubr.f32.gmra.mxu1 %v4272_v62  ;;  %3341 = vmatprep.subr.mxu0 %v2707_v63 }
  0x71   : > { %3409 = vmatprep.subr.mxu1 %v2723_v0  ;;  %3342 = vmatpush3.msra.mxu0 %v2707_v63  ;;  %v2762_v63 = vld [vmem:[%s4990_s1 + $0x2d0] sm:$0xff] }
  0x72   : > { %3410 = vmatpush3.msra.mxu1 %v2723_v0  ;;  %3243 = vmatprep.mubr.f32.mxu0 %v4284_v1  ;;  %v4387_v0 = vld [vmem:[#allocation2 + $0x4a] sm:$0xff] }
  0x73   : > { %3311 = vmatprep.mubr.f32.mxu1 %v4286_v2  ;;  %3343 = vmatprep.subr.mxu0 %v2706_v3 }
  0x74   : > { %3411 = vmatprep.subr.mxu1 %v2722_v4  ;;  %3244 = vmatmul.mubr.f32.gmra.mxu0 %v4294_v5 }
  0x75   : > { %3312 = vmatmul.mubr.f32.gmra.mxu1 %v4296_v6  ;;  %3344 = vmatpush3.msra.mxu0 %v2706_v3  ;;  %v4399_v3 = vld [vmem:[#allocation2 + $0x52] sm:$0xff] }
  0x76   : > { %3412 = vmatpush3.msra.mxu1 %v2722_v4  ;;  %3345 = vmatprep.subr.mxu0 %v2705_v7  ;;  %v2744_v4 = vld [vmem:[%s4990_s1 + $0x240] sm:$0xff] }
  0x77   : > { %3413 = vmatprep.subr.mxu1 %v2721_v8  ;;  %3246 = vmatprep.mubr.f32.mxu0 %v4308_v11 }
  0x78   : > { %3314 = vmatprep.mubr.f32.mxu1 %v4310_v12  ;;  %3346 = vmatpush3.msra.mxu0 %v2705_v7  ;;  %v4413_v7 = vld [vmem:[#allocation2 + $0x62] sm:$0xff] }
  0x79   : > { %3414 = vmatpush3.msra.mxu1 %v2721_v8  ;;  %3247 = vmatmul.mubr.f32.gmra.mxu0 %v4312_v17  ;;  %v4415_v8 = vld [vmem:[#allocation2 + $0x6a] sm:$0xff] }
  0x7a   : > { %3315 = vmatmul.mubr.f32.gmra.mxu1 %v4314_v18  ;;  %3347 = vmatprep.subr.mxu0 %v2704_v23 }
  0x7b   : > { %3415 = vmatprep.subr.mxu1 %v2720_v24  ;;  %3348 = vmatpush3.msra.mxu0 %v2704_v23  ;;  %v2759_v23 = vld [vmem:[%s4990_s1 + $0x2b8] sm:$0xff] }
  0x7c   : > { %3416 = vmatpush3.msra.mxu1 %v2720_v24  ;;  %3349 = vmatprep.mubr.f32.mxu0 %v781_v27  ;;  %v2742_v24 = vld [vmem:[%s4990_s1 + $0x230] sm:$0xff] }
  0x7d   : > { %3417 = vmatprep.mubr.f32.mxu1 %v4118_v10  ;;  %3350 = vmatmul.mubr.f32.vlgmr.msra.gmra.mxu0 %v782_v28  ;;  %v2749_v10 = vld [vmem:[%s4990_s1 + $0x268] sm:$0xff]  ;;  %v2758_v27 = vld [vmem:[%s4990_s1 + $0x2b0] sm:$0xff]  ;;  %v4435_v28 = vld [vmem:[#allocation2 + $0x7a] sm:$0xff] }
  0x7e   : > { %3418 = vmatmul.mubr.f32.vlgmr.msra.gmra.mxu1 %v4130_v14  ;;  %3453 = vmatprep.subr.mxu0 %v2751_v31  ;;  %v2765_v14 = vld [vmem:[%s4990_s1 + $0x2e8] sm:$0xff] }
  0x7f   : > { %3521 = vmatprep.subr.mxu1 %v2767_v32  ;;  %3454 = vmatpush3.msra.mxu0 %v2751_v31  ;;  %v4447_v31 = vld [vmem:[#allocation2 + $0x82] sm:$0xff] }
  0x80   : > { %3522 = vmatpush3.msra.mxu1 %v2767_v32  ;;  %3352 = vmatprep.mubr.f32.mxu0 %v783_v37  ;;  %v2740_v32 = vld [vmem:[%s4990_s1 + $0x220] sm:$0xff]  ;;  %v4461_v37 = vld [vmem:[#allocation2 + $0x92] sm:$0xff] }
  0x81   : > { %3420 = vmatprep.mubr.f32.mxu1 %v4134_v16  ;;  %3455 = vmatprep.subr.mxu0 %v2750_v38  ;;  %v4353_v16 = vld [vmem:[#allocation2 + $0x2a] sm:$0xff] }
  0x82   : > { %3523 = vmatprep.subr.mxu1 %v2766_v43  ;;  %3353 = vmatmul.mubr.f32.gmra.mxu0 %v4340_v44 }
  0x83   : > { %3421 = vmatmul.mubr.f32.gmra.mxu1 %v4148_v20  ;;  %3456 = vmatpush3.msra.mxu0 %v2750_v38  ;;  %v2764_v20 = vld [vmem:[%s4990_s1 + $0x2e0] sm:$0xff] }
  0x84   : > { %3524 = vmatpush3.msra.mxu1 %v2766_v43  ;;  %3457 = vmatprep.subr.mxu0 %v2749_v10  ;;  %v4463_v38 = vld [vmem:[#allocation2 + $0x9a] sm:$0xff] }
  0x85   : > { %3525 = vmatprep.subr.mxu1 %v2765_v14  ;;  %3355 = vmatprep.mubr.f32.mxu0 %v4351_v47  ;;  %v2755_v43 = vld [vmem:[%s4990_s1 + $0x298] sm:$0xff] }
  0x86   : > { %3423 = vmatprep.mubr.f32.mxu1 %v4152_v22  ;;  %3458 = vmatpush3.msra.mxu0 %v2749_v10  ;;  %v2747_v22 = vld [vmem:[%s4990_s1 + $0x258] sm:$0xff]  ;;  %v2738_v10 = vld [vmem:[%s4990_s1 + $0x210] sm:$0xff] }
  0x87   : > { %3526 = vmatpush3.msra.mxu1 %v2765_v14  ;;  %3356 = vmatmul.mubr.f32.gmra.mxu0 %v4353_v16  ;;  %v2754_v14 = vld [vmem:[%s4990_s1 + $0x290] sm:$0xff] }
  0x88   : > { %3424 = vmatmul.mubr.f32.gmra.mxu1 %v4166_v26  ;;  %3459 = vmatprep.subr.mxu0 %v2748_v48  ;;  %v4379_v26 = vld [vmem:[#allocation2 + $0x42] sm:$0xff] }
  0x89   : > { %3527 = vmatprep.subr.mxu1 %v2764_v20  ;;  %3460 = vmatpush3.msra.mxu0 %v2748_v48  ;;  %v4483_v48 = vld [vmem:[#allocation2 + $0xaa] sm:$0xff] }
  0x8a   : > { %3528 = vmatpush3.msra.mxu1 %v2764_v20  ;;  %3358 = vmatprep.mubr.f32.mxu0 %v4365_v51  ;;  %v2753_v20 = vld [vmem:[%s4990_s1 + $0x288] sm:$0xff] }
  0x8b   : > { %3426 = vmatprep.mubr.f32.mxu1 %v4176_v30  ;;  %3359 = vmatmul.mubr.f32.gmra.mxu0 %v4367_v52  ;;  %v2745_v30 = vld [vmem:[%s4990_s1 + $0x248] sm:$0xff] }
  0x8c   : > { %3427 = vmatmul.mubr.f32.gmra.mxu1 %v4190_v34  ;;  %3461 = vmatprep.subr.mxu0 %v2747_v22  ;;  %v2761_v34 = vld [vmem:[%s4990_s1 + $0x2c8] sm:$0xff] }
  0x8d   : > { %3529 = vmatprep.subr.mxu1 %v2763_v57  ;;  %3462 = vmatpush3.msra.mxu0 %v2747_v22  ;;  %v4497_v22 = vld [vmem:[#allocation2 + $0xb2] sm:$0xff] }
  0x8e   : > { %3530 = vmatpush3.msra.mxu1 %v2763_v57  ;;  %3361 = vmatprep.mubr.f32.mxu0 %v4379_v26  ;;  %v4499_v57 = vld [vmem:[#allocation2 + $0xc8] sm:$0xff] }
  0x8f   : > { %3429 = vmatprep.mubr.f32.mxu1 %v4194_v36  ;;  %3463 = vmatprep.subr.mxu0 %v2746_v58  ;;  %v4401_v36 = vld [vmem:[#allocation2 + $0x5a] sm:$0xff] }
  0x90   : > { %3531 = vmatprep.subr.mxu1 %v2762_v63  ;;  %3362 = vmatmul.mubr.f32.gmra.mxu0 %v4387_v0 }
  0x91   : > { %3430 = vmatmul.mubr.f32.gmra.mxu1 %v4208_v40  ;;  %3464 = vmatpush3.msra.mxu0 %v2746_v58  ;;  %v2760_v40 = vld [vmem:[%s4990_s1 + $0x2c0] sm:$0xff]  ;;  %v4503_v58 = vld [vmem:[#allocation2 + $0xd0] sm:$0xff] }
  0x92   : > { %3532 = vmatpush3.msra.mxu1 %v2762_v63  ;;  %3465 = vmatprep.subr.mxu0 %v2745_v30  ;;  %v2736_v63 = vld [vmem:[%s4990_s1 + $0x200] sm:$0xff] }
  0x93   : > { %3533 = vmatprep.subr.mxu1 %v2761_v34  ;;  %3364 = vmatprep.mubr.f32.mxu0 %v4399_v3 }
  0x94   : > { %3432 = vmatprep.mubr.f32.mxu1 %v4212_v42  ;;  %3466 = vmatpush3.msra.mxu0 %v2745_v30  ;;  %v2743_v42 = vld [vmem:[%s4990_s1 + $0x238] sm:$0xff]  ;;  %v2752_v30 = vld [vmem:[%s4990_s1 + $0x280] sm:$0xff] }
  0x95   : > { %3534 = vmatpush3.msra.mxu1 %v2761_v34  ;;  %3365 = vmatmul.mubr.f32.gmra.mxu0 %v4401_v36  ;;  %v2783_v34 = vld [vmem:[%s4990_s1 + $0x378] sm:$0xff] }
  0x96   : > { %3433 = vmatmul.mubr.f32.gmra.mxu1 %v4226_v46  ;;  %3467 = vmatprep.subr.mxu0 %v2744_v4  ;;  %v4427_v46 = vld [vmem:[#allocation2 + $0x72] sm:$0xff] }
  0x97   : > { %3535 = vmatprep.subr.mxu1 %v2760_v40  ;;  %3468 = vmatpush3.msra.mxu0 %v2744_v4  ;;  %v2799_v4 = vld [vmem:[%s4990_s1 + $0x3f8] sm:$0xff] }
  0x98   : > { %3536 = vmatpush3.msra.mxu1 %v2760_v40  ;;  %3367 = vmatprep.mubr.f32.mxu0 %v4413_v7  ;;  %v2782_v40 = vld [vmem:[%s4990_s1 + $0x370] sm:$0xff] }
  0x99   : > { %3435 = vmatprep.mubr.f32.mxu1 %v4236_v50  ;;  %3368 = vmatmul.mubr.f32.gmra.mxu0 %v4415_v8  ;;  %v2741_v50 = vld [vmem:[%s4990_s1 + $0x228] sm:$0xff] }
  0x9a   : > { %3436 = vmatmul.mubr.f32.gmra.mxu1 %v4250_v54  ;;  %3469 = vmatprep.subr.mxu0 %v2743_v42  ;;  %v2757_v54 = vld [vmem:[%s4990_s1 + $0x2a8] sm:$0xff] }
  0x9b   : > { %3537 = vmatprep.subr.mxu1 %v2759_v23  ;;  %3470 = vmatpush3.msra.mxu0 %v2743_v42  ;;  %v2798_v42 = vld [vmem:[%s4990_s1 + $0x3f0] sm:$0xff] }
  0x9c   : > { %3538 = vmatpush3.msra.mxu1 %v2759_v23  ;;  %3370 = vmatprep.mubr.f32.mxu0 %v4427_v46  ;;  %v2788_v23 = vld [vmem:[%s4990_s1 + $0x3a0] sm:$0xff] }
  0x9d   : > { %3438 = vmatprep.mubr.f32.mxu1 %v4254_v56  ;;  %3471 = vmatprep.subr.mxu0 %v2742_v24  ;;  %v4449_v56 = vld [vmem:[#allocation2 + $0x8a] sm:$0xff] }
  0x9e   : > { %3539 = vmatprep.subr.mxu1 %v2758_v27  ;;  %3371 = vmatmul.mubr.f32.gmra.mxu0 %v4435_v28 }
  0x9f   : > { %3439 = vmatmul.mubr.f32.gmra.mxu1 %v4268_v60  ;;  %3472 = vmatpush3.msra.mxu0 %v2742_v24  ;;  %v2756_v60 = vld [vmem:[%s4990_s1 + $0x2a0] sm:$0xff]  ;;  %v2786_v24 = vld [vmem:[%s4990_s1 + $0x390] sm:$0xff] }
  0xa0   : > { %3540 = vmatpush3.msra.mxu1 %v2758_v27  ;;  %3473 = vmatprep.subr.mxu0 %v2741_v50  ;;  %v4639_v27 = vld [vmem:[#allocation2 + $0xc1] sm:$0xff] }
  0xa1   : > { %3541 = vmatprep.subr.mxu1 %v2757_v54  ;;  %3373 = vmatprep.mubr.f32.mxu0 %v4447_v31 }
  0xa2   : > { %3441 = vmatprep.mubr.f32.mxu1 %v4272_v62  ;;  %3474 = vmatpush3.msra.mxu0 %v2741_v50  ;;  %v2739_v62 = vld [vmem:[%s4990_s1 + $0x218] sm:$0xff]  ;;  %v2785_v50 = vld [vmem:[%s4990_s1 + $0x388] sm:$0xff] }
  0xa3   : > { %3542 = vmatpush3.msra.mxu1 %v2757_v54  ;;  %3374 = vmatmul.mubr.f32.gmra.mxu0 %v4449_v56  ;;  %v4653_v54 = vld [vmem:[#allocation2 + $0xc9] sm:$0xff] }
  0xa4   : > { %3442 = vmatmul.mubr.f32.gmra.mxu1 %v4286_v2  ;;  %3475 = vmatprep.subr.mxu0 %v2740_v32  ;;  %v4475_v2 = vld [vmem:[#allocation2 + $0xa2] sm:$0xff] }
  0xa5   : > { %3543 = vmatprep.subr.mxu1 %v2756_v60  ;;  %3476 = vmatpush3.msra.mxu0 %v2740_v32  ;;  %v4655_v32 = vld [vmem:[#allocation2 + $0xca] sm:$0xff] }
  0xa6   : > { %3544 = vmatpush3.msra.mxu1 %v2756_v60  ;;  %3376 = vmatprep.mubr.f32.mxu0 %v4461_v37  ;;  %v4659_v60 = vld [vmem:[#allocation2 + $0xd2] sm:$0xff] }
  0xa7   : > { %3444 = vmatprep.mubr.f32.mxu1 %v4296_v6  ;;  %3377 = vmatmul.mubr.f32.gmra.mxu0 %v4463_v38  ;;  %v4485_v6 = vld [vmem:[#allocation2 + $0xc0] sm:$0xff] }
  0xa8   : > { %3445 = vmatmul.mubr.f32.gmra.mxu1 %v4310_v12  ;;  %3477 = vmatprep.subr.mxu0 %v2739_v62  ;;  %v2737_v12 = vld [vmem:[%s4990_s1 + $0x208] sm:$0xff] }
  0xa9   : > { %3545 = vmatprep.subr.mxu1 %v2755_v43  ;;  %3478 = vmatpush3.msra.mxu0 %v2739_v62  ;;  %v2768_v62 = vld [vmem:[%s4990_s1 + $0x300] sm:$0xff] }
  0xaa   : > { %3546 = vmatpush3.msra.mxu1 %v2755_v43  ;;  %3379 = vmatprep.mubr.f32.mxu0 %v4475_v2  ;;  %v2784_v43 = vld [vmem:[%s4990_s1 + $0x380] sm:$0xff] }
  0xab   : > { %3447 = vmatprep.mubr.f32.mxu1 %v4314_v18  ;;  %3479 = vmatprep.subr.mxu0 %v2738_v10  ;;  %v4501_v18 = vld [vmem:[#allocation2 + $0xba] sm:$0xff] }
  0xac   : > { %3547 = vmatprep.subr.mxu1 %v2754_v14  ;;  %3380 = vmatmul.mubr.f32.gmra.mxu0 %v4483_v48 }
  0xad   : > { %3448 = vmatmul.mubr.f32.gmra.mxu1 %v4485_v6  ;;  %3480 = vmatpush3.msra.mxu0 %v2738_v10  ;;  %v1717_v10 = vld [vmem:[#allocation2 + $0x30] sm:$0xff] }
  0xae   : > { %3548 = vmatpush3.msra.mxu1 %v2754_v14  ;;  %3481 = vmatprep.subr.mxu0 %v2737_v12  ;;  %v1951_v14 = vld [vmem:[#allocation2 + $0x31] sm:$0xff] }
  0xaf   : > { %3549 = vmatprep.subr.mxu1 %v2753_v20  ;;  %3382 = vmatprep.mubr.f32.mxu0 %v4497_v22 }
  0xb0   : > { %3450 = vmatprep.mubr.f32.mxu1 %v4499_v57  ;;  %3482 = vmatpush3.msra.mxu0 %v2737_v12  ;;  %v1718_v12 = vld [vmem:[#allocation2 + $0x38] sm:$0xff] }
  0xb1   : > { %3550 = vmatpush3.msra.mxu1 %v2753_v20  ;;  %3383 = vmatmul.mubr.f32.gmra.mxu0 %v4501_v18  ;;  %v1952_v20 = vld [vmem:[#allocation2 + $0x39] sm:$0xff] }
  0xb2   : > { %3451 = vmatmul.mubr.f32.gmra.mxu1 %v4503_v58  ;;  %3483 = vmatprep.subr.mxu0 %v2736_v63 }
  0xb3   : > { %3551 = vmatprep.subr.mxu1 %v2752_v30  ;;  %3484 = vmatpush3.msra.mxu0 %v2736_v63  ;;  %v2815_v63 = vld [vmem:[%s4990_s1 + $0x478] sm:$0xff] }
  0xb4   : > { %3552 = vmatpush3.msra.mxu1 %v2752_v30  ;;  %3485 = vmatprep.mubr.f32.mxu0 %v4116_v9  ;;  %v2781_v9 = vld [vmem:[%s4990_s1 + $0x368] sm:$0xff]  ;;  %v1719_v30 = vld [vmem:[#allocation2 + $0x40] sm:$0xff] }
  0xb5   : > { %3553 = vmatprep.mubr.f32.mxu1 %v4340_v44  ;;  %3486 = vmatmul.mubr.f32.vlgmr.msra.gmra.mxu0 %v4128_v13  ;;  %v2797_v13 = vld [vmem:[%s4990_s1 + $0x3e8] sm:$0xff]  ;;  %v2796_v44 = vld [vmem:[%s4990_s1 + $0x3e0] sm:$0xff] }
  0xb6   : > { %3554 = vmatmul.mubr.f32.vlgmr.msra.gmra.mxu1 %v4351_v47  ;;  %3589 = vmatprep.subr.mxu0 %v2783_v34  ;;  %v2794_v47 = vld [vmem:[%s4990_s1 + $0x3d0] sm:$0xff] }
  0xb7   : > { %3657 = vmatprep.subr.mxu1 %v2799_v4  ;;  %3590 = vmatpush3.msra.mxu0 %v2783_v34  ;;  %v1953_v34 = vld [vmem:[#allocation2 + $0x41] sm:$0xff] }
  0xb8   : > { %3658 = vmatpush3.msra.mxu1 %v2799_v4  ;;  %3488 = vmatprep.mubr.f32.mxu0 %v4132_v15  ;;  %v2780_v15 = vld [vmem:[%s4990_s1 + $0x360] sm:$0xff]  ;;  %v2814_v4 = vld [vmem:[%s4990_s1 + $0x470] sm:$0xff] }
  0xb9   : > { %3556 = vmatprep.mubr.f32.mxu1 %v4353_v16  ;;  %3591 = vmatprep.subr.mxu0 %v2782_v40  ;;  %v2792_v16 = vld [vmem:[%s4990_s1 + $0x3c0] sm:$0xff] }
  0xba   : > { %3659 = vmatprep.subr.mxu1 %v2798_v42  ;;  %3489 = vmatmul.mubr.f32.gmra.mxu0 %v4146_v19  ;;  %v2779_v19 = vld [vmem:[%s4990_s1 + $0x358] sm:$0xff] }
  0xbb   : > { %3557 = vmatmul.mubr.f32.gmra.mxu1 %v4365_v51  ;;  %3592 = vmatpush3.msra.mxu0 %v2782_v40  ;;  %v1720_v40 = vld [vmem:[#allocation2 + $0x48] sm:$0xff] }
  0xbc   : > { %3660 = vmatpush3.msra.mxu1 %v2798_v42  ;;  %3593 = vmatprep.subr.mxu0 %v2781_v9  ;;  %v1954_v42 = vld [vmem:[#allocation2 + $0x49] sm:$0xff] }
  0xbd   : > { %3661 = vmatprep.subr.mxu1 %v2797_v13  ;;  %3491 = vmatprep.mubr.f32.mxu0 %v4150_v21  ;;  %v2795_v21 = vld [vmem:[%s4990_s1 + $0x3d8] sm:$0xff] }
  0xbe   : > { %3559 = vmatprep.mubr.f32.mxu1 %v4367_v52  ;;  %3594 = vmatpush3.msra.mxu0 %v2781_v9  ;;  %v2790_v52 = vld [vmem:[%s4990_s1 + $0x3b0] sm:$0xff]  ;;  %v2813_v9 = vld [vmem:[%s4990_s1 + $0x468] sm:$0xff] }
  0xbf   : > { %3662 = vmatpush3.msra.mxu1 %v2797_v13  ;;  %3492 = vmatmul.mubr.f32.gmra.mxu0 %v4164_v25  ;;  %v2778_v25 = vld [vmem:[%s4990_s1 + $0x350] sm:$0xff] }
  0xc0   : > { %3560 = vmatmul.mubr.f32.gmra.mxu1 %v4379_v26  ;;  %3595 = vmatprep.subr.mxu0 %v2780_v15  ;;  %v1721_v13 = vld [vmem:[#allocation2 + $0x50] sm:$0xff] }
  0xc1   : > { %3663 = vmatprep.subr.mxu1 %v2796_v44  ;;  %3596 = vmatpush3.msra.mxu0 %v2780_v15  ;;  %v1955_v15 = vld [vmem:[#allocation2 + $0x51] sm:$0xff] }
  0xc2   : > { %3664 = vmatpush3.msra.mxu1 %v2796_v44  ;;  %3494 = vmatprep.mubr.f32.mxu0 %v4174_v29  ;;  %v2777_v29 = vld [vmem:[%s4990_s1 + $0x348] sm:$0xff]  ;;  %v1722_v44 = vld [vmem:[#allocation2 + $0x58] sm:$0xff] }
  0xc3   : > { %3562 = vmatprep.mubr.f32.mxu1 %v4387_v0  ;;  %3495 = vmatmul.mubr.f32.gmra.mxu0 %v4188_v33  ;;  %v2793_v33 = vld [vmem:[%s4990_s1 + $0x3c8] sm:$0xff] }
  0xc4   : > { %3563 = vmatmul.mubr.f32.gmra.mxu1 %v4399_v3  ;;  %3597 = vmatprep.subr.mxu0 %v2779_v19 }
  0xc5   : > { %3665 = vmatprep.subr.mxu1 %v2795_v21  ;;  %3598 = vmatpush3.msra.mxu0 %v2779_v19  ;;  %v1956_v19 = vld [vmem:[#allocation2 + $0x59] sm:$0xff] }
  0xc6   : > { %3666 = vmatpush3.msra.mxu1 %v2795_v21  ;;  %3497 = vmatprep.mubr.f32.mxu0 %v4192_v35  ;;  %v2776_v35 = vld [vmem:[%s4990_s1 + $0x340] sm:$0xff] }
  0xc7   : > { %3565 = vmatprep.mubr.f32.mxu1 %v4401_v36  ;;  %3599 = vmatprep.subr.mxu0 %v2778_v25  ;;  %v2812_v21 = vld [vmem:[%s4990_s1 + $0x460] sm:$0xff] }
  0xc8   : > { %3667 = vmatprep.subr.mxu1 %v2794_v47  ;;  %3498 = vmatmul.mubr.f32.gmra.mxu0 %v4206_v39  ;;  %v2775_v39 = vld [vmem:[%s4990_s1 + $0x338] sm:$0xff] }
  0xc9   : > { %3566 = vmatmul.mubr.f32.gmra.mxu1 %v4413_v7  ;;  %3600 = vmatpush3.msra.mxu0 %v2778_v25  ;;  %v1723_v25 = vld [vmem:[#allocation2 + $0x60] sm:$0xff] }
  0xca   : > { %3668 = vmatpush3.msra.mxu1 %v2794_v47  ;;  %3601 = vmatprep.subr.mxu0 %v2777_v29  ;;  %v1957_v47 = vld [vmem:[#allocation2 + $0x61] sm:$0xff] }
  0xcb   : > { %3669 = vmatprep.subr.mxu1 %v2793_v33  ;;  %3500 = vmatprep.mubr.f32.mxu0 %v4210_v41  ;;  %v2791_v41 = vld [vmem:[%s4990_s1 + $0x3b8] sm:$0xff] }
  0xcc   : > { %3568 = vmatprep.mubr.f32.mxu1 %v4415_v8  ;;  %3602 = vmatpush3.msra.mxu0 %v2777_v29  ;;  %v1724_v29 = vld [vmem:[#allocation2 + $0x68] sm:$0xff] }
  0xcd   : > { %3670 = vmatpush3.msra.mxu1 %v2793_v33  ;;  %3501 = vmatmul.mubr.f32.gmra.mxu0 %v4224_v45  ;;  %v2774_v45 = vld [vmem:[%s4990_s1 + $0x330] sm:$0xff] }
  0xce   : > { %3569 = vmatmul.mubr.f32.gmra.mxu1 %v4427_v46  ;;  %3603 = vmatprep.subr.mxu0 %v2776_v35  ;;  %v1958_v33 = vld [vmem:[#allocation2 + $0x69] sm:$0xff] }
  0xcf   : > { %3671 = vmatprep.subr.mxu1 %v2792_v16  ;;  %3604 = vmatpush3.msra.mxu0 %v2776_v35  ;;  %v2811_v35 = vld [vmem:[%s4990_s1 + $0x458] sm:$0xff] }
  0xd0   : > { %3672 = vmatpush3.msra.mxu1 %v2792_v16  ;;  %3503 = vmatprep.mubr.f32.mxu0 %v4234_v49  ;;  %v2773_v49 = vld [vmem:[%s4990_s1 + $0x328] sm:$0xff]  ;;  %v1725_v16 = vld [vmem:[#allocation2 + $0x70] sm:$0xff] }
  0xd1   : > { %3571 = vmatprep.mubr.f32.mxu1 %v4435_v28  ;;  %3504 = vmatmul.mubr.f32.gmra.mxu0 %v4248_v53  ;;  %v2789_v53 = vld [vmem:[%s4990_s1 + $0x3a8] sm:$0xff] }
  0xd2   : > { %3572 = vmatmul.mubr.f32.gmra.mxu1 %v4447_v31  ;;  %3605 = vmatprep.subr.mxu0 %v2775_v39 }
  0xd3   : > { %3673 = vmatprep.subr.mxu1 %v2791_v41  ;;  %3606 = vmatpush3.msra.mxu0 %v2775_v39  ;;  %v1959_v39 = vld [vmem:[#allocation2 + $0x71] sm:$0xff] }
  0xd4   : > { %3674 = vmatpush3.msra.mxu1 %v2791_v41  ;;  %3506 = vmatprep.mubr.f32.mxu0 %v4252_v55  ;;  %v2772_v55 = vld [vmem:[%s4990_s1 + $0x320] sm:$0xff]  ;;  %v2810_v41 = vld [vmem:[%s4990_s1 + $0x450] sm:$0xff] }
  0xd5   : > { %3574 = vmatprep.mubr.f32.mxu1 %v4449_v56  ;;  %3607 = vmatprep.subr.mxu0 %v2774_v45 }
  0xd6   : > { %3675 = vmatprep.subr.mxu1 %v2790_v52  ;;  %3507 = vmatmul.mubr.f32.gmra.mxu0 %v4266_v59  ;;  %v2771_v59 = vld [vmem:[%s4990_s1 + $0x318] sm:$0xff] }
  0xd7   : > { %3575 = vmatmul.mubr.f32.gmra.mxu1 %v4461_v37  ;;  %3608 = vmatpush3.msra.mxu0 %v2774_v45  ;;  %v1726_v45 = vld [vmem:[#allocation2 + $0x78] sm:$0xff] }
  0xd8   : > { %3676 = vmatpush3.msra.mxu1 %v2790_v52  ;;  %3609 = vmatprep.subr.mxu0 %v2773_v49  ;;  %v1960_v52 = vld [vmem:[#allocation2 + $0x79] sm:$0xff] }
  0xd9   : > { %3677 = vmatprep.subr.mxu1 %v2789_v53  ;;  %3509 = vmatprep.mubr.f32.mxu0 %v4270_v61  ;;  %v2787_v61 = vld [vmem:[%s4990_s1 + $0x398] sm:$0xff] }
  0xda   : > { %3577 = vmatprep.mubr.f32.mxu1 %v4463_v38  ;;  %3610 = vmatpush3.msra.mxu0 %v2773_v49  ;;  %v2809_v49 = vld [vmem:[%s4990_s1 + $0x448] sm:$0xff] }
  0xdb   : > { %3678 = vmatpush3.msra.mxu1 %v2789_v53  ;;  %3510 = vmatmul.mubr.f32.gmra.mxu0 %v4284_v1  ;;  %v2770_v1 = vld [vmem:[%s4990_s1 + $0x310] sm:$0xff]  ;;  %v1727_v53 = vld [vmem:[#allocation2 + $0x80] sm:$0xff] }
  0xdc   : > { %3578 = vmatmul.mubr.f32.gmra.mxu1 %v4475_v2  ;;  %3611 = vmatprep.subr.mxu0 %v2772_v55 }
  0xdd   : > { %3679 = vmatprep.subr.mxu1 %v2788_v23  ;;  %3612 = vmatpush3.msra.mxu0 %v2772_v55  ;;  %v1961_v55 = vld [vmem:[#allocation2 + $0x81] sm:$0xff] }
  0xde   : > { %3680 = vmatpush3.msra.mxu1 %v2788_v23  ;;  %3512 = vmatprep.mubr.f32.mxu0 %v4294_v5  ;;  %v4641_v5 = vld [vmem:[#allocation2 + $0xc2] sm:$0xff] }
  0xdf   : > { %3580 = vmatprep.mubr.f32.mxu1 %v4483_v48  ;;  %3513 = vmatmul.mubr.f32.gmra.mxu0 %v4308_v11  ;;  %v2769_v11 = vld [vmem:[%s4990_s1 + $0x308] sm:$0xff] }
  0xe0   : > { %3581 = vmatmul.mubr.f32.gmra.mxu1 %v4497_v22  ;;  %3613 = vmatprep.subr.mxu0 %v2771_v59  ;;  %v1728_v23 = vld [vmem:[#allocation2 + $0x88] sm:$0xff] }
  0xe1   : > { %3681 = vmatprep.subr.mxu1 %v2787_v61  ;;  %3614 = vmatpush3.msra.mxu0 %v2771_v59  ;;  %v1962_v59 = vld [vmem:[#allocation2 + $0x89] sm:$0xff] }
  0xe2   : > { %3682 = vmatpush3.msra.mxu1 %v2787_v61  ;;  %3515 = vmatprep.mubr.f32.mxu0 %v4312_v17  ;;  %v4657_v17 = vld [vmem:[#allocation2 + $0xd1] sm:$0xff]  ;;  %v2808_v61 = vld [vmem:[%s4990_s1 + $0x440] sm:$0xff] }
  0xe3   : > { %3583 = vmatprep.mubr.f32.mxu1 %v4501_v18  ;;  %3615 = vmatprep.subr.mxu0 %v2770_v1 }
  0xe4   : > { %3683 = vmatprep.subr.mxu1 %v2786_v24  ;;  %3516 = vmatmul.mubr.f32.gmra.mxu0 %v4639_v27 }
  0xe5   : > { %3584 = vmatmul.mubr.f32.gmra.mxu1 %v4641_v5  ;;  %3616 = vmatpush3.msra.mxu0 %v2770_v1  ;;  %v1729_v1 = vld [vmem:[#allocation2 + $0x90] sm:$0xff] }
  0xe6   : > { %3684 = vmatpush3.msra.mxu1 %v2786_v24  ;;  %3617 = vmatprep.subr.mxu0 %v2769_v11  ;;  %v1963_v24 = vld [vmem:[#allocation2 + $0x91] sm:$0xff] }
  0xe7   : > { %3685 = vmatprep.subr.mxu1 %v2785_v50  ;;  %3518 = vmatprep.mubr.f32.mxu0 %v4653_v54 }
  0xe8   : > { %3586 = vmatprep.mubr.f32.mxu1 %v4655_v32  ;;  %3618 = vmatpush3.msra.mxu0 %v2769_v11 }
  0xe9   : > { %3686 = vmatpush3.msra.mxu1 %v2785_v50  ;;  %3519 = vmatmul.mubr.f32.gmra.mxu0 %v4657_v17 }
  0xea   : > { %3587 = vmatmul.mubr.f32.gmra.mxu1 %v4659_v60  ;;  %3619 = vmatprep.subr.mxu0 %v2768_v62 }
  0xeb   : > { %3687 = vmatprep.subr.mxu1 %v2784_v43  ;;  %3620 = vmatpush3.msra.mxu0 %v2768_v62  ;;  %v1730_v62 = vld [vmem:[#allocation2 + $0x98] sm:$0xff] }
  0xec   : > { %3688 = vmatpush3.msra.mxu1 %v2784_v43  ;;  %3621 = vmatprep.mubr.f32.mxu0 %v1717_v10  ;;  %v1964_v43 = vld [vmem:[#allocation2 + $0x99] sm:$0xff] }
  0xed   : > { %3689 = vmatprep.mubr.f32.mxu1 %v1951_v14  ;;  %3622 = vmatmul.mubr.f32.vlgmr.msra.gmra.mxu0 %v1718_v12  ;;  %v2807_v14 = vld [vmem:[%s4990_s1 + $0x438] sm:$0xff] }
  0xee   : > { %3690 = vmatmul.mubr.f32.vlgmr.msra.gmra.mxu1 %v1952_v20  ;;  %3725 = vmatprep.subr.mxu0 %v2815_v63 }
  0xef   : > { %3793 = vmatprep.subr.mxu1 %v2815_v63  ;;  %3726 = vmatpush3.msra.mxu0 %v2815_v63 }
  0xf0   : > { %3809 = vmatpush3.msra.mxu1 %v2815_v63  ;;  %3624 = vmatprep.mubr.f32.mxu0 %v1719_v30  ;;  %v1731_v30 = vld [vmem:[#allocation2 + $0xa0] sm:$0xff] }
  0xf1   : > { %3692 = vmatprep.mubr.f32.mxu1 %v1953_v34  ;;  %3727 = vmatprep.subr.mxu0 %v2814_v4  ;;  %v1965_v34 = vld [vmem:[#allocation2 + $0xa1] sm:$0xff] }
  0xf2   : > { %3794 = vmatprep.subr.mxu1 %v2814_v4  ;;  %3625 = vmatmul.mubr.f32.gmra.mxu0 %v1720_v40 }
  0xf3   : > { %3693 = vmatmul.mubr.f32.gmra.mxu1 %v1954_v42  ;;  %3728 = vmatpush3.msra.mxu0 %v2814_v4 }
  0xf4   : > { %3810 = vmatpush3.msra.mxu1 %v2814_v4  ;;  %3729 = vmatprep.subr.mxu0 %v2813_v9  ;;  %v2806_v4 = vld [vmem:[%s4990_s1 + $0x430] sm:$0xff] }
  0xf5   : > { %3795 = vmatprep.subr.mxu1 %v2813_v9  ;;  %3627 = vmatprep.mubr.f32.mxu0 %v1721_v13  ;;  %v1966_v13 = vld [vmem:[#allocation2 + $0xa9] sm:$0xff] }
  0xf6   : > { %3695 = vmatprep.mubr.f32.mxu1 %v1955_v15  ;;  %3730 = vmatpush3.msra.mxu0 %v2813_v9 }
  0xf7   : > { %3811 = vmatpush3.msra.mxu1 %v2813_v9  ;;  %3628 = vmatmul.mubr.f32.gmra.mxu0 %v1722_v44  ;;  %v1732_v9 = vld [vmem:[#allocation2 + $0xa8] sm:$0xff] }
  0xf8   : > { %3696 = vmatmul.mubr.f32.gmra.mxu1 %v1956_v19  ;;  %3731 = vmatprep.subr.mxu0 %v2812_v21 }
  0xf9   : > { %3796 = vmatprep.subr.mxu1 %v2812_v21  ;;  %3732 = vmatpush3.msra.mxu0 %v2812_v21 }
  0xfa   : > { %3812 = vmatpush3.msra.mxu1 %v2812_v21  ;;  %3630 = vmatprep.mubr.f32.mxu0 %v1723_v25  ;;  %v2805_v21 = vld [vmem:[%s4990_s1 + $0x428] sm:$0xff]  ;;  %v1733_v25 = vld [vmem:[#allocation2 + $0xb0] sm:$0xff] }
  0xfb   : > { %3698 = vmatprep.mubr.f32.mxu1 %v1957_v47  ;;  %3631 = vmatmul.mubr.f32.gmra.mxu0 %v1724_v29  ;;  %v1967_v47 = vld [vmem:[#allocation2 + $0xb1] sm:$0xff] }
  0xfc   : > { %3699 = vmatmul.mubr.f32.gmra.mxu1 %v1958_v33  ;;  %3733 = vmatprep.subr.mxu0 %v2811_v35 }
  0xfd   : > { %3797 = vmatprep.subr.mxu1 %v2811_v35  ;;  %3734 = vmatpush3.msra.mxu0 %v2811_v35 }
  0xfe   : > { %3813 = vmatpush3.msra.mxu1 %v2811_v35  ;;  %3633 = vmatprep.mubr.f32.mxu0 %v1725_v16  ;;  %v1734_v35 = vld [vmem:[#allocation2 + $0xb8] sm:$0xff] }
  0xff   : > { %3701 = vmatprep.mubr.f32.mxu1 %v1959_v39  ;;  %3735 = vmatprep.subr.mxu0 %v2810_v41  ;;  %v1968_v16 = vld [vmem:[#allocation2 + $0xb9] sm:$0xff] }
 0x100   : > { %3798 = vmatprep.subr.mxu1 %v2810_v41  ;;  %3634 = vmatmul.mubr.f32.gmra.mxu0 %v1726_v45  ;;  %v2804_v39 = vld [vmem:[%s4990_s1 + $0x420] sm:$0xff] }
 0x101   : > { %3702 = vmatmul.mubr.f32.gmra.mxu1 %v1960_v52  ;;  %3736 = vmatpush3.msra.mxu0 %v2810_v41 }
 0x102   : > { %3814 = vmatpush3.msra.mxu1 %v2810_v41  ;;  %3737 = vmatprep.subr.mxu0 %v2809_v49 }
 0x103   : > { %3799 = vmatprep.subr.mxu1 %v2809_v49  ;;  %3636 = vmatprep.mubr.f32.mxu0 %v1727_v53 }
 0x104   : > { %3704 = vmatprep.mubr.f32.mxu1 %v1961_v55  ;;  %3738 = vmatpush3.msra.mxu0 %v2809_v49 }
 0x105   : > { %3815 = vmatpush3.msra.mxu1 %v2809_v49  ;;  %3637 = vmatmul.mubr.f32.gmra.mxu0 %v1728_v23  ;;  %v3215_v11 = vpop.f32.mrf.mxu0  ;;  %v2803_v23 = vld [vmem:[%s4990_s1 + $0x418] sm:$0xff] }
 0x106   : > { %3705 = vmatmul.mubr.f32.gmra.mxu1 %v1962_v59  ;;  %v3283_v50 = vpop.f32.mrf.mxu1  ;;  %3739 = vmatprep.subr.mxu0 %v2808_v61 }
 0x107   : > { %3800 = vmatprep.subr.mxu1 %v2808_v61  ;;  %v4695_v10 = vadd.f32 %v3283_v50, %v3215_v11  ;;  %3740 = vmatpush3.msra.mxu0 %v2808_v61  ;;  %v493_v12 = vpop.f32.mrf.mxu0 }
 0x108   : > { %3816 = vmatpush3.msra.mxu1 %v2808_v61  ;;  %v670_v20 = vpop.f32.mrf.mxu1  ;;  %3639 = vmatprep.mubr.f32.mxu0 %v1729_v1 }
 0x109   : > { %3707 = vmatprep.mubr.f32.mxu1 %v1963_v24  ;;  %v4700_v63 = vadd.f32 %v670_v20, %v493_v12  ;;  %3640 = vmatmul.mubr.f32.gmra.mxu0 %v1730_v62  ;;  %v2802_v24 = vld [vmem:[%s4990_s1 + $0x410] sm:$0xff]  ;;  %v1738_v62 = vld [vmem:[#allocation2 + $0xd8] sm:$0xff]  ;;  %v1973_v12 = vld [vmem:[#allocation2 + $0xe1] sm:$0xff] }
 0x10a   : > { %3708 = vmatmul.mubr.f32.gmra.mxu1 %v1964_v43  ;;  %3741 = vmatprep.subr.mxu0 %v2807_v14  ;;  %v3218_v40 = vpop.f32.mrf.mxu0 }
 0x10b   : > { %3801 = vmatprep.subr.mxu1 %v2807_v14  ;;  %v3286_v42 = vpop.f32.mrf.mxu1  ;;  %3742 = vmatpush3.msra.mxu0 %v2807_v14 }
 0x10c   : > { %3817 = vmatpush3.msra.mxu1 %v2807_v14  ;;  %v4705_v15 = vadd.f32 %v3286_v42, %v3218_v40  ;;  %3642 = vmatprep.mubr.f32.mxu0 %v1731_v30  ;;  %v503_v44 = vpop.f32.mrf.mxu0  ;;  %v1739_v14 = vld [vmem:[#allocation2 + $0xe0] sm:$0xff] }
 0x10d   : > { %3710 = vmatprep.mubr.f32.mxu1 %v1965_v34  ;;  %v680_v19 = vpop.f32.mrf.mxu1  ;;  %3743 = vmatprep.subr.mxu0 %v2806_v4  ;;  %v2800_v34 = vld [vmem:[%s4990_s1 + $0x400] sm:$0xff] }
 0x10e   : > { %3802 = vmatprep.subr.mxu1 %v2806_v4  ;;  %3643 = vmatmul.mubr.f32.gmra.mxu0 %v1732_v9  ;;  %v2186_v44 = vld [vmem:[#allocation2 + $0x3a] sm:$0xff] }
 0x10f   : > { %3711 = vmatmul.mubr.f32.gmra.mxu1 %v1966_v13  ;;  %3744 = vmatpush3.msra.mxu0 %v2806_v4  ;;  %v3221_v29 = vpop.f32.mrf.mxu0 }
 0x110   : > { %3818 = vmatpush3.msra.mxu1 %v2806_v4  ;;  %v3289_v33 = vpop.f32.mrf.mxu1  ;;  %3745 = vmatprep.subr.mxu0 %v2805_v21 }
 0x111   : > { %3803 = vmatprep.subr.mxu1 %v2805_v21  ;;  %3645 = vmatprep.mubr.f32.mxu0 %v1733_v25  ;;  %v512_v41 = vpop.f32.mrf.mxu0 }
 0x112   : > { %3713 = vmatprep.mubr.f32.mxu1 %v1967_v47  ;;  %v689_v45 = vpop.f32.mrf.mxu1  ;;  %3746 = vmatpush3.msra.mxu0 %v2805_v21 }
 0x113   : > { %3819 = vmatpush3.msra.mxu1 %v2805_v21  ;;  %v4713_v52 = vadd.f32 %v689_v45, %v512_v41  ;;  %3646 = vmatmul.mubr.f32.gmra.mxu0 %v1734_v35  ;;  %v3224_v49 = vpop.f32.mrf.mxu0 }
 0x114   : > { %3714 = vmatmul.mubr.f32.gmra.mxu1 %v1968_v16  ;;  %v3292_v53 = vpop.f32.mrf.mxu1  ;;  %3747 = vmatprep.subr.mxu0 %v2804_v39 }
 0x115   : > { %3804 = vmatprep.subr.mxu1 %v2804_v39  ;;  %v4715_v55 = vadd.f32 %v3292_v53, %v3224_v49  ;;  %3748 = vmatpush3.msra.mxu0 %v2804_v39  ;;  %v521_v59 = vpop.f32.mrf.mxu0 }
 0x116   : > { %3820 = vmatpush3.msra.mxu1 %v2804_v39  ;;  %v698_v61 = vpop.f32.mrf.mxu1  ;;  %3648 = vmatprep.mubr.f32.mxu0 %v4485_v6  ;;  %v1972_v6 = vld [vmem:[#allocation2 + $0xd9] sm:$0xff] }
 0x117   : > { %3716 = vmatprep.mubr.f32.mxu1 %v4639_v27  ;;  %v4722_v1 = vadd.f32 %v698_v61, %v521_v59  ;;  %3649 = vmatmul.mubr.f32.gmra.mxu0 %v4499_v57 }
 0x118   : > { %3717 = vmatmul.mubr.f32.gmra.mxu1 %v4653_v54  ;;  %3749 = vmatprep.subr.mxu0 %v2803_v23  ;;  %v3227_v11 = vpop.f32.mrf.mxu0  ;;  %v2801_v54 = vld [vmem:[%s4990_s1 + $0x408] sm:$0xff] }
 0x119   : > { %3805 = vmatprep.subr.mxu1 %v2803_v23  ;;  %v3295_v50 = vpop.f32.mrf.mxu1  ;;  %3750 = vmatpush3.msra.mxu0 %v2803_v23 }
 0x11a   : > { %3821 = vmatpush3.msra.mxu1 %v2803_v23  ;;  %v4729_v43 = vadd.f32 %v3295_v50, %v3227_v11  ;;  %3651 = vmatprep.mubr.f32.mxu0 %v4503_v58  ;;  %v531_v57 = vpop.f32.mrf.mxu0  ;;  %v1740_v58 = vld [vmem:[#allocation2 + $0xe8] sm:$0xff] }
 0x11b   : > { %3719 = vmatprep.mubr.f32.mxu1 %v4657_v17  ;;  %v708_v27 = vpop.f32.mrf.mxu1  ;;  %3751 = vmatprep.subr.mxu0 %v2802_v24  ;;  %v1974_v17 = vld [vmem:[#allocation2 + $0xe9] sm:$0xff] }
 0x11c   : > { %3806 = vmatprep.subr.mxu1 %v2802_v24  ;;  %3652 = vmatmul.mubr.f32.gmra.mxu0 %v1738_v62 }
 0x11d   : > { %3720 = vmatmul.mubr.f32.gmra.mxu1 %v1972_v6  ;;  %3752 = vmatpush3.msra.mxu0 %v2802_v24  ;;  %v3230_v20 = vpop.f32.mrf.mxu0 }
 0x11e   : > { %3822 = vmatpush3.msra.mxu1 %v2802_v24  ;;  %v3298_v30 = vpop.f32.mrf.mxu1  ;;  %3753 = vmatprep.subr.mxu0 %v2801_v54 }
 0x11f   : > { %3807 = vmatprep.subr.mxu1 %v2801_v54  ;;  %3654 = vmatprep.mubr.f32.mxu0 %v1739_v14  ;;  %v540_v4 = vpop.f32.mrf.mxu0 }
 0x120   : > { %3722 = vmatprep.mubr.f32.mxu1 %v1973_v12  ;;  %v717_v40 = vpop.f32.mrf.mxu1  ;;  %3754 = vmatpush3.msra.mxu0 %v2801_v54 }
 0x121   : > { %3823 = vmatpush3.msra.mxu1 %v2801_v54  ;;  %v4739_v42 = vadd.f32 %v717_v40, %v540_v4  ;;  %3655 = vmatmul.mubr.f32.gmra.mxu0 %v1740_v58  ;;  %v3233_v9 = vpop.f32.mrf.mxu0 }
 0x122   : > { %3723 = vmatmul.mubr.f32.gmra.mxu1 %v1974_v17  ;;  %v3301_v13 = vpop.f32.mrf.mxu1  ;;  %3755 = vmatprep.subr.mxu0 %v2800_v34 }
 0x123   : > { %3808 = vmatprep.subr.mxu1 %v2800_v34  ;;  %v4741_v19 = vadd.f32 %v3301_v13, %v3233_v9  ;;  %3756 = vmatpush3.msra.mxu0 %v2800_v34  ;;  %v549_v21 = vpop.f32.mrf.mxu0 }
 0x124   : > { %3824 = vmatpush3.msra.mxu1 %v2800_v34  ;;  %v726_v25 = vpop.f32.mrf.mxu1  ;;  %3757 = vmatprep.mubr.f32.mxu0 %v4365_v51 }
 0x125   : > { %3775 = vmatprep.mubr.f32.mxu1 %v4461_v37  ;;  %v4745_v47 = vadd.f32 %v726_v25, %v549_v21  ;;  %3758 = vmatmul.mubr.f32.vlgmr.msra.gmra.mxu0 %v2186_v44 }
 0x126   : > { %3776 = vmatmul.mubr.f32.vlgmr.msra.gmra.mxu1 %v4463_v38  ;;  %3760 = vmatprep.mubr.f32.mxu0 %v4379_v26  ;;  %v3236_v29 = vpop.f32.mrf.mxu0 }
 0x127   : > { %3778 = vmatprep.mubr.f32.mxu1 %v4475_v2  ;;  %v3304_v33 = vpop.f32.mrf.mxu1 }
 0x128   : > { %v4750_v35 = vadd.f32 %v3304_v33, %v3236_v29  ;;  %v559_v16 = vpop.f32.mrf.mxu0 }
 0x129   : > { %v736_v39 = vpop.f32.mrf.mxu1  ;;  %3761 = vmatmul.mubr.f32.gmra.mxu0 %v4387_v0 }
 0x12a   : > { %3779 = vmatmul.mubr.f32.gmra.mxu1 %v4483_v48  ;;  %3763 = vmatprep.mubr.f32.mxu0 %v4399_v3 }
 0x12b   : > { %3781 = vmatprep.mubr.f32.mxu1 %v4497_v22  ;;  %v3239_v51 = vpop.f32.mrf.mxu0  ;;  %v2206_v22 = vld [vmem:[#allocation2 + $0xda] sm:$0xff] }
 0x12c   : > { %v3307_v37 = vpop.f32.mrf.mxu1 }
 0x12d   : > { %3764 = vmatmul.mubr.f32.gmra.mxu0 %v4401_v36  ;;  %v568_v26 = vpop.f32.mrf.mxu0 }
 0x12e   : > { %3782 = vmatmul.mubr.f32.gmra.mxu1 %v4501_v18  ;;  %v745_v38 = vpop.f32.mrf.mxu1  ;;  %3766 = vmatprep.mubr.f32.mxu0 %v4413_v7  ;;  %v2207_v18 = vld [vmem:[#allocation2 + $0xe2] sm:$0xff] }
 0x12f   : > { %3784 = vmatprep.mubr.f32.mxu1 %v4641_v5  ;;  %v4760_v2 = vadd.f32 %v745_v38, %v568_v26  ;;  %v3242_v0 = vpop.f32.mrf.mxu0 }
 0x130   : > { %v3310_v48 = vpop.f32.mrf.mxu1 }
 0x131   : > { %v4762_v41 = vadd.f32 %v3310_v48, %v3242_v0  ;;  %3767 = vmatmul.mubr.f32.gmra.mxu0 %v4415_v8  ;;  %v577_v3 = vpop.f32.mrf.mxu0  ;;  %v2208_v8 = vld [vmem:[#allocation2 + $0xea] sm:$0xff] }
 0x132   : > { %3785 = vmatmul.mubr.f32.gmra.mxu1 %v4655_v32  ;;  %v754_v36 = vpop.f32.mrf.mxu1  ;;  %3769 = vmatprep.mubr.f32.mxu0 %v4427_v46 }
 0x133   : > { %3787 = vmatprep.mubr.f32.mxu1 %v4659_v60  ;;  %v4768_v7 = vadd.f32 %v754_v36, %v577_v3 }
 0x134   : > { %v3245_v5 = vpop.f32.mrf.mxu0 }
 0x135   : > { %v3313_v45 = vpop.f32.mrf.mxu1  ;;  %3770 = vmatmul.mubr.f32.gmra.mxu0 %v4435_v28 }
 0x136   : > { %3788 = vmatmul.mubr.f32.gmra.mxu1 %v2206_v22  ;;  %v4771_v49 = vadd.f32 %v3313_v45, %v3245_v5  ;;  %3772 = vmatprep.mubr.f32.mxu0 %v4447_v31  ;;  %v587_v32 = vpop.f32.mrf.mxu0 }
 0x137   : > { %3790 = vmatprep.mubr.f32.mxu1 %v2207_v18  ;;  %v764_v53 = vpop.f32.mrf.mxu1 }
 0x139   : > { %3773 = vmatmul.mubr.f32.gmra.mxu0 %v4449_v56  ;;  %v3248_v46 = vpop.f32.mrf.mxu0 }
 0x13a   : > { %3791 = vmatmul.mubr.f32.gmra.mxu1 %v2208_v8  ;;  %v3316_v60 = vpop.f32.mrf.mxu1 }
 0x13b   : > { %v596_v23 = vpop.f32.mrf.mxu0 }
 0x13c   : > { %v773_v59 = vpop.f32.mrf.mxu1 }
 0x13d   : > { %v4775_v61 = vadd.f32 %v773_v59, %v596_v23  ;;  %v3351_v24 = vpop.f32.mrf.mxu0 }
 0x13e   : > { %v3419_v28 = vpop.f32.mrf.mxu1  ;;  %v1000_v11 = vadd.f32 %v3351_v24, %v4695_v10 }
 0x13f   : > { %v888_v50 = vpop.f32.mrf.mxu0 }
 0x140   : > { %v1122_v62 = vpop.f32.mrf.mxu1  ;;  %v4778_v31 = vadd.f32 %v3419_v28, %v1000_v11  ;;  %v999_v6 = vadd.f32 %v888_v50, %v4700_v63 }
 0x142   : > { %v4781_v57 = vadd.f32 %v1122_v62, %v999_v6  ;;  %v3354_v56 = vpop.f32.mrf.mxu0 }
 0x143   : > { %v3422_v27 = vpop.f32.mrf.mxu1  ;;  %v1001_v54 = vadd.f32 %v3354_v56, %v4705_v15 }
 0x144   : > { %v898_v14 = vpop.f32.mrf.mxu0 }
 0x145   : > { %v1132_v12 = vpop.f32.mrf.mxu1  ;;  %v4784_v20 = vadd.f32 %v3422_v27, %v1001_v54 }
 0x147   : > { %v3357_v30 = vpop.f32.mrf.mxu0 }
 0x148   : > { %v3425_v58 = vpop.f32.mrf.mxu1 }
 0x149   : > { %v907_v17 = vpop.f32.mrf.mxu0 }
 0x14a   : > { %v1141_v10 = vpop.f32.mrf.mxu1  ;;  %v1002_v34 = vadd.f32 %v907_v17, %v4713_v52 }
 0x14b   : > { %v3360_v4 = vpop.f32.mrf.mxu0 }
 0x14c   : > { %v3428_v40 = vpop.f32.mrf.mxu1  ;;  %v4787_v9 = vadd.f32 %v1141_v10, %v1002_v34  ;;  %v1004_v63 = vadd.f32 %v3360_v4, %v4715_v55 }
 0x14d   : > { %v916_v13 = vpop.f32.mrf.mxu0 }
 0x14e   : > { %v1150_v44 = vpop.f32.mrf.mxu1  ;;  %v4790_v21 = vadd.f32 %v3428_v40, %v1004_v63  ;;  %v1003_v15 = vadd.f32 %v916_v13, %v4722_v1 }
 0x150   : > { %v4793_v25 = vadd.f32 %v1150_v44, %v1003_v15  ;;  %v3363_v29 = vpop.f32.mrf.mxu0 }
 0x151   : > { %v3431_v33 = vpop.f32.mrf.mxu1  ;;  %v1005_v16 = vadd.f32 %v3363_v29, %v4729_v43 }
 0x152   : > { %v926_v39 = vpop.f32.mrf.mxu0 }
 0x153   : > { %v1160_v52 = vpop.f32.mrf.mxu1  ;;  %v4796_v51 = vadd.f32 %v3431_v33, %v1005_v16 }
 0x155   : > { %v3366_v37 = vpop.f32.mrf.mxu0 }
 0x156   : > { %v3434_v26 = vpop.f32.mrf.mxu1 }
 0x157   : > { %v935_v38 = vpop.f32.mrf.mxu0 }
 0x158   : > { %v1169_v55 = vpop.f32.mrf.mxu1  ;;  %v1006_v0 = vadd.f32 %v935_v38, %v4739_v42 }
 0x159   : > { %v3369_v48 = vpop.f32.mrf.mxu0 }
 0x15a   : > { %v3437_v3 = vpop.f32.mrf.mxu1  ;;  %v4799_v36 = vadd.f32 %v1169_v55, %v1006_v0  ;;  %v1008_v1 = vadd.f32 %v3369_v48, %v4741_v19 }
 0x15b   : > { %v944_v22 = vpop.f32.mrf.mxu0 }
 0x15c   : > { %v1178_v18 = vpop.f32.mrf.mxu1  ;;  %v4802_v5 = vadd.f32 %v3437_v3, %v1008_v1  ;;  %v1007_v43 = vadd.f32 %v944_v22, %v4745_v47 }
 0x15e   : > { %v4805_v45 = vadd.f32 %v1178_v18, %v1007_v43  ;;  %v3372_v8 = vpop.f32.mrf.mxu0 }
 0x15f   : > { %v3440_v32 = vpop.f32.mrf.mxu1  ;;  %v1009_v53 = vadd.f32 %v3372_v8, %v4750_v35 }
 0x160   : > { %v954_v46 = vpop.f32.mrf.mxu0 }
 0x161   : > { %v1188_v42 = vpop.f32.mrf.mxu1  ;;  %v4808_v60 = vadd.f32 %v3440_v32, %v1009_v53 }
 0x163   : > { %v3375_v23 = vpop.f32.mrf.mxu0 }
 0x164   : > { %v3443_v59 = vpop.f32.mrf.mxu1 }
 0x165   : > { %v963_v24 = vpop.f32.mrf.mxu0 }
 0x166   : > { %v1197_v19 = vpop.f32.mrf.mxu1  ;;  %v1010_v28 = vadd.f32 %v963_v24, %v4760_v2 }
 0x167   : > { %v3378_v11 = vpop.f32.mrf.mxu0 }
 0x168   : > { %v3446_v50 = vpop.f32.mrf.mxu1  ;;  %v4811_v62 = vadd.f32 %v1197_v19, %v1010_v28  ;;  %v1012_v47 = vadd.f32 %v3378_v11, %v4762_v41 }
 0x169   : > { %v972_v6 = vpop.f32.mrf.mxu0 }
 0x16a   : > { %v1206_v56 = vpop.f32.mrf.mxu1  ;;  %v4814_v27 = vadd.f32 %v3446_v50, %v1012_v47  ;;  %v1011_v35 = vadd.f32 %v972_v6, %v4768_v7 }
 0x16c   : > { %v4817_v54 = vadd.f32 %v1206_v56, %v1011_v35  ;;  %v3381_v14 = vpop.f32.mrf.mxu0 }
 0x16d   : > { %v3449_v12 = vpop.f32.mrf.mxu1  ;;  %v1013_v30 = vadd.f32 %v3381_v14, %v4771_v49 }
 0x16e   : > { %v982_v58 = vpop.f32.mrf.mxu0 }
 0x16f   : > { %v1216_v2 = vpop.f32.mrf.mxu1  ;;  %v4820_v17 = vadd.f32 %v3449_v12, %v1013_v30 }
 0x171   : > { %v3384_v10 = vpop.f32.mrf.mxu0 }
 0x172   : > { %v3452_v34 = vpop.f32.mrf.mxu1 }
 0x173   : > { %v991_v4 = vpop.f32.mrf.mxu0 }
 0x174   : > { %v1225_v41 = vpop.f32.mrf.mxu1  ;;  %v1014_v40 = vadd.f32 %v991_v4, %v4775_v61 }
 0x175   : > { %v3487_v63 = vpop.f32.mrf.mxu0 }
 0x176   : > { %v3555_v13 = vpop.f32.mrf.mxu1  ;;  %v4823_v44 = vadd.f32 %v1225_v41, %v1014_v40  ;;  %v1468_v7 = vadd.f32 %v3487_v63, %v4778_v31 }
 0x177   : > { %v1356_v15 = vpop.f32.mrf.mxu0 }
 0x178   : > { %v1590_v29 = vpop.f32.mrf.mxu1  ;;  %v4826_v33 = vadd.f32 %v3555_v13, %v1468_v7  ;;  %v1467_v49 = vadd.f32 %v1356_v15, %v4781_v57 }
 0x17a   : > { %v4829_v16 = vadd.f32 %v1590_v29, %v1467_v49  ;;  %v3490_v39 = vpop.f32.mrf.mxu0 }
 0x17b   : > { %v3558_v52 = vpop.f32.mrf.mxu1  ;;  %v1469_v37 = vadd.f32 %v3490_v39, %v4784_v20 }
 0x17c   : > { %v1366_v26 = vpop.f32.mrf.mxu0 }
 0x17d   : > { %v1600_v61 = vpop.f32.mrf.mxu1  ;;  %v4832_v38 = vadd.f32 %v3558_v52, %v1469_v37 }
 0x17f   : > { %v3493_v55 = vpop.f32.mrf.mxu0 }
 0x180   : > { %v3561_v0 = vpop.f32.mrf.mxu1 }
 0x181   : > { %v1375_v48 = vpop.f32.mrf.mxu0 }
 0x182   : > { %v1609_v31 = vpop.f32.mrf.mxu1  ;;  %v1470_v3 = vadd.f32 %v1375_v48, %v4787_v9 }
 0x183   : > { %v3496_v1 = vpop.f32.mrf.mxu0 }
 0x184   : > { %v3564_v22 = vpop.f32.mrf.mxu1  ;;  %v4835_v18 = vadd.f32 %v1609_v31, %v1470_v3  ;;  %v1472_v57 = vadd.f32 %v3496_v1, %v4790_v21 }
 0x185   : > { %v1384_v43 = vpop.f32.mrf.mxu0 }
 0x186   : > { %v1618_v8 = vpop.f32.mrf.mxu1  ;;  %v4838_v32 = vadd.f32 %v3564_v22, %v1472_v57  ;;  %v1471_v20 = vadd.f32 %v1384_v43, %v4793_v25 }
 0x188   : > { %v4841_v53 = vadd.f32 %v1618_v8, %v1471_v20  ;;  %v3499_v46 = vpop.f32.mrf.mxu0 }
 0x189   : > { %v3567_v42 = vpop.f32.mrf.mxu1  ;;  %v1473_v23 = vadd.f32 %v3499_v46, %v4796_v51 }
 0x18a   : > { %v1394_v59 = vpop.f32.mrf.mxu0 }
 0x18b   : > { %v1628_v9 = vpop.f32.mrf.mxu1  ;;  %v4844_v24 = vadd.f32 %v3567_v42, %v1473_v23 }
 0x18d   : > { %v3502_v19 = vpop.f32.mrf.mxu0 }
 0x18e   : > { %v3570_v28 = vpop.f32.mrf.mxu1 }
 0x18f   : > { %v1403_v11 = vpop.f32.mrf.mxu0 }
 0x190   : > { %v1637_v21 = vpop.f32.mrf.mxu1  ;;  %v1474_v50 = vadd.f32 %v1403_v11, %v4799_v36 }
 0x191   : > { %v3505_v47 = vpop.f32.mrf.mxu0 }
 0x192   : > { %v3573_v6 = vpop.f32.mrf.mxu1  ;;  %v4847_v56 = vadd.f32 %v1637_v21, %v1474_v50  ;;  %v1476_v25 = vadd.f32 %v3505_v47, %v4802_v5 }
 0x193   : > { %v1412_v35 = vpop.f32.mrf.mxu0 }
 0x194   : > { %v1646_v14 = vpop.f32.mrf.mxu1  ;;  %v4850_v12 = vadd.f32 %v3573_v6, %v1476_v25  ;;  %v1475_v51 = vadd.f32 %v1412_v35, %v4805_v45 }
 0x196   : > { %v4853_v30 = vadd.f32 %v1646_v14, %v1475_v51  ;;  %v3508_v58 = vpop.f32.mrf.mxu0 }
 0x197   : > { %v3576_v2 = vpop.f32.mrf.mxu1  ;;  %v1477_v10 = vadd.f32 %v3508_v58, %v4808_v60 }
 0x198   : > { %v1422_v34 = vpop.f32.mrf.mxu0 }
 0x199   : > { %v1656_v36 = vpop.f32.mrf.mxu1  ;;  %v4856_v4 = vadd.f32 %v3576_v2, %v1477_v10 }
 0x19b   : > { %v3511_v41 = vpop.f32.mrf.mxu0 }
 0x19c   : > { %v3579_v40 = vpop.f32.mrf.mxu1 }
 0x19d   : > { %v1431_v63 = vpop.f32.mrf.mxu0 }
 0x19e   : > { %v1665_v5 = vpop.f32.mrf.mxu1  ;;  %v1478_v13 = vadd.f32 %v1431_v63, %v4811_v62 }
 0x19f   : > { %v3514_v7 = vpop.f32.mrf.mxu0 }
 0x1a0   : > { %v3582_v15 = vpop.f32.mrf.mxu1  ;;  %v4859_v29 = vadd.f32 %v1665_v5, %v1478_v13  ;;  %v1480_v45 = vadd.f32 %v3514_v7, %v4814_v27 }
 0x1a1   : > { %v1440_v49 = vpop.f32.mrf.mxu0 }
 0x1a2   : > { %v1674_v39 = vpop.f32.mrf.mxu1  ;;  %v4862_v52 = vadd.f32 %v3582_v15, %v1480_v45  ;;  %v1479_v60 = vadd.f32 %v1440_v49, %v4817_v54 }
 0x1a4   : > { %v4865_v37 = vadd.f32 %v1674_v39, %v1479_v60  ;;  %v3517_v26 = vpop.f32.mrf.mxu0 }
 0x1a5   : > { %v3585_v61 = vpop.f32.mrf.mxu1  ;;  %v1481_v55 = vadd.f32 %v3517_v26, %v4820_v17 }
 0x1a6   : > { %v1450_v0 = vpop.f32.mrf.mxu0 }
 0x1a7   : > { %v1684_v62 = vpop.f32.mrf.mxu1  ;;  %v4868_v48 = vadd.f32 %v3585_v61, %v1481_v55 }
 0x1a9   : > { %v3520_v31 = vpop.f32.mrf.mxu0 }
 0x1aa   : > { %v3588_v3 = vpop.f32.mrf.mxu1 }
 0x1ab   : > { %v1459_v1 = vpop.f32.mrf.mxu0 }
 0x1ac   : > { %v1693_v27 = vpop.f32.mrf.mxu1  ;;  %v1482_v22 = vadd.f32 %v1459_v1, %v4823_v44 }
 0x1ad   : > { %v3623_v57 = vpop.f32.mrf.mxu0 }
 0x1ae   : > { %v3691_v43 = vpop.f32.mrf.mxu1  ;;  %v4871_v8 = vadd.f32 %v1693_v27, %v1482_v22  ;;  %v1936_v3 = vadd.f32 %v3623_v57, %v4826_v33 }
 0x1af   : > { %v1824_v54 = vpop.f32.mrf.mxu0 }
 0x1b0   : > { %v2058_v20 = vpop.f32.mrf.mxu1  ;;  %v1935_v27 = vadd.f32 %v1824_v54, %v4829_v16  ;;  %v2170_v16 = vadd.f32 %v3691_v43, %v1936_v3 }
 0x1b2   : > { %v3626_v46 = vpop.f32.mrf.mxu0 }
 0x1b3   : > { %v3694_v42 = vpop.f32.mrf.mxu1  ;;  %v1937_v22 = vadd.f32 %v3626_v46, %v4832_v38  ;;  %v2169_v38 = vadd.f32 %v2058_v20, %v1935_v27 }
 0x1b4   : > { %v1834_v23 = vpop.f32.mrf.mxu0 }
 0x1b5   : > { %v2068_v17 = vpop.f32.mrf.mxu1  ;;  %v2171_v46 = vadd.f32 %v3694_v42, %v1937_v22 }
 0x1b7   : > { %v3629_v59 = vpop.f32.mrf.mxu0 }
 0x1b8   : > { %v3697_v9 = vpop.f32.mrf.mxu1 }
 0x1b9   : > { %v1843_v19 = vpop.f32.mrf.mxu0 }
 0x1ba   : > { %v2077_v28 = vpop.f32.mrf.mxu1  ;;  %v1938_v59 = vadd.f32 %v1843_v19, %v4835_v18 }
 0x1bb   : > { %v3632_v11 = vpop.f32.mrf.mxu0 }
 0x1bc   : > { %v3700_v21 = vpop.f32.mrf.mxu1 }
 0x1bd   : > { %v1852_v50 = vpop.f32.mrf.mxu0 }
 0x1be   : > { %v2086_v47 = vpop.f32.mrf.mxu1 }
 0x1c0   : > { %v3635_v6 = vpop.f32.mrf.mxu0 }
 0x1c1   : > { %v3703_v44 = vpop.f32.mrf.mxu1 }
 0x1c2   : > { %v1862_v25 = vpop.f32.mrf.mxu0 }
 0x1c3   : > { %v2096_v35 = vpop.f32.mrf.mxu1  ;;  %v1940_v25 = vadd.f32 %v3632_v11, %v4838_v32  ;;  %v4896_v32 = vld [vmem:[%s4991_s2] ss:$0 sm:$0xff] }
 0x1c4   : > { %v1939_v35 = vadd.f32 %v1852_v50, %v4841_v53 }
 0x1c5   : > { %v3638_v14 = vpop.f32.mrf.mxu0  ;;  %v4898_v50 = vadd.f32 %v3700_v21, %v1940_v25 }
 0x1c6   : > { %v3706_v51 = vpop.f32.mrf.mxu1  ;;  %v1941_v14 = vadd.f32 %v3635_v6, %v4844_v24  ;;  %v2172_v24 = vadd.f32 %v2077_v28, %v1938_v59  ;;  %v4900_v43 = vadd.f32 %v2086_v47, %v1939_v35 }
 0x1c7   : > { %v1871_v58 = vpop.f32.mrf.mxu0 }
 0x1c8   : > { %v2105_v2 = vpop.f32.mrf.mxu1  ;;  %v1942_v33 = vadd.f32 %v1871_v58, %v4847_v56  ;;  %v4902_v20 = vadd.f32 %v3703_v44, %v1941_v14 }
 0x1c9   : > { %v3641_v10 = vpop.f32.mrf.mxu0 }
 0x1ca   : > { %v3709_v34 = vpop.f32.mrf.mxu1  ;;  %v1944_v1 = vadd.f32 %v3641_v10, %v4850_v12 }
 0x1cb   : > { %v1880_v36 = vpop.f32.mrf.mxu0 }
 0x1cc   : > { %v2114_v41 = vpop.f32.mrf.mxu1  ;;  %v1943_v9 = vadd.f32 %v1880_v36, %v4853_v30  ;;  %v2178_v54 = vadd.f32 %v3709_v34, %v1944_v1 }
 0x1ce   : > { %v3644_v40 = vpop.f32.mrf.mxu0  ;;  %v2177_v56 = vadd.f32 %v2114_v41, %v1943_v9 }
 0x1cf   : > { %v3712_v63 = vpop.f32.mrf.mxu1  ;;  %v1945_v51 = vadd.f32 %v3644_v40, %v4856_v4  ;;  %v4904_v4 = vadd.f32 %v2105_v2, %v1942_v33 }
 0x1d0   : > { %v1890_v5 = vpop.f32.mrf.mxu0 }
 0x1d1   : > { %v2124_v13 = vpop.f32.mrf.mxu1  ;;  %v2179_v34 = vadd.f32 %v3712_v63, %v1945_v51 }
 0x1d3   : > { %v3647_v7 = vpop.f32.mrf.mxu0 }
 0x1d4   : > { %v3715_v15 = vpop.f32.mrf.mxu1 }
 0x1d5   : > { %v1899_v45 = vpop.f32.mrf.mxu0 }
 0x1d6   : > { %v2133_v49 = vpop.f32.mrf.mxu1  ;;  %v1946_v18 = vadd.f32 %v1899_v45, %v4859_v29  ;;  %v4909_v29 = vld [vmem:[%s4992_s3] ss:$0 sm:$0xff] }
 0x1d7   : > { %v3650_v39 = vpop.f32.mrf.mxu0 }
 0x1d8   : > { %v4873_v60 = vpop.f32.mrf.mxu1  ;;  %v2180_v47 = vadd.f32 %v2133_v49, %v1946_v18  ;;  %v1948_v44 = vadd.f32 %v3650_v39, %v4862_v52 }
 0x1d9   : > { %v1908_v26 = vpop.f32.mrf.mxu0 }
 0x1da   : > { %v4875_v61 = vpop.f32.mrf.mxu1  ;;  %v1947_v2 = vadd.f32 %v1908_v26, %v4865_v37  ;;  %v2182_v1 = vadd.f32 %v4873_v60, %v1948_v44 }
 0x1dc   : > { %v3653_v55 = vpop.f32.mrf.mxu0  ;;  %v2181_v27 = vadd.f32 %v4875_v61, %v1947_v2 }
 0x1dd   : > { %v4877_v0 = vpop.f32.mrf.mxu1  ;;  %v1949_v15 = vadd.f32 %v3653_v55, %v4868_v48 }
 0x1de   : > { %v1918_v62 = vpop.f32.mrf.mxu0 }
 0x1df   : > { %v2152_v31 = vpop.f32.mrf.mxu1  ;;  %v2183_v61 = vadd.f32 %v4877_v0, %v1949_v15 }
 0x1e1   : > { %v3656_v23 = vpop.f32.mrf.mxu0 }
 0x1e2   : > { %v3724_v17 = vpop.f32.mrf.mxu1 }
 0x1e3   : > { %v1927_v57 = vpop.f32.mrf.mxu0 }
 0x1e4   : > { %v4889_v12 = vpop.f32.mrf.mxu1  ;;  %v1950_v45 = vadd.f32 %v1927_v57, %v4871_v8 }
 0x1e5   : > { %v3759_v30 = vpop.f32.mrf.mxu0 }
 0x1e6   : > { %v3777_v53 = vpop.f32.mrf.mxu1  ;;  %v2404_v19 = vadd.f32 %v3759_v30, %v2170_v16  ;;  %v4933_v57 = vadd.f32 %v4889_v12, %v1950_v45 }
 0x1e7   : > { %v2412_v11 = vadd.f32 %v3777_v53, %v2178_v54  ;;  %v2292_v42 = vpop.f32.mrf.mxu0 }
 0x1e8   : > { %v2348_v6 = vpop.f32.mrf.mxu1  ;;  %v2427_v28 = vmul.f32 %v4896_v32, %v2404_v19  ;;  %v2403_v10 = vadd.f32 %v2292_v42, %v2169_v38 }
 0x1e9   : > { %v2435_v58 = vmul.f32 %v4896_v32, %v2412_v11  ;;  %v2411_v21 = vadd.f32 %v2348_v6, %v2177_v56  ;;  %v3762_v36 = vpop.f32.mrf.mxu0 }
 0x1ea   : > { %v3780_v41 = vpop.f32.mrf.mxu1  ;;  %v2450_v40 = vadd.f32 %v4909_v29, %v2427_v28  ;;  %v2426_v13 = vmul.f32 %v4896_v32, %v2403_v10  ;;  %v2405_v63 = vadd.f32 %v3762_v36, %v2171_v46 }
 0x1eb   : > { %v2458_v5 = vadd.f32 %v4909_v29, %v2435_v58  ;;  %v2434_v7 = vmul.f32 %v4896_v32, %v2411_v21  ;;  %v2413_v49 = vadd.f32 %v3780_v41, %v2179_v34  ;;  %v2302_v62 = vpop.f32.mrf.mxu0 }
 0x1ec   : > { %v2358_v52 = vpop.f32.mrf.mxu1  ;;  %vm2466_vm0 = vcmp.ge.f32.partialorder %v2450_v40, 0.0  ;;  %v2482_v37 = vmul.f32 0.01, %v2450_v40  ;;  %v2449_v26 = vadd.f32 %v4909_v29, %v2426_v13  ;;  %v2428_v3 = vmul.f32 %v4896_v32, %v2405_v63 }
 0x1ed   : > { %vm2474_vm1 = vcmp.ge.f32.partialorder %v2458_v5, 0.0  ;;  %v2490_v39 = vmul.f32 0.01, %v2458_v5  ;;  %v2457_v31 = vadd.f32 %v4909_v29, %v2434_v7  ;;  %v2436_v48 = vmul.f32 %v4896_v32, %v2413_v49  ;;  %v3765_v55 = vpop.f32.mrf.mxu0 }
 0x1ee   : > { %v3783_v8 = vpop.f32.mrf.mxu1  ;;  %v2498_v22 = vsel %vm2466_vm0, %v2450_v40, %v2482_v37  ;;  %vm2465_vm2 = vcmp.ge.f32.partialorder %v2449_v26, 0.0  ;;  %v2481_v17 = vmul.f32 0.01, %v2449_v26  ;;  %v2451_v35 = vadd.f32 %v4909_v29, %v2428_v3 }
 0x1ef   : > { %v2506_v23 = vsel %vm2474_vm1, %v2458_v5, %v2490_v39  ;;  %2514 = vst [vmem:[%s3976_s9 + $0x8] sm:$0xff] %v2498_v22  ;;  %vm2473_vm3 = vcmp.ge.f32.partialorder %v2457_v31, 0.0  ;;  %v2489_v59 = vmul.f32 0.01, %v2457_v31  ;;  %v2311_v9 = vpop.f32.mrf.mxu0  ;;  %v2459_v14 = vadd.f32 %v4909_v29, %v2436_v48 }
 0x1f0   : > { %2522 = vst [vmem:[%s3976_s9 + $0x48] sm:$0xff] %v2506_v23  ;;  %v2367_v25 = vpop.f32.mrf.mxu1  ;;  %v2406_v33 = vadd.f32 %v2311_v9, %v2172_v24  ;;  %v2497_v16 = vsel %vm2465_vm2, %v2449_v26, %v2481_v17  ;;  %vm2467_vm4 = vcmp.ge.f32.partialorder %v2451_v35, 0.0  ;;  %v2483_v51 = vmul.f32 0.01, %v2451_v35 }
 0x1f1   : > { %v2414_v60 = vadd.f32 %v2367_v25, %v2180_v47  ;;  %v2505_v54 = vsel %vm2473_vm3, %v2457_v31, %v2489_v59  ;;  %v3768_v38 = vpop.f32.mrf.mxu0  ;;  %2513 = vst [vmem:[%s3976_s9] sm:$0xff] %v2497_v16  ;;  %vm2475_vm5 = vcmp.ge.f32.partialorder %v2459_v14, 0.0  ;;  %v2491_v18 = vmul.f32 0.01, %v2459_v14 }
 0x1f2   : > { %v3786_v46 = vpop.f32.mrf.mxu1  ;;  %2521 = vst [vmem:[%s3976_s9 + $0x40] sm:$0xff] %v2505_v54  ;;  %v2429_v30 = vmul.f32 %v4896_v32, %v2406_v33  ;;  %v2408_v0 = vadd.f32 %v3768_v38, %v4898_v50  ;;  %v2499_v19 = vsel %vm2467_vm4, %v2451_v35, %v2483_v51 }
 0x1f3   : > { %v2437_v53 = vmul.f32 %v4896_v32, %v2414_v60  ;;  %v2416_v12 = vadd.f32 %v3786_v46, %v2182_v1  ;;  %v2320_v24 = vpop.f32.mrf.mxu0  ;;  %v2507_v11 = vsel %vm2475_vm5, %v2459_v14, %v2491_v18  ;;  %2515 = vst [vmem:[%s3976_s9 + $0x10] sm:$0xff] %v2499_v19 }
 0x1f4   : > { %v2376_v56 = vpop.f32.mrf.mxu1  ;;  %v2407_v42 = vadd.f32 %v2320_v24, %v4900_v43  ;;  %2523 = vst [vmem:[%s3976_s9 + $0x50] sm:$0xff] %v2507_v11  ;;  %v2452_v28 = vadd.f32 %v4909_v29, %v2429_v30  ;;  %v2431_v10 = vmul.f32 %v4896_v32, %v2408_v0 }
 0x1f5   : > { %v2415_v6 = vadd.f32 %v2376_v56, %v2181_v27  ;;  %v2460_v58 = vadd.f32 %v4909_v29, %v2437_v53  ;;  %v2439_v21 = vmul.f32 %v4896_v32, %v2416_v12  ;;  %v3771_v34 = vpop.f32.mrf.mxu0 }
 0x1f6   : > { %v3789_v50 = vpop.f32.mrf.mxu1  ;;  %v2430_v47 = vmul.f32 %v4896_v32, %v2407_v42  ;;  %v2409_v2 = vadd.f32 %v3771_v34, %v4902_v20  ;;  %vm2468_vm6 = vcmp.ge.f32.partialorder %v2452_v28, 0.0  ;;  %v2484_v36 = vmul.f32 0.01, %v2452_v28 }
 0x1f7   : > { %v2438_v44 = vmul.f32 %v4896_v32, %v2415_v6  ;;  %v2417_v43 = vadd.f32 %v3789_v50, %v2183_v61  ;;  %vm2476_vm7 = vcmp.ge.f32.partialorder %v2460_v58, 0.0  ;;  %v2492_v41 = vmul.f32 0.01, %v2460_v58  ;;  %v2330_v40 = vpop.f32.mrf.mxu0 }
 0x1f8   : > { %v2386_v5 = vpop.f32.mrf.mxu1  ;;  %v2454_v13 = vadd.f32 %v4909_v29, %v2431_v10  ;;  %v2462_v7 = vadd.f32 %v4909_v29, %v2439_v21  ;;  %v2453_v15 = vadd.f32 %v4909_v29, %v2430_v47  ;;  %v2500_v63 = vsel %vm2468_vm6, %v2452_v28, %v2484_v36 }
 0x1f9   : > { %v2461_v45 = vadd.f32 %v4909_v29, %v2438_v44  ;;  %v2508_v49 = vsel %vm2476_vm7, %v2460_v58, %v2492_v41  ;;  %v2432_v20 = vmul.f32 %v4896_v32, %v2409_v2  ;;  %v2440_v62 = vmul.f32 %v4896_v32, %v2417_v43  ;;  %v3774_v52 = vpop.f32.mrf.mxu0  ;;  %2516 = vst [vmem:[%s3976_s9 + $0x18] sm:$0xff] %v2500_v63 }
 0x1fa   : > { %v3792_v37 = vpop.f32.mrf.mxu1  ;;  %2524 = vst [vmem:[%s3976_s9 + $0x58] sm:$0xff] %v2508_v49  ;;  %vm2470_vm8 = vcmp.ge.f32.partialorder %v2454_v13, 0.0  ;;  %v2486_v39 = vmul.f32 0.01, %v2454_v13  ;;  %vm2478_vm9 = vcmp.ge.f32.partialorder %v2462_v7, 0.0  ;;  %vm2469_vm10 = vcmp.ge.f32.partialorder %v2453_v15, 0.0 }
 0x1fb   : > { %v2494_v26 = vmul.f32 0.01, %v2462_v7  ;;  %v2485_v31 = vmul.f32 0.01, %v2453_v15  ;;  %vm2477_vm11 = vcmp.ge.f32.partialorder %v2461_v45, 0.0  ;;  %v2339_v48 = vpop.f32.mrf.mxu0  ;;  %v2455_v27 = vadd.f32 %v4909_v29, %v2432_v20 }
 0x1fc   : > { %v2493_v3 = vmul.f32 0.01, %v2461_v45  ;;  %v2395_v55 = vpop.f32.mrf.mxu1  ;;  %v2502_v8 = vsel %vm2470_vm8, %v2454_v13, %v2486_v39  ;;  %v2463_v22 = vadd.f32 %v4909_v29, %v2440_v62  ;;  %v2410_v59 = vadd.f32 %v2339_v48, %v4904_v4 }
 0x1fd   : > { %v2510_v1 = vsel %vm2478_vm9, %v2462_v7, %v2494_v26  ;;  %2518 = vst [vmem:[%s3976_s9 + $0x28] sm:$0xff] %v2502_v8  ;;  %v2501_v23 = vsel %vm2469_vm10, %v2453_v15, %v2485_v31  ;;  %v2418_v9 = vadd.f32 %v2395_v55, %v4933_v57  ;;  %vm2471_vm12 = vcmp.ge.f32.partialorder %v2455_v27, 0.0 }
 0x1fe   : > { %2526 = vst [vmem:[%s3976_s9 + $0x68] sm:$0xff] %v2510_v1  ;;  %v2509_v17 = vsel %vm2477_vm11, %v2461_v45, %v2493_v3  ;;  %2517 = vst [vmem:[%s3976_s9 + $0x20] sm:$0xff] %v2501_v23  ;;  %v2487_v25 = vmul.f32 0.01, %v2455_v27  ;;  %vm2479_vm13 = vcmp.ge.f32.partialorder %v2463_v22, 0.0  ;;  %v2433_v14 = vmul.f32 %v4896_v32, %v2410_v59 }
 0x1ff   : > { %2525 = vst [vmem:[%s3976_s9 + $0x60] sm:$0xff] %v2509_v17  ;;  %v2495_v35 = vmul.f32 0.01, %v2463_v22  ;;  %v2441_v33 = vmul.f32 %v4896_v32, %v2418_v9 }
 0x200   : > { %v2503_v60 = vsel %vm2471_vm12, %v2455_v27, %v2487_v25  ;;  %v2456_v4 = vadd.f32 %v4909_v29, %v2433_v14 }
 0x201   : > { %v2511_v61 = vsel %vm2479_vm13, %v2463_v22, %v2495_v35  ;;  %2519 = vst [vmem:[%s3976_s9 + $0x30] sm:$0xff] %v2503_v60  ;;  %v2464_v57 = vadd.f32 %v4909_v29, %v2441_v33 }
 0x202   : > { %2527 = vst [vmem:[%s3976_s9 + $0x70] sm:$0xff] %v2511_v61  ;;  %vm2472_vm14 = vcmp.ge.f32.partialorder %v2456_v4, 0.0  ;;  %v2488_v16 = vmul.f32 0.01, %v2456_v4 }
 0x203   : > { %vm2480_vm15 = vcmp.ge.f32.partialorder %v2464_v57, 0.0  ;;  %v2496_v54 = vmul.f32 0.01, %v2464_v57 }
 0x204   : > { %v2504_v38 = vsel %vm2472_vm14, %v2456_v4, %v2488_v16 }
 0x205   : > { %v2512_v46 = vsel %vm2480_vm15, %v2464_v57, %v2496_v54  ;;  %2520 = vst [vmem:[%s3976_s9 + $0x38] sm:$0xff] %v2504_v38 }
 0x206   : > { %2528 = vst [vmem:[%s3976_s9 + $0x78] sm:$0xff] %v2512_v46 }
 0x207 PF: > { %s14_s19 = sadd.s32 1, %s3906_s19   ;;  %s4994_s15 = smov %s3898_s17 }
 0x208   : > { %p11_p7 = scmp.ge.s32.totalorder %s14_s19, 6   ;;  %s4995_s16 = smov %s3902_s18 }
 0x209   : > { %s4996_s17 = smov %s4999_s20  ;;  %s4997_s18 = smov %s5003_s21 }
 0x20a   :  { %13 = sbr.rel (!%p11_p7) target bundleno = 3 (0x3), region = 119 }
 0x20f   :  { %2567 = vsyncmov [#allocation3] }
 0x212   :  { %s2568_s9 = vpop.sfrf %2567 }
 0x213   :  { %p2820_p8 = scmp.ne.s32.totalorder %s2568_s9, 0 }
 0x215   :  { %2572 = shalt.err (%p2820_p8)  }

</bundles_post_ra>
